<compile_context>
chip_gen: v7x
topology: tpu7x:2x2x1
jax: 0.10.0
libtpu: 0.0.40
codegen_flags: <defaults>
</compile_context>

<pallas_src>
import functools

import jax
import jax.numpy as jnp
from jax.experimental import pallas as pl
from jax.experimental.pallas import tpu as pltpu


def _round_up(v, m):
    return (v + m - 1) // m * m


def _sigmoid(v):
    # Same formula in kernel and reference so the self-check is tight.
    return 1.0 / (1.0 + jnp.exp(-v))


def _gating_kernel(x_ref, w_ref, b_ref, alpha_ref, out_ref, *,
                   num_experts, top_k, route_scale, score_func, has_ppr):
    """One batch tile: scores -> sigmoid/softmax -> top-k -> packed lane-dense output."""
    x = x_ref[...].astype(jnp.float32)           # (TM, D)     f32 (no feature padding)
    w = w_ref[...]                               # (D, E_pad)  f32, VMEM-resident
    b = b_ref[...]                               # (1, E_pad)  f32, VMEM-resident
    alpha = alpha_ref[0, 0]                      # f32 scalar from SMEM

    # x @ expert_vector.T on the MXU, f32 accumulation.
    s = jnp.dot(x, w, preferred_element_type=jnp.float32)    # (TM, E_pad)

    if has_ppr:
        # alpha*(s+b) + (1-alpha)*s == s + alpha*b
        final = s + alpha * b
    else:
        # structure_scores == 0 (default ppr_values=None path)
        final = alpha * (s + b)

    tm, e_pad = final.shape
    col = jax.lax.broadcasted_iota(jnp.int32, (tm, e_pad), 1)
    valid = col < num_experts                    # mask the lane-padding columns

    if score_func == "softmax":
        masked = jnp.where(valid, final, -jnp.inf)
        mx = jnp.max(masked, axis=-1, keepdims=True)
        ex = jnp.where(valid, jnp.exp(masked - mx), 0.0)
        scores = ex / jnp.sum(ex, axis=-1, keepdims=True)
    elif score_func == "sigmoid":
        scores = _sigmoid(final)
    else:
        raise ValueError(f"Unsupported score function: {score_func}")

    # Iterative top-k (top_k is small & static): argmax, record, mask, repeat.
    # Leftmost-index tie-break matches jax.lax.top_k.
    neg = jnp.float32(-1e30)
    work = jnp.where(valid, scores, neg)
    sparse = jnp.zeros((tm, e_pad), jnp.float32)
    topk_sum = jnp.zeros((tm, 1), jnp.float32)
    idx_cols = []
    for _ in range(top_k):
        vmax = jnp.max(work, axis=-1, keepdims=True)                       # (TM, 1)
        idx = jnp.min(jnp.where(work == vmax, col, e_pad), axis=-1,
                      keepdims=True)                                        # leftmost argmax
        sel = col == idx
        sparse = sparse + jnp.where(sel, vmax, 0.0)                         # dense scatter
        topk_sum = topk_sum + vmax
        idx_cols.append(idx)
        work = jnp.where(sel, neg, work)

    if score_func == "sigmoid":
        # approx reciprocal goes to the otherwise-idle EUP slot; zeros stay zero.
        sparse = sparse * pl.reciprocal(topk_sum + 1e-6, approx=True)
    if route_scale != 1.0:                       # statically skipped when == 1.0
        sparse = sparse * route_scale

    # Pack the top-k indices into the unused padded lanes [e, e+top_k) of the same
    # lane-dense f32 tile (small ints are exact in f32) -> one unmasked 128-lane store.
    packed = sparse
    for j, idx in enumerate(idx_cols):
        packed = jnp.where(col == (num_experts + j), idx.astype(jnp.float32), packed)

    out_ref[...] = packed.astype(out_ref.dtype)


def sparse_gating_forward(x, expert_vector, bias, alpha, *, top_k, route_scale=1.0,
                          score_func="sigmoid", has_ppr=False, block_m=4096):
    """Pallas forward for SparseGatingNetwork.forward(x, edge_index, ppr_values=None)."""
    n, d = x.shape
    e, d2 = expert_vector.shape
    assert d == d2, "expert_vector must be (num_experts, input_dim)"
    assert 1 <= top_k <= e

    # Lane-dense expert dim, with room for the packed top-k index lanes.
    e_pad = _round_up(e + top_k, 128)

    # >=2 grid steps when possible (v7x dual-TC), as large as the cap allows otherwise
    # (amortizes per-step overhead on single-TC v5e/v6e).  Footprint ~1.5 KiB/row, well
    # under every generation's scoped-VMEM default, so no vmem_limit_bytes needed.
    block_m = max(8, min(block_m, _round_up(pl.cdiv(n, 2), 8)))
    n_pad = _round_up(n, block_m)

    # x stays in its original dtype and feature width; pad rows only if required.
    x_in = x if n_pad == n else jnp.zeros((n_pad, d), x.dtype).at[:n].set(x)
    w_p = jnp.zeros((d, e_pad), jnp.float32).at[:, :e].set(
        expert_vector.T.astype(jnp.float32))
    b_p = jnp.zeros((1, e_pad), jnp.float32).at[0, :e].set(bias.astype(jnp.float32))
    alpha_p = jnp.asarray(alpha, jnp.float32).reshape(1, 1)

    kernel = functools.partial(
        _gating_kernel, num_experts=e, top_k=top_k, route_scale=float(route_scale),
        score_func=score_func, has_ppr=has_ppr)

    packed = pl.pallas_call(
        kernel,
        grid=(n_pad // block_m,),
        in_specs=[
            pl.BlockSpec((block_m, d), lambda i: (i, 0)),                 # x: unpadded features
            pl.BlockSpec((d, e_pad), lambda i: (0, 0)),                   # W^T: VMEM-resident
            pl.BlockSpec((1, e_pad), lambda i: (0, 0)),                   # bias: VMEM-resident
            pl.BlockSpec((1, 1), lambda i: (0, 0),
                         memory_space=pltpu.MemorySpace.SMEM),            # alpha scalar
        ],
        out_specs=pl.BlockSpec((block_m, e_pad), lambda i: (i, 0)),       # single lane-dense out
        out_shape=jax.ShapeDtypeStruct((n_pad, e_pad), jnp.float32),
        compiler_params=pltpu.CompilerParams(
            dimension_semantics=("parallel",)),                           # megacore / 2-TC sharding
    )(x_in, w_p, b_p, alpha_p)

    sparse = packed[:n, :e]
    top_k_indices = packed[:n, e:e + top_k].astype(jnp.int32)
    return sparse, top_k_indices


def reference_forward(x, expert_vector, bias, alpha, *, top_k, route_scale=1.0,
                      score_func="sigmoid", has_ppr=False):
    """Pure-JAX f32 reference mirroring the PyTorch forward."""
    s = jnp.dot(x.astype(jnp.float32), expert_vector.T.astype(jnp.float32),
                preferred_element_type=jnp.float32)
    semantic = s + bias[None, :].astype(jnp.float32)
    structure = s if has_ppr else jnp.zeros_like(s)
    final = alpha * semantic + (1.0 - alpha) * structure
    if score_func == "softmax":
        scores = jax.nn.softmax(final, axis=-1)
    else:
        scores = _sigmoid(final)
    w, idx = jax.lax.top_k(scores, top_k)
    if score_func == "sigmoid":
        w = w / (jnp.sum(w, axis=-1, keepdims=True) + 1e-6)
    w = w * route_scale
    sparse = jnp.zeros_like(scores).at[jnp.arange(x.shape[0])[:, None], idx].set(w)
    return sparse, idx


if __name__ == "__main__":
    key = jax.random.PRNGKey(0)
    k_x, k_w, k_b = jax.random.split(key, 3)

    n, input_dim = 512, 64
    num_experts, top_k = 8, 2
    route_scale = 1.0

    x = jax.random.normal(k_x, (n, input_dim), jnp.float32)
    bound = (3.0 / input_dim) ** 0.5             # kaiming_uniform_, nonlinearity='linear'
    expert_vector = jax.random.uniform(k_w, (num_experts, input_dim), jnp.float32,
                                       -bound, bound)
    bias = 0.1 * jax.random.normal(k_b, (num_experts,), jnp.float32)
    alpha = jnp.float32(0.5)

    sparse_w, topk_idx = sparse_gating_forward(
        x, expert_vector, bias, alpha, top_k=top_k, route_scale=route_scale,
        score_func="sigmoid", has_ppr=False)
    sparse_w, topk_idx = jax.block_until_ready((sparse_w, topk_idx))

    ref_sparse, ref_idx = reference_forward(
        x, expert_vector, bias, alpha, top_k=top_k, route_scale=route_scale,
        score_func="sigmoid", has_ppr=False)

    assert sparse_w.shape == (n, num_experts)
    assert topk_idx.shape == (n, top_k)
    assert jnp.allclose(sparse_w, ref_sparse, atol=2e-3, rtol=2e-3), "sparse_weights mismatch"
    assert jnp.array_equal(topk_idx, ref_idx), "top_k_indices mismatch"

    print("KERNEL_OK")
</pallas_src>

<mosaic_0001>
module attributes {stable_mosaic.version = 11 : i64} {
  func.func @_gating_kernel(%arg0: i32, %arg1: memref<256x64xf32, #tpu.memory_space<vmem>>, %arg2: memref<64x128xf32, #tpu.memory_space<vmem>>, %arg3: memref<1x128xf32, #tpu.memory_space<vmem>>, %arg4: memref<1x1xf32, #tpu.memory_space<smem>>, %arg5: memref<256x128xf32, #tpu.memory_space<vmem>>) attributes {dimension_semantics = [#tpu.dimension_semantics<parallel>], iteration_bounds = array<i64: 2>, scalar_prefetch = 0 : i64, scratch_operands = 0 : i64, tpu.core_type = #tpu.core_type<tc>, window_params = [{transform_indices = @transform_0, window_bounds = array<i64: 256, 64>}, {pipeline_mode = #tpu.pipeline_mode<synchronous>, transform_indices = @transform_1, window_bounds = array<i64: 64, 128>}, {pipeline_mode = #tpu.pipeline_mode<synchronous>, transform_indices = @transform_2, window_bounds = array<i64: 1, 128>}, {transform_indices = @transform_3, window_bounds = array<i64: 1, 1>}, {transform_indices = @transform_4, window_bounds = array<i64: 256, 128>}]} {
    %c0 = arith.constant 0 : index
    %c0_0 = arith.constant 0 : index
    %0 = vector.load %arg1[%c0, %c0_0] : memref<256x64xf32, #tpu.memory_space<vmem>>, vector<256x64xf32>
    %c0_1 = arith.constant 0 : index
    %c0_2 = arith.constant 0 : index
    %1 = vector.load %arg2[%c0_1, %c0_2] : memref<64x128xf32, #tpu.memory_space<vmem>>, vector<64x128xf32>
    %c0_3 = arith.constant 0 : index
    %c0_4 = arith.constant 0 : index
    %2 = vector.load %arg3[%c0_3, %c0_4] : memref<1x128xf32, #tpu.memory_space<vmem>>, vector<1x128xf32>
    %c0_5 = arith.constant 0 : index
    %c0_6 = arith.constant 0 : index
    %3 = memref.load %arg4[%c0_5, %c0_6] : memref<1x1xf32, #tpu.memory_space<smem>>
    %cst = arith.constant dense<0.000000e+00> : vector<256x128xf32>
    %4 = tpu.matmul %0, %1, %cst {dimension_numbers = #tpu.dot_dimension_numbers<[1], [0], [0], [1], [0, 0, 1, 1], [], []>} : vector<256x64xf32>, vector<64x128xf32>, vector<256x128xf32> -> vector<256x128xf32>
    %5 = vector.broadcast %2 : vector<1x128xf32> to vector<256x128xf32>
    %6 = arith.addf %4, %5 : vector<256x128xf32>
    %7 = vector.broadcast %3 : f32 to vector<256x128xf32>
    %8 = arith.mulf %7, %6 : vector<256x128xf32>
    %9 = tpu.iota {dimensions = array<i32: 1>} : vector<256x128xi32>
    %c8_i32 = arith.constant 8 : i32
    %10 = vector.broadcast %c8_i32 : i32 to vector<256x128xi32>
    %11 = arith.cmpi slt, %9, %10 : vector<256x128xi32>
    %cst_7 = arith.constant 0.000000e+00 : f32
    %12 = vector.broadcast %cst_7 : f32 to vector<256x128xf32>
    %13 = arith.subf %12, %8 : vector<256x128xf32>
    %14 = math.exp %13 : vector<256x128xf32>
    %cst_8 = arith.constant 1.000000e+00 : f32
    %15 = vector.broadcast %cst_8 : f32 to vector<256x128xf32>
    %16 = arith.addf %15, %14 : vector<256x128xf32>
    %cst_9 = arith.constant 1.000000e+00 : f32
    %17 = vector.broadcast %cst_9 : f32 to vector<256x128xf32>
    %18 = arith.divf %17, %16 : vector<256x128xf32>
    %cst_10 = arith.constant -1.000000e+30 : f32
    %19 = vector.broadcast %cst_10 : f32 to vector<256x128xf32>
    %20 = arith.select %11, %18, %19 : vector<256x128xi1>, vector<256x128xf32>
    %cst_11 = arith.constant 0.000000e+00 : f32
    %21 = vector.broadcast %cst_11 : f32 to vector<256x128xf32>
    %cst_12 = arith.constant 0.000000e+00 : f32
    %22 = vector.broadcast %cst_12 : f32 to vector<256x1xf32>
    %cst_13 = arith.constant dense<0xFF800000> : vector<256xf32>
    %23 = vector.multi_reduction <maximumf>, %20, %cst_13 [1] : vector<256x128xf32> to vector<256xf32>
    %24 = vector.shape_cast %23 : vector<256xf32> to vector<256x1xf32>
    %25 = vector.broadcast %24 : vector<256x1xf32> to vector<256x128xf32>
    %26 = arith.cmpf oeq, %20, %25 : vector<256x128xf32>
    %c128_i32 = arith.constant 128 : i32
    %27 = vector.broadcast %c128_i32 : i32 to vector<256x128xi32>
    %28 = arith.select %26, %9, %27 : vector<256x128xi1>, vector<256x128xi32>
    %cst_14 = arith.constant dense<2147483647> : vector<256xi32>
    %29 = vector.multi_reduction <minsi>, %28, %cst_14 [1] : vector<256x128xi32> to vector<256xi32>
    %30 = vector.shape_cast %29 : vector<256xi32> to vector<256x1xi32>
    %31 = vector.broadcast %30 : vector<256x1xi32> to vector<256x128xi32>
    %32 = arith.cmpi eq, %9, %31 : vector<256x128xi32>
    %cst_15 = arith.constant 0.000000e+00 : f32
    %33 = vector.shape_cast %24 : vector<256x1xf32> to vector<256x1xf32>
    %34 = vector.broadcast %33 : vector<256x1xf32> to vector<256x128xf32>
    %35 = vector.broadcast %cst_15 : f32 to vector<256x128xf32>
    %36 = arith.select %32, %34, %35 : vector<256x128xi1>, vector<256x128xf32>
    %37 = arith.addf %21, %36 : vector<256x128xf32>
    %38 = arith.addf %22, %24 : vector<256x1xf32>
    %cst_16 = arith.constant -1.000000e+30 : f32
    %39 = vector.broadcast %cst_16 : f32 to vector<256x128xf32>
    %40 = arith.select %32, %39, %20 : vector<256x128xi1>, vector<256x128xf32>
    %cst_17 = arith.constant dense<0xFF800000> : vector<256xf32>
    %41 = vector.multi_reduction <maximumf>, %40, %cst_17 [1] : vector<256x128xf32> to vector<256xf32>
    %42 = vector.shape_cast %41 : vector<256xf32> to vector<256x1xf32>
    %43 = vector.broadcast %42 : vector<256x1xf32> to vector<256x128xf32>
    %44 = arith.cmpf oeq, %40, %43 : vector<256x128xf32>
    %c128_i32_18 = arith.constant 128 : i32
    %45 = vector.broadcast %c128_i32_18 : i32 to vector<256x128xi32>
    %46 = arith.select %44, %9, %45 : vector<256x128xi1>, vector<256x128xi32>
    %cst_19 = arith.constant dense<2147483647> : vector<256xi32>
    %47 = vector.multi_reduction <minsi>, %46, %cst_19 [1] : vector<256x128xi32> to vector<256xi32>
    %48 = vector.shape_cast %47 : vector<256xi32> to vector<256x1xi32>
    %49 = vector.broadcast %48 : vector<256x1xi32> to vector<256x128xi32>
    %50 = arith.cmpi eq, %9, %49 : vector<256x128xi32>
    %cst_20 = arith.constant 0.000000e+00 : f32
    %51 = vector.shape_cast %42 : vector<256x1xf32> to vector<256x1xf32>
    %52 = vector.broadcast %51 : vector<256x1xf32> to vector<256x128xf32>
    %53 = vector.broadcast %cst_20 : f32 to vector<256x128xf32>
    %54 = arith.select %50, %52, %53 : vector<256x128xi1>, vector<256x128xf32>
    %55 = arith.addf %37, %54 : vector<256x128xf32>
    %56 = arith.addf %38, %42 : vector<256x1xf32>
    %cst_21 = arith.constant 9.99999997E-7 : f32
    %57 = vector.broadcast %cst_21 : f32 to vector<256x1xf32>
    %58 = arith.addf %56, %57 : vector<256x1xf32>
    %59 = tpu.reciprocal %58 {approx = true} : vector<256x1xf32> -> vector<256x1xf32>
    %60 = vector.broadcast %59 : vector<256x1xf32> to vector<256x128xf32>
    %61 = arith.mulf %55, %60 : vector<256x128xf32>
    %c8_i32_22 = arith.constant 8 : i32
    %62 = vector.broadcast %c8_i32_22 : i32 to vector<256x128xi32>
    %63 = arith.cmpi eq, %9, %62 : vector<256x128xi32>
    %64 = arith.sitofp %30 : vector<256x1xi32> to vector<256x1xf32>
    %65 = vector.shape_cast %64 : vector<256x1xf32> to vector<256x1xf32>
    %66 = vector.broadcast %65 : vector<256x1xf32> to vector<256x128xf32>
    %67 = arith.select %63, %66, %61 : vector<256x128xi1>, vector<256x128xf32>
    %c9_i32 = arith.constant 9 : i32
    %68 = vector.broadcast %c9_i32 : i32 to vector<256x128xi32>
    %69 = arith.cmpi eq, %9, %68 : vector<256x128xi32>
    %70 = arith.sitofp %48 : vector<256x1xi32> to vector<256x1xf32>
    %71 = vector.shape_cast %70 : vector<256x1xf32> to vector<256x1xf32>
    %72 = vector.broadcast %71 : vector<256x1xf32> to vector<256x128xf32>
    %73 = arith.select %69, %72, %67 : vector<256x128xi1>, vector<256x128xf32>
    %c0_23 = arith.constant 0 : index
    %c0_24 = arith.constant 0 : index
    %74 = vector.load %arg5[%c0_23, %c0_24] : memref<256x128xf32, #tpu.memory_space<vmem>>, vector<256x128xf32>
    tpu.vector_store %arg5[%c0_23, %c0_24], %73 {strides = array<i32>} : memref<256x128xf32, #tpu.memory_space<vmem>>, vector<256x128xf32>,
    return
  }
  func.func @transform_0(%arg0: i32) -> (i32, i32) {
    %c0_i32 = arith.constant 0 : i32
    %c0_i32_0 = arith.constant 0 : i32
    return %arg0, %c0_i32 : i32, i32
  }
  func.func @transform_1(%arg0: i32) -> (i32, i32) {
    %c0_i32 = arith.constant 0 : i32
    %c0_i32_0 = arith.constant 0 : i32
    %c0_i32_1 = arith.constant 0 : i32
    return %c0_i32, %c0_i32_0 : i32, i32
  }
  func.func @transform_2(%arg0: i32) -> (i32, i32) {
    %c0_i32 = arith.constant 0 : i32
    %c0_i32_0 = arith.constant 0 : i32
    %c0_i32_1 = arith.constant 0 : i32
    return %c0_i32, %c0_i32_0 : i32, i32
  }
  func.func @transform_3(%arg0: i32) -> (i32, i32) {
    %c0_i32 = arith.constant 0 : i32
    %c0_i32_0 = arith.constant 0 : i32
    %c0_i32_1 = arith.constant 0 : i32
    return %c0_i32, %c0_i32_0 : i32, i32
  }
  func.func @transform_4(%arg0: i32) -> (i32, i32) {
    %c0_i32 = arith.constant 0 : i32
    %c0_i32_0 = arith.constant 0 : i32
    return %arg0, %c0_i32 : i32, i32
  }
}

</mosaic_0001>

<bundles_post_ra>
// kernel: tpu_custom_call.1
= control target key start
LH: loop header
LB: loop body
LE: loop exit
PB: predicated region body
PF: predicated region fallthrough
CT: control target
= control target key end

     0   :  { %s5779_s0 = inlined_call_operand.vmem [shape: f32[512,64], index: 0, kind: input, shape index: {}]   ;;  %s5780_s1 = inlined_call_operand.vmem [shape: f32[64,128], index: 1, kind: input, shape index: {}]   ;;  %s5781_s2 = inlined_call_operand.vmem [shape: f32[1,128], index: 2, kind: input, shape index: {}]   ;;  %s5782_s3 = inlined_call_operand.<no memory space> [shape: f32[1,1], index: 3, kind: input, shape index: {}]   ;;  %s5783_s4 = inlined_call_operand.hbm [shape: f32[512,128], index: 4, kind: output, shape index: {}]  }
   0x1   :  { %9 = sst [smem:[#allocation2]] %s5782_s3 }
   0x2   :  { %10 = vsyncpa [#allocation4], 0 }
   0x3   :  { %12 = vsyncpa [#allocation4 + $0x1], 0  ;;  %s3106_s17 = smov 0   ;;  %s3108_s18 = smov 0  }
   0x4   :  { %s3110_s19 = smov 0   ;;  %s3112_s20 = smov 0  }
   0x5 LB: > { %s3127_s3 = sadd.s32 4294967295, %s3073_s20   ;;  %s2604_s21 = sadd.s32 4294967294, %s3073_s20   ;;  %s3073_s20 = sphi %s3112_s20, %s6594_s20   ;;  %s3069_s19 = sphi %s3110_s19, %s6593_s19   ;;  %s3065_s18 = sphi %s3108_s18, %s6592_s18   ;;  %s3061_s17 = sphi %s3106_s17, %s6591_s17  }
   0x6   : > { %s3131_s22 = sadd.s32 1, %s3073_s20   ;;  %s114_s23 = sadd.s32 1, %s3069_s19 }
   0x7   : > { %s111_s24 = ssub.s32 %s3073_s20, %s3131_s22  ;;  %p124_p0 = scmp.ne.s32.totalorder %s3069_s19, %s3065_s18 }
   0x8   : > { %p112_p1 = scmp.eq.s32.totalorder %s111_s24, 0  ;;  %p125_p2 = scmp.eq.s32.totalorder %s3127_s3, 1 }
   0x9   : > { %p130_p3 = scmp.ne.s32.totalorder %s3065_s18, %s3061_s17  ;;  %p131_p4 = scmp.eq.s32.totalorder %s2604_s21, 1 }
   0xa   : > { %s3142_s25 = scalar_select %p112_p1, %s3069_s19, %s114_s23  }
   0xb   : > { %p3144_p5 = por %p125_p2, %p124_p0  ;;  %p3148_p6 = por %p131_p4, %p130_p3 }
   0xc   : > { %p2607_p7 = scmp.ge.s32.totalorder %s3073_s20, 1  ;;  %p167_p8 = scmp.lt.s32.totalorder %s3073_s20, 3 }
   0xe   : > { %p168_p9 = pnand %p2607_p7, %p167_p8 }
  0x10   : > { %171 = sbr.rel (%p168_p9) target bundleno = 1267 (0x4f3), region = 36 }
  0x17   : > { %v232_v0 = vld [vmem:[%s5780_s1] sm:$0xff]  ;;  %v233_v1 = vld [vmem:[%s5780_s1 + $0x8] sm:$0xff]  ;;  %v234_v2 = vld [vmem:[%s5780_s1 + $0x10] sm:$0xff]  ;;  %s2609_s8 = sshll.u32 %s3127_s3, 5  ;;  %vm248_vm0 = vcmask 523264   ;;  %s241_s5 = sld [smem:[#allocation2]]  ;;  %v603_v60 = vlaneseq }
  0x18   : > { %v2754_v3 = vpack.c.bf16 %v233_v1, %v232_v0  ;;  %v235_v4 = vld [vmem:[%s5780_s1 + $0x18] sm:$0xff]  ;;  %p194_p10 = scmp.lt.s32.totalorder %s2609_s8, 63  ;;  %v236_v6 = vld [vmem:[%s5780_s1 + $0x20] sm:$0xff]  ;;  %v237_v7 = vld [vmem:[%s5780_s1 + $0x28] sm:$0xff]  ;;  %s2649_s11 = sshll.u32 %s3127_s3, 12 }
  0x19   : > { %v2758_v5 = vpack.c.bf16 %v235_v4, %v234_v2  ;;  %v2762_v8 = vpack.c.bf16 %v237_v7, %v236_v6  ;;  %v238_v9 = vld [vmem:[%s5780_s1 + $0x30] sm:$0xff]  ;;  %v239_v10 = vld [vmem:[%s5780_s1 + $0x38] sm:$0xff]  ;;  %v3251_v44 = vld [vmem:[%s5781_s2] ss:$0 sm:$0xff]  ;;  %s5723_s14 = scalar_lea.hbm %s5783_s4, %s2649_s11  ;;  %s3075_s21 = smov [#allocation3]  }
  0x1a   : > { %2755 = vmatprep.subr.bf16.mxu0 %v2754_v3  ;;  %2770 = vmatprep.subr.bf16.mxu1 %v2754_v3  ;;  %s6596_s8 = smov (!%p194_p10, %s2609_s8), 63  ;;  %v2766_v13 = vpack.c.bf16 %v239_v10, %v238_v9  ;;  %s3015_s23 = sshll.u32 %s3075_s21, 4  ;;  %s3016_s23 = int_to_ptr.vmem [resolvable:$false] %s3015_s23 }
  0x1b   : > { %2757 = vmatpush3.bf16.msra.mxu0 %v2754_v3  ;;  %2774 = vmatpush3.bf16.msra.mxu1 %v2754_v3  ;;  %s2610_s15 = sshll.u32 %s6596_s8, 3  ;;  %s190_s8 = sand.u32 1, %s3065_s18  }
  0x1c   : > { %2759 = vmatprep.subr.bf16.mxu0 %v2758_v5  ;;  %2771 = vmatprep.subr.bf16.mxu1 %v2758_v5  ;;  %s3182_s30 = scalar_lea.vmem %s5779_s0, %s2610_s15  ;;  %s2608_s9 = sshll.u32 %s190_s8, 8 }
  0x1d   : > { %v200_v11 = vld [vmem:[%s3182_s30] sm:$0xff]  ;;  %v201_v14 = vld [vmem:[%s3182_s30 + $0x8] sm:$0xff]  ;;  %v202_v16 = vld [vmem:[%s3182_s30 + $0x10] sm:$0xff]  ;;  %v3253_v46 = vstv %s241_s5  ;;  %s5340_s10 = scalar_lea.vmem [#allocation3], %s2608_s9  ;;  %s5738_s15 = scalar_lea.sflag [#allocation4], %s190_s8 }
  0x1e   : > { %v216_v12 = vld [vmem:[%s3182_s30 + $0x80] sm:$0xff]  ;;  %2706 = vmatprep.mubr.msk.f32.mxu0 %vm248_vm0, %v200_v11  ;;  %v217_v15 = vld [vmem:[%s3182_s30 + $0x88] sm:$0xff]  ;;  %v218_v17 = vld [vmem:[%s3182_s30 + $0x90] sm:$0xff]  ;;  %s2542_s12 = sshll.u32 %s5340_s10, 4  ;;  %s3017_s24 = scalar_lea.vmem %s3016_s23, 8192  ;;  %s5725_s12 = int_to_ptr.vmem [resolvable:$true] %s2542_s12 }
  0x1f   : > { %2761 = vmatpush3.bf16.msra.mxu0 %v2758_v5  ;;  %2775 = vmatpush3.bf16.msra.mxu1 %v2758_v5  ;;  %v203_v18 = vld [vmem:[%s3182_s30 + $0x18] sm:$0xff]  ;;  %v204_v20 = vld [vmem:[%s3182_s30 + $0x20] sm:$0xff]  ;;  %v205_v22 = vld [vmem:[%s3182_s30 + $0x28] sm:$0xff]  ;;  %s3011_s16 = scalar_lea.vmem %s5725_s12, 4096  ;;  %p3018_p0 = scmp.lt.s32.totalorder %s5725_s12, %s3016_s23 }
  0x20   : > { %2763 = vmatprep.subr.bf16.mxu0 %v2762_v8  ;;  %2772 = vmatprep.subr.bf16.mxu1 %v2762_v8  ;;  %v219_v19 = vld [vmem:[%s3182_s30 + $0x98] sm:$0xff]  ;;  %v220_v21 = vld [vmem:[%s3182_s30 + $0xa0] sm:$0xff]  ;;  %v221_v23 = vld [vmem:[%s3182_s30 + $0xa8] sm:$0xff]  ;;  %p3012_p11 = scmp.ne.s32.totalorder %s5725_s12, %s3011_s16  ;;  %p3019_p1 = scmp.lt.s32.totalorder %s3017_s24, %s3011_s16 }
  0x21   : > { %2730 = vmatprep.mubr.msk.f32.mxu1 %vm248_vm0, %v216_v12  ;;  %v206_v24 = vld [vmem:[%s3182_s30 + $0x30] sm:$0xff]  ;;  %v207_v26 = vld [vmem:[%s3182_s30 + $0x38] sm:$0xff]  ;;  %v208_v28 = vld [vmem:[%s3182_s30 + $0x40] sm:$0xff] }
  0x22   : > { %v222_v25 = vld [vmem:[%s3182_s30 + $0xb0] sm:$0xff]  ;;  %v223_v27 = vld [vmem:[%s3182_s30 + $0xb8] sm:$0xff]  ;;  %v224_v29 = vld [vmem:[%s3182_s30 + $0xc0] sm:$0xff]  ;;  %p3013_p12 = pnand %p3012_p11, %p3144_p5  ;;  %p3020_p2 = por %p3019_p1, %p3018_p0 }
  0x23   : > { %2765 = vmatpush3.bf16.msra.mxu0 %v2762_v8  ;;  %2776 = vmatpush3.bf16.msra.mxu1 %v2762_v8  ;;  %v209_v30 = vld [vmem:[%s3182_s30 + $0x48] sm:$0xff]  ;;  %v210_v32 = vld [vmem:[%s3182_s30 + $0x50] sm:$0xff]  ;;  %v211_v34 = vld [vmem:[%s3182_s30 + $0x58] sm:$0xff] }
  0x24   : > { %2767 = vmatprep.subr.bf16.mxu0 %v2766_v13  ;;  %2773 = vmatprep.subr.bf16.mxu1 %v2766_v13  ;;  %v225_v31 = vld [vmem:[%s3182_s30 + $0xc8] sm:$0xff]  ;;  %v226_v33 = vld [vmem:[%s3182_s30 + $0xd0] sm:$0xff]  ;;  %v227_v35 = vld [vmem:[%s3182_s30 + $0xd8] sm:$0xff]  ;;  %p3014_p13 = pneg %p3013_p12 }
  0x25   : > { %v212_v36 = vld [vmem:[%s3182_s30 + $0x60] sm:$0xff]  ;;  %v213_v38 = vld [vmem:[%s3182_s30 + $0x68] sm:$0xff]  ;;  %v214_v40 = vld [vmem:[%s3182_s30 + $0x70] sm:$0xff] }
  0x26   : > { %v228_v37 = vld [vmem:[%s3182_s30 + $0xe0] sm:$0xff]  ;;  %v229_v39 = vld [vmem:[%s3182_s30 + $0xe8] sm:$0xff]  ;;  %v230_v41 = vld [vmem:[%s3182_s30 + $0xf0] sm:$0xff]  ;;  %p3021_p3 = pnand %p3020_p2, %p3014_p13 }
  0x27   : > { %2769 = vmatpush3.bf16.msra.mxu0 %v2766_v13  ;;  %2777 = vmatpush3.bf16.msra.mxu1 %v2766_v13  ;;  %v215_v42 = vld [vmem:[%s3182_s30 + $0x78] sm:$0xff] }
  0x28   : > { %v231_v43 = vld [vmem:[%s3182_s30 + $0xf8] sm:$0xff] }
  0x2a   : > { %2707 = vmatmul.mubr.msk.f32.vlgmr.msra.gmra.mrb[0].mxu0 %vm248_vm0, %v201_v14  ;;  %2731 = vmatmul.mubr.msk.f32.vlgmr.msra.gmra.mrb[0].mxu1 %vm248_vm0, %v217_v15 }
  0x2b   : > { %2709 = vmatprep.mubr.msk.f32.mxu0 %vm248_vm0, %v202_v16  ;;  %2733 = vmatprep.mubr.msk.f32.mxu1 %vm248_vm0, %v218_v17 }
  0x2e   : > { %2710 = vmatmul.mubr.msk.f32.gmra.mrb[2].mxu0 %vm248_vm0, %v203_v18  ;;  %2734 = vmatmul.mubr.msk.f32.gmra.mrb[2].mxu1 %vm248_vm0, %v219_v19 }
  0x2f   : > { %2712 = vmatprep.mubr.msk.f32.mxu0 %vm248_vm0, %v204_v20  ;;  %2736 = vmatprep.mubr.msk.f32.mxu1 %vm248_vm0, %v220_v21 }
  0x32   : > { %2713 = vmatmul.mubr.msk.f32.gmra.mrb[4].mxu0 %vm248_vm0, %v205_v22  ;;  %2737 = vmatmul.mubr.msk.f32.gmra.mrb[4].mxu1 %vm248_vm0, %v221_v23 }
  0x33   : > { %2715 = vmatprep.mubr.msk.f32.mxu0 %vm248_vm0, %v206_v24  ;;  %2739 = vmatprep.mubr.msk.f32.mxu1 %vm248_vm0, %v222_v25 }
  0x36   : > { %2716 = vmatmul.mubr.msk.f32.gmra.mrb[6].mxu0 %vm248_vm0, %v207_v26  ;;  %2740 = vmatmul.mubr.msk.f32.gmra.mrb[6].mxu1 %vm248_vm0, %v223_v27 }
  0x37   : > { %2718 = vmatprep.mubr.msk.f32.mxu0 %vm248_vm0, %v208_v28  ;;  %2742 = vmatprep.mubr.msk.f32.mxu1 %vm248_vm0, %v224_v29 }
  0x3a   : > { %2719 = vmatmul.mubr.msk.f32.gmra.mrb[8].mxu0 %vm248_vm0, %v209_v30  ;;  %2743 = vmatmul.mubr.msk.f32.gmra.mrb[8].mxu1 %vm248_vm0, %v225_v31 }
  0x3b   : > { %2721 = vmatprep.mubr.msk.f32.mxu0 %vm248_vm0, %v210_v32  ;;  %2745 = vmatprep.mubr.msk.f32.mxu1 %vm248_vm0, %v226_v33 }
  0x3e   : > { %2722 = vmatmul.mubr.msk.f32.gmra.mrb[10].mxu0 %vm248_vm0, %v211_v34  ;;  %2746 = vmatmul.mubr.msk.f32.gmra.mrb[10].mxu1 %vm248_vm0, %v227_v35 }
  0x3f   : > { %2724 = vmatprep.mubr.msk.f32.mxu0 %vm248_vm0, %v212_v36  ;;  %2748 = vmatprep.mubr.msk.f32.mxu1 %vm248_vm0, %v228_v37 }
  0x42   : > { %2725 = vmatmul.mubr.msk.f32.gmra.mrb[12].mxu0 %vm248_vm0, %v213_v38  ;;  %2749 = vmatmul.mubr.msk.f32.gmra.mrb[12].mxu1 %vm248_vm0, %v229_v39 }
  0x43   : > { %2727 = vmatprep.mubr.msk.f32.mxu0 %vm248_vm0, %v214_v40  ;;  %2751 = vmatprep.mubr.msk.f32.mxu1 %vm248_vm0, %v230_v41 }
  0x46   : > { %2728 = vmatmul.mubr.msk.f32.gmra.mrb[14].mxu0 %vm248_vm0, %v215_v42  ;;  %2752 = vmatmul.mubr.msk.f32.gmra.mrb[14].mxu1 %vm248_vm0, %v231_v43 }
  0xfd   : > { %v2708_v45 = vpop.f32.mrb[0].mxu0  ;;  %v2732_v47 = vpop.f32.mrb[0].mxu1 }
  0xfe   : > { %v417_v48 = vadd.f32 %v2708_v45, %v3251_v44  ;;  %v497_v49 = vadd.f32 %v2732_v47, %v3251_v44  ;;  %v411_v50 = vpop.f32.mrb[1].mxu0  ;;  %v491_v51 = vpop.f32.mrb[1].mxu1 }
  0xff   : > { %v412_v52 = vadd.f32 %v3251_v44, %v411_v50  ;;  %v492_v53 = vadd.f32 %v3251_v44, %v491_v51 }
 0x100   : > { %v572_v54 = vmul.f32 %v3253_v46, %v417_v48  ;;  %v588_v55 = vmul.f32 %v3253_v46, %v497_v49 }
 0x101   : > { %v571_v56 = vmul.f32 %v3253_v46, %v412_v52  ;;  %v587_v57 = vmul.f32 %v3253_v46, %v492_v53  ;;  %v2711_v58 = vpop.f32.mrb[2].mxu0  ;;  %v2735_v59 = vpop.f32.mrb[2].mxu1 }
 0x102   : > { %v607_v61 = vsub.f32 0.0, %v572_v54  ;;  %v623_v62 = vsub.f32 0.0, %v588_v55  ;;  %v427_v63 = vadd.f32 %v2711_v58, %v3251_v44  ;;  %v421_v0 = vpop.f32.mrb[3].mxu0  ;;  %v507_v1 = vadd.f32 %v2735_v59, %v3251_v44  ;;  %v501_v2 = vpop.f32.mrb[3].mxu1 }
 0x103   : > { %v606_v3 = vsub.f32 0.0, %v571_v56  ;;  %v622_v4 = vsub.f32 0.0, %v587_v57  ;;  %v422_v5 = vadd.f32 %v3251_v44, %v421_v0  ;;  %v502_v6 = vadd.f32 %v3251_v44, %v501_v2 }
 0x104   : > { %v640_v7 = vmul.f32 1.442695, %v607_v61  ;;  %v672_v8 = vmul.f32 1.442695, %v623_v62  ;;  %v574_v9 = vmul.f32 %v3253_v46, %v427_v63  ;;  %v590_v10 = vmul.f32 %v3253_v46, %v507_v1 }
 0x105   : > { %v638_v11 = vmul.f32 1.442695, %v606_v3  ;;  %v670_v12 = vmul.f32 1.442695, %v622_v4  ;;  %v573_v13 = vmul.f32 %v3253_v46, %v422_v5  ;;  %v589_v14 = vmul.f32 %v3253_v46, %v502_v6  ;;  %v2714_v15 = vpop.f32.mrb[4].mxu0  ;;  %v2738_v16 = vpop.f32.mrb[4].mxu1 }
 0x106   : > { %2819 = vpow2.f32 %v640_v7  ;;  %v609_v17 = vsub.f32 0.0, %v574_v9  ;;  %v625_v18 = vsub.f32 0.0, %v590_v10  ;;  %v437_v19 = vadd.f32 %v2714_v15, %v3251_v44  ;;  %v431_v20 = vpop.f32.mrb[5].mxu0  ;;  %v511_v21 = vpop.f32.mrb[5].mxu1 }
 0x107   : > { %2821 = vpow2.f32 %v672_v8  ;;  %v608_v22 = vsub.f32 0.0, %v573_v13  ;;  %v624_v23 = vsub.f32 0.0, %v589_v14  ;;  %v432_v24 = vadd.f32 %v3251_v44, %v431_v20 }
 0x108   : > { %2823 = vpow2.f32 %v638_v11  ;;  %v644_v25 = vmul.f32 1.442695, %v609_v17  ;;  %v676_v26 = vmul.f32 1.442695, %v625_v18  ;;  %v576_v27 = vmul.f32 %v3253_v46, %v437_v19 }
 0x109   : > { %2825 = vpow2.f32 %v670_v12  ;;  %v642_v28 = vmul.f32 1.442695, %v608_v22  ;;  %v674_v29 = vmul.f32 1.442695, %v624_v23  ;;  %v575_v30 = vmul.f32 %v3253_v46, %v432_v24  ;;  %v2717_v31 = vpop.f32.mrb[6].mxu0  ;;  %v2741_v32 = vpop.f32.mrb[6].mxu1 }
 0x10a   : > { %2827 = vpow2.f32 %v644_v25  ;;  %v611_v33 = vsub.f32 0.0, %v576_v27  ;;  %v517_v34 = vadd.f32 %v2738_v16, %v3251_v44  ;;  %v512_v35 = vadd.f32 %v3251_v44, %v511_v21  ;;  %v441_v36 = vpop.f32.mrb[7].mxu0  ;;  %v521_v37 = vpop.f32.mrb[7].mxu1 }
 0x10b   : > { %2829 = vpow2.f32 %v642_v28  ;;  %v610_v38 = vsub.f32 0.0, %v575_v30  ;;  %v447_v39 = vadd.f32 %v2717_v31, %v3251_v44  ;;  %v442_v40 = vadd.f32 %v3251_v44, %v441_v36 }
 0x10c   : > { %2831 = vpow2.f32 %v676_v26  ;;  %v648_v41 = vmul.f32 1.442695, %v611_v33  ;;  %v592_v42 = vmul.f32 %v3253_v46, %v517_v34  ;;  %v591_v43 = vmul.f32 %v3253_v46, %v512_v35 }
 0x10d   : > { %2833 = vpow2.f32 %v674_v29  ;;  %v646_v45 = vmul.f32 1.442695, %v610_v38  ;;  %v578_v47 = vmul.f32 %v3253_v46, %v447_v39  ;;  %v577_v48 = vmul.f32 %v3253_v46, %v442_v40  ;;  %v2720_v49 = vpop.f32.mrb[8].mxu0  ;;  %v2744_v50 = vpop.f32.mrb[8].mxu1 }
 0x10e   : > { %2835 = vpow2.f32 %v648_v41  ;;  %v627_v51 = vsub.f32 0.0, %v592_v42  ;;  %v626_v52 = vsub.f32 0.0, %v591_v43  ;;  %v527_v53 = vadd.f32 %v2741_v32, %v3251_v44  ;;  %v451_v54 = vpop.f32.mrb[9].mxu0  ;;  %v531_v55 = vpop.f32.mrb[9].mxu1 }
 0x10f   : > { %2837 = vpow2.f32 %v646_v45  ;;  %v522_v56 = vadd.f32 %v3251_v44, %v521_v37  ;;  %v3286_v57 = vand.u32 127, %v603_v60  ;;  %v613_v61 = vsub.f32 0.0, %v578_v47 }
 0x110   : > { %v2820_v58 = vpop.eup %2819  ;;  %v680_v59 = vmul.f32 1.442695, %v627_v51  ;;  %v457_v62 = vadd.f32 %v2720_v49, %v3251_v44  ;;  %v612_v1 = vsub.f32 0.0, %v577_v48  ;;  %v594_v2 = vmul.f32 %v3253_v46, %v527_v53 }
 0x111   : > { %6084 = vst [vmem:[#allocation6_spill] sm:$0xff] %v3286_v57  ;;  %v2822_v63 = vpop.eup %2821  ;;  %v703_v0 = vadd.f32 1.0, %v2820_v58  ;;  %v2723_v3 = vpop.f32.mrb[10].mxu0  ;;  %v678_v6 = vmul.f32 1.442695, %v626_v52  ;;  %v593_v10 = vmul.f32 %v3253_v46, %v522_v56  ;;  %v452_v11 = vadd.f32 %v3251_v44, %v451_v54 }
 0x112   : > { %v2824_v4 = vpop.eup %2823  ;;  %v719_v5 = vadd.f32 1.0, %v2822_v63  ;;  %2839 = vpow2.f32 %v680_v59  ;;  %v461_v7 = vpop.f32.mrb[11].mxu0  ;;  %vm605_vm1 = vcmp.lt.s32.totalorder %v3286_v57, 8  ;;  %v652_v15 = vmul.f32 1.442695, %v613_v61 }
 0x113   : > { %v2747_v8 = vpop.f32.mrb[10].mxu1  ;;  %v2826_v9 = vpop.eup %2825  ;;  %2841 = vrcp.f32 %v703_v0  ;;  %v702_v60 = vadd.f32 1.0, %v2824_v4  ;;  %v580_v16 = vmul.f32 %v3253_v46, %v457_v62  ;;  %v650_v19 = vmul.f32 1.442695, %v612_v1 }
 0x114   : > { %v541_v12 = vpop.f32.mrb[11].mxu1  ;;  %v2828_v13 = vpop.eup %2827  ;;  %2843 = vrcp.f32 %v719_v5  ;;  %v718_v14 = vadd.f32 1.0, %v2826_v9  ;;  %v629_v20 = vsub.f32 0.0, %v594_v2  ;;  %v579_v25 = vmul.f32 %v3253_v46, %v452_v11 }
 0x115   : > { %v2830_v17 = vpop.eup %2829  ;;  %2845 = vrcp.f32 %v702_v60  ;;  %v705_v18 = vadd.f32 1.0, %v2828_v13  ;;  %v2726_v21 = vpop.f32.mrb[12].mxu0  ;;  %v537_v26 = vadd.f32 %v2744_v50, %v3251_v44  ;;  %v628_v31 = vsub.f32 0.0, %v593_v10 }
 0x116   : > { %v3294_v22 = vpop.f32.mrb[12].mxu1  ;;  %v2832_v23 = vpop.eup %2831  ;;  %2847 = vrcp.f32 %v718_v14  ;;  %v704_v24 = vadd.f32 1.0, %v2830_v17  ;;  %v532_v32 = vadd.f32 %v3251_v44, %v531_v55  ;;  %v615_v35 = vsub.f32 0.0, %v580_v16 }
 0x117   : > { %v3298_v27 = vpop.f32.mrb[13].mxu0  ;;  %v3300_v28 = vpop.f32.mrb[13].mxu1  ;;  %2849 = vrcp.f32 %v705_v18  ;;  %v721_v30 = vadd.f32 1.0, %v2832_v23  ;;  %v467_v36 = vadd.f32 %v2723_v3, %v3251_v44  ;;  %v684_v39 = vmul.f32 1.442695, %v629_v20 }
 0x118   : > { %v2834_v29 = vpop.eup %2833  ;;  %2851 = vrcp.f32 %v704_v24  ;;  %v596_v40 = vmul.f32 %v3253_v46, %v537_v26  ;;  %v614_v45 = vsub.f32 0.0, %v579_v25  ;;  %v595_v47 = vmul.f32 %v3253_v46, %v532_v32 }
 0x119   : > { %v2836_v33 = vpop.eup %2835  ;;  %v720_v34 = vadd.f32 1.0, %v2834_v29  ;;  %2853 = vrcp.f32 %v721_v30  ;;  %v3305_v41 = vpop.f32.mrb[14].mxu0  ;;  %v582_v50 = vmul.f32 %v3253_v46, %v467_v36  ;;  %v462_v51 = vadd.f32 %v3251_v44, %v461_v7 }
 0x11a   : > { %v2838_v37 = vpop.eup %2837  ;;  %v707_v38 = vadd.f32 1.0, %v2836_v33  ;;  %v3307_v42 = vpop.f32.mrb[14].mxu1  ;;  %v547_v52 = vadd.f32 %v2747_v8, %v3251_v44  ;;  %v682_v54 = vmul.f32 1.442695, %v628_v31  ;;  %v656_v55 = vmul.f32 1.442695, %v615_v35 }
 0x11b   : > { %2855 = vrcp.f32 %v720_v34  ;;  %v706_v43 = vadd.f32 1.0, %v2838_v37  ;;  %v3310_v48 = vpop.f32.mrb[15].mxu0  ;;  %v3312_v49 = vpop.f32.mrb[15].mxu1  ;;  %v542_v56 = vadd.f32 %v3251_v44, %v541_v12  ;;  %v631_v61 = vsub.f32 0.0, %v596_v40 }
 0x11c   : > { %2857 = vrcp.f32 %v707_v38  ;;  %v2840_v53 = vpop.eup %2839  ;;  %v581_v62 = vmul.f32 %v3253_v46, %v462_v51  ;;  %v630_v1 = vsub.f32 0.0, %v595_v47  ;;  %v598_v2 = vmul.f32 %v3253_v46, %v547_v52 }
 0x11d   : > { %2859 = vrcp.f32 %v706_v43  ;;  %v2842_v58 = vpop.eup %2841  ;;  %v723_v59 = vadd.f32 1.0, %v2840_v53  ;;  %v654_v4 = vmul.f32 1.442695, %v614_v45  ;;  %v597_v9 = vmul.f32 %v3253_v46, %v542_v56 }
 0x11e   : > { %2861 = vpow2.f32 %v678_v6  ;;  %v2844_v63 = vpop.eup %2843  ;;  %v3321_v0 = vsel %vm605_vm1, %v2842_v58, -1e+30  ;;  %v617_v6 = vsub.f32 0.0, %v582_v50  ;;  %v616_v8 = vsub.f32 0.0, %v581_v62 }
 0x11f   : > { %2863 = vpow2.f32 %v652_v15  ;;  %6085 = vst [vmem:[#allocation7_spill] sm:$0xff] %v3321_v0  ;;  %v2846_v3 = vpop.eup %2845  ;;  %v3326_v5 = vsel %vm605_vm1, %v2844_v63, -1e+30  ;;  %832 = vmax.xlane.f32.xlu0 %v3321_v0  ;;  %v477_v60 = vadd.f32 %v2726_v21, %v3251_v44  ;;  %v688_v11 = vmul.f32 1.442695, %v631_v61 }
 0x120   : > { %2865 = vrcp.f32 %v723_v59  ;;  %6086 = vst [vmem:[#allocation8_spill] sm:$0xff] %v3326_v5  ;;  %v2848_v7 = vpop.eup %2847  ;;  %864 = vmax.xlane.f32.xlu1 %v3326_v5  ;;  %v633_v12 = vsub.f32 0.0, %v598_v2  ;;  %v686_v14 = vmul.f32 1.442695, %v630_v1  ;;  %v3338_v16 = vsel %vm605_vm1, %v2846_v3, -1e+30 }
 0x121   : > { %2867 = vpow2.f32 %v650_v19  ;;  %v2850_v10 = vpop.eup %2849  ;;  %6088 = vst [vmem:[#allocation10_spill] sm:$0xff] %v3338_v16  ;;  %v660_v18 = vmul.f32 1.442695, %v617_v6  ;;  %v584_v19 = vmul.f32 %v3253_v46, %v477_v60  ;;  %v658_v21 = vmul.f32 1.442695, %v616_v8 }
 0x122   : > { %2869 = vpow2.f32 %v684_v39  ;;  %v2852_v13 = vpop.eup %2851  ;;  %v3334_v15 = vsel %vm605_vm1, %v2850_v10, -1e+30  ;;  %v632_v23 = vsub.f32 0.0, %v597_v9  ;;  %v692_v26 = vmul.f32 1.442695, %v633_v12 }
 0x123   : > { %2871 = vpow2.f32 %v682_v54  ;;  %6087 = vst [vmem:[#allocation9_spill] sm:$0xff] %v3334_v15  ;;  %v2854_v17 = vpop.eup %2853  ;;  %830 = vmax.xlane.f32.xlu0 %v3338_v16  ;;  %v3349_v30 = vsel %vm605_vm1, %v2848_v7, -1e+30  ;;  %v472_v31 = vadd.f32 %v3251_v44, %v3298_v27  ;;  %v619_v33 = vsub.f32 0.0, %v584_v19 }
 0x124   : > { %2873 = vpow2.f32 %v656_v55  ;;  %836 = vmax.xlane.f32.xlu1 %v3334_v15  ;;  %v3345_v25 = vsel %vm605_vm1, %v2854_v17, -1e+30  ;;  %6090 = vst [vmem:[#allocation12_spill] sm:$0xff] %v3349_v30  ;;  %v690_v36 = vmul.f32 1.442695, %v632_v23  ;;  %v557_v45 = vadd.f32 %v3294_v22, %v3251_v44 }
 0x125   : > { %v2856_v20 = vpop.eup %2855  ;;  %2875 = vpow2.f32 %v654_v4  ;;  %6089 = vst [vmem:[#allocation11_spill] sm:$0xff] %v3345_v25  ;;  %v3357_v39 = vsel %vm605_vm1, %v2852_v13, -1e+30  ;;  %v583_v43 = vmul.f32 %v3253_v46, %v472_v31  ;;  %v664_v51 = vmul.f32 1.442695, %v619_v33 }
 0x126   : > { %v2858_v24 = vpop.eup %2857  ;;  %2877 = vpow2.f32 %v688_v11  ;;  %6091 = vst [vmem:[#allocation13_spill] sm:$0xff] %v3357_v39  ;;  %v3361_v27 = vsel %vm605_vm1, %v2856_v20, -1e+30  ;;  %v552_v52 = vadd.f32 %v3251_v44, %v3300_v28  ;;  %v487_v22 = vadd.f32 %v3305_v41, %v3251_v44 }
 0x127   : > { %v2860_v29 = vpop.eup %2859  ;;  %2879 = vpow2.f32 %v686_v14  ;;  %862 = vmax.xlane.f32.xlu0 %v3349_v30  ;;  %6092 = vst [vmem:[#allocation14_spill] sm:$0xff] %v3361_v27  ;;  %v3378_v59 = vsel %vm605_vm1, %v2858_v24, -1e+30  ;;  %v482_v28 = vadd.f32 %v3251_v44, %v3310_v48  ;;  %v600_v63 = vmul.f32 %v3253_v46, %v557_v45 }
 0x128   : > { %v2862_v32 = vpop.eup %2861  ;;  %2881 = vpow2.f32 %v660_v18  ;;  %868 = vmax.xlane.f32.xlu1 %v3345_v25  ;;  %v3372_v55 = vsel %vm605_vm1, %v2860_v29, -1e+30  ;;  %6094 = vst [vmem:[#allocation16_spill] sm:$0xff] %v3378_v59  ;;  %v567_v1 = vadd.f32 %v3307_v42, %v3251_v44  ;;  %v599_v3 = vmul.f32 %v3253_v46, %v552_v52 }
 0x129   : > { %v2864_v34 = vpop.eup %2863  ;;  %v722_v35 = vadd.f32 1.0, %v2862_v32  ;;  %2883 = vpow2.f32 %v658_v21  ;;  %6093 = vst [vmem:[#allocation15_spill] sm:$0xff] %v3372_v55  ;;  %v562_v4 = vadd.f32 %v3251_v44, %v3312_v49  ;;  %v618_v7 = vsub.f32 0.0, %v583_v43 }
 0x12a   : > { %v2866_v37 = vpop.eup %2865  ;;  %v709_v38 = vadd.f32 1.0, %v2864_v34  ;;  %2885 = vpow2.f32 %v692_v26  ;;  %v586_v8 = vmul.f32 %v3253_v46, %v487_v22  ;;  %v585_v10 = vmul.f32 %v3253_v46, %v482_v28 }
 0x12b   : > { %v2868_v40 = vpop.eup %2867  ;;  %2887 = vrcp.f32 %v722_v35  ;;  %866 = vmax.xlane.f32.xlu0 %v3361_v27  ;;  %v3393_v60 = vsel %vm605_vm1, %v2866_v37, -1e+30  ;;  %v635_v49 = vsub.f32 0.0, %v600_v63  ;;  %v602_v12 = vmul.f32 %v3253_v46, %v567_v1 }
 0x12c   : > { %v2870_v47 = vpop.eup %2869  ;;  %2889 = vrcp.f32 %v709_v38  ;;  %v708_v50 = vadd.f32 1.0, %v2868_v40  ;;  %834 = vmax.xlane.f32.xlu1 %v3357_v39  ;;  %6095 = vst [vmem:[#allocation17_spill] sm:$0xff] %v3393_v60  ;;  %v634_v17 = vsub.f32 0.0, %v599_v3  ;;  %v601_v18 = vmul.f32 %v3253_v46, %v562_v4 }
 0x12d   : > { %v2872_v53 = vpop.eup %2871  ;;  %v725_v54 = vadd.f32 1.0, %v2870_v47  ;;  %2891 = vpow2.f32 %v690_v36  ;;  %v662_v21 = vmul.f32 1.442695, %v618_v7  ;;  %v621_v23 = vsub.f32 0.0, %v586_v8 }
 0x12e   : > { %v2874_v56 = vpop.eup %2873  ;;  %2893 = vrcp.f32 %v708_v50  ;;  %v724_v58 = vadd.f32 1.0, %v2872_v53  ;;  %v620_v29 = vsub.f32 0.0, %v585_v10  ;;  %v696_v32 = vmul.f32 1.442695, %v635_v49 }
 0x12f   : > { %v2876_v61 = vpop.eup %2875  ;;  %2895 = vrcp.f32 %v725_v54  ;;  %v711_v62 = vadd.f32 1.0, %v2874_v56  ;;  %838 = vmax.xlane.f32.xlu0 %v3372_v55  ;;  %v637_v33 = vsub.f32 0.0, %v602_v12  ;;  %v694_v36 = vmul.f32 1.442695, %v634_v17 }
 0x130   : > { %v2878_v2 = vpop.eup %2877  ;;  %2897 = vrcp.f32 %v724_v58  ;;  %v710_v41 = vadd.f32 1.0, %v2876_v61  ;;  %840 = vmax.xlane.f32.xlu1 %v3378_v59  ;;  %v636_v37 = vsub.f32 0.0, %v601_v18  ;;  %v668_v40 = vmul.f32 1.442695, %v621_v23 }
 0x131   : > { %v2880_v6 = vpop.eup %2879  ;;  %2899 = vrcp.f32 %v711_v62  ;;  %v727_v48 = vadd.f32 1.0, %v2878_v2  ;;  %v666_v47 = vmul.f32 1.442695, %v620_v29 }
 0x132   : > { %v2882_v9 = vpop.eup %2881  ;;  %2901 = vrcp.f32 %v710_v41  ;;  %v726_v42 = vadd.f32 1.0, %v2880_v6  ;;  %v698_v54 = vmul.f32 1.442695, %v636_v37 }
 0x133   : > { %v2884_v11 = vpop.eup %2883  ;;  %2903 = vrcp.f32 %v727_v48  ;;  %v713_v44 = vadd.f32 1.0, %v2882_v9 }
 0x134   : > { %v2886_v13 = vpop.eup %2885  ;;  %2905 = vrcp.f32 %v726_v42  ;;  %v712_v14 = vadd.f32 1.0, %v2884_v11  ;;  %872 = vmax.xlane.f32.xlu1 %v3393_v60 }
 0x135   : > { %v2888_v19 = vpop.eup %2887  ;;  %2907 = vrcp.f32 %v713_v44  ;;  %v729_v20 = vadd.f32 1.0, %v2886_v13 }
 0x136   : > { %v2890_v24 = vpop.eup %2889  ;;  %2909 = vrcp.f32 %v712_v14  ;;  %v3401_v26 = vsel %vm605_vm1, %v2888_v19, -1e+30 }
 0x137   : > { %6096 = vst [vmem:[#allocation18_spill] sm:$0xff] %v3401_v26  ;;  %v2892_v31 = vpop.eup %2891  ;;  %2911 = vrcp.f32 %v729_v20  ;;  %870 = vmax.xlane.f32.xlu0 %v3401_v26  ;;  %v3406_v46 = vsel %vm605_vm1, %v2890_v24, -1e+30 }
 0x138   : > { %6097 = vst [vmem:[#allocation19_spill] sm:$0xff] %v3406_v46  ;;  %v2894_v34 = vpop.eup %2893  ;;  %v728_v35 = vadd.f32 1.0, %v2892_v31  ;;  %2913 = vpow2.f32 %v664_v51  ;;  %844 = vmax.xlane.f32.xlu1 %v3406_v46  ;;  %v700_v51 = vmul.f32 1.442695, %v637_v33 }
 0x139   : > { %v2896_v38 = vpop.eup %2895  ;;  %2915 = vpow2.f32 %v662_v21  ;;  %v3411_v43 = vsel %vm605_vm1, %v2894_v34, -1e+30 }
 0x13a   : > { %6098 = vst [vmem:[#allocation20_spill] sm:$0xff] %v3411_v43  ;;  %v2898_v45 = vpop.eup %2897  ;;  %2917 = vrcp.f32 %v728_v35  ;;  %v3415_v50 = vsel %vm605_vm1, %v2896_v38, -1e+30 }
 0x13b   : > { %6099 = vst [vmem:[#allocation21_spill] sm:$0xff] %v3415_v50  ;;  %v2900_v52 = vpop.eup %2899  ;;  %2919 = vpow2.f32 %v696_v32  ;;  %842 = vmax.xlane.f32.xlu0 %v3411_v43  ;;  %v3420_v22 = vsel %vm605_vm1, %v2898_v45, -1e+30 }
 0x13c   : > { %v2902_v53 = vpop.eup %2901  ;;  %2921 = vpow2.f32 %v694_v36  ;;  %6100 = vst [vmem:[#allocation22_spill] sm:$0xff] %v3420_v22  ;;  %876 = vmax.xlane.f32.xlu1 %v3415_v50  ;;  %v3425_v28 = vsel %vm605_vm1, %v2900_v52, -1e+30 }
 0x13d   : > { %v2904_v56 = vpop.eup %2903  ;;  %2923 = vpow2.f32 %v668_v40  ;;  %6101 = vst [vmem:[#allocation23_spill] sm:$0xff] %v3425_v28  ;;  %v3430_v63 = vsel %vm605_vm1, %v2902_v53, -1e+30 }
 0x13e   : > { %v2906_v58 = vpop.eup %2905  ;;  %2925 = vpow2.f32 %v666_v47  ;;  %6102 = vst [vmem:[#allocation24_spill] sm:$0xff] %v3430_v63  ;;  %v3435_v41 = vsel %vm605_vm1, %v2904_v56, -1e+30 }
 0x13f   : > { %v2908_v61 = vpop.eup %2907  ;;  %2927 = vpow2.f32 %v700_v51  ;;  %874 = vmax.xlane.f32.xlu0 %v3420_v22  ;;  %6103 = vst [vmem:[#allocation25_spill] sm:$0xff] %v3435_v41  ;;  %v3440_v7 = vsel %vm605_vm1, %v2906_v58, -1e+30 }
 0x140   : > { %v2910_v62 = vpop.eup %2909  ;;  %2929 = vpow2.f32 %v698_v54  ;;  %848 = vmax.xlane.f32.xlu1 %v3425_v28  ;;  %6104 = vst [vmem:[#allocation26_spill] sm:$0xff] %v3440_v7  ;;  %v3445_v10 = vsel %vm605_vm1, %v2908_v61, -1e+30 }
 0x141   : > { %v2912_v1 = vpop.eup %2911  ;;  %6105 = vst [vmem:[#allocation27_spill] sm:$0xff] %v3445_v10  ;;  %v3450_v13 = vsel %vm605_vm1, %v2910_v62, -1e+30 }
 0x142   : > { %v2914_v2 = vpop.eup %2913  ;;  %6106 = vst [vmem:[#allocation28_spill] sm:$0xff] %v3450_v13  ;;  %v3455_v20 = vsel %vm605_vm1, %v2912_v1, -1e+30 }
 0x143   : > { %v2916_v3 = vpop.eup %2915  ;;  %v715_v4 = vadd.f32 1.0, %v2914_v2  ;;  %846 = vmax.xlane.f32.xlu0 %v3430_v63  ;;  %6107 = vst [vmem:[#allocation29_spill] sm:$0xff] %v3455_v20 }
 0x144   : > { %v2918_v6 = vpop.eup %2917  ;;  %v714_v48 = vadd.f32 1.0, %v2916_v3  ;;  %880 = vmax.xlane.f32.xlu1 %v3435_v41 }
 0x145   : > { %v2920_v8 = vpop.eup %2919  ;;  %2931 = vrcp.f32 %v715_v4  ;;  %v3460_v23 = vsel %vm605_vm1, %v2918_v6, -1e+30 }
 0x146   : > { %v2922_v9 = vpop.eup %2921  ;;  %2933 = vrcp.f32 %v714_v48  ;;  %v731_v42 = vadd.f32 1.0, %v2920_v8  ;;  %6108 = vst [vmem:[#allocation30_spill] sm:$0xff] %v3460_v23 }
 0x147   : > { %v2924_v11 = vpop.eup %2923  ;;  %v730_v44 = vadd.f32 1.0, %v2922_v9  ;;  %878 = vmax.xlane.f32.xlu0 %v3440_v7 }
 0x148   : > { %v2926_v49 = vpop.eup %2925  ;;  %2935 = vrcp.f32 %v731_v42  ;;  %v717_v12 = vadd.f32 1.0, %v2924_v11  ;;  %852 = vmax.xlane.f32.xlu1 %v3445_v10 }
 0x149   : > { %v2928_v14 = vpop.eup %2927  ;;  %2937 = vrcp.f32 %v730_v44  ;;  %v716_v17 = vadd.f32 1.0, %v2926_v49 }
 0x14a   : > { %v2930_v18 = vpop.eup %2929  ;;  %2939 = vrcp.f32 %v717_v12  ;;  %v733_v19 = vadd.f32 1.0, %v2928_v14 }
 0x14b   : > { %2941 = vrcp.f32 %v716_v17  ;;  %v732_v21 = vadd.f32 1.0, %v2930_v18  ;;  %850 = vmax.xlane.f32.xlu0 %v3450_v13 }
 0x14c   : > { %2943 = vrcp.f32 %v733_v19  ;;  %884 = vmax.xlane.f32.xlu1 %v3455_v20 }
 0x14d   : > { %2945 = vrcp.f32 %v732_v21 }
 0x14f   : > { %v2932_v24 = vpop.eup %2931  ;;  %882 = vmax.xlane.f32.xlu0 %v3460_v23 }
 0x150   : > { %v2934_v29 = vpop.eup %2933  ;;  %v3466_v31 = vsel %vm605_vm1, %v2932_v24, -1e+30 }
 0x151   : > { %6109 = vst [vmem:[#allocation31_spill] sm:$0xff] %v3466_v31  ;;  %856 = vmax.xlane.f32.xlu1 %v3466_v31  ;;  %v3471_v32 = vsel %vm605_vm1, %v2934_v29, -1e+30 }
 0x152   : > { %6110 = vst [vmem:[#allocation32_spill] sm:$0xff] %v3471_v32  ;;  %v2936_v33 = vpop.eup %2935 }
 0x153   : > { %v2938_v34 = vpop.eup %2937  ;;  %854 = vmax.xlane.f32.xlu0 %v3471_v32  ;;  %v3476_v35 = vsel %vm605_vm1, %v2936_v33, -1e+30 }
 0x154   : > { %6111 = vst [vmem:[#allocation33_spill] sm:$0xff] %v3476_v35  ;;  %v2940_v36 = vpop.eup %2939  ;;  %v3480_v37 = vsel %vm605_vm1, %v2938_v34, -1e+30 }
 0x155   : > { %6112 = vst [vmem:[#allocation34_spill] sm:$0xff] %v3480_v37  ;;  %v2942_v38 = vpop.eup %2941  ;;  %888 = vmax.xlane.f32.xlu1 %v3476_v35  ;;  %v3485_v40 = vsel %vm605_vm1, %v2940_v36, -1e+30 }
 0x156   : > { %6113 = vst [vmem:[#allocation35_spill] sm:$0xff] %v3485_v40  ;;  %v2944_v45 = vpop.eup %2943  ;;  %v3490_v47 = vsel %vm605_vm1, %v2942_v38, -1e+30 }
 0x157   : > { %886 = vmax.xlane.f32.xlu0 %v3480_v37  ;;  %6114 = vst [vmem:[#allocation36_spill] sm:$0xff] %v3490_v47  ;;  %v2946_v52 = vpop.eup %2945  ;;  %v3495_v51 = vsel %vm605_vm1, %v2944_v45, -1e+30 }
 0x158   : > { %6115 = vst [vmem:[#allocation37_spill] sm:$0xff] %v3495_v51  ;;  %v3500_v53 = vsel %vm605_vm1, %v2946_v52, -1e+30 }
 0x159   : > { %860 = vmax.xlane.f32.xlu1 %v3485_v40  ;;  %6116 = vst [vmem:[#allocation38_spill] sm:$0xff] %v3500_v53 }
 0x15b   : > { %858 = vmax.xlane.f32.xlu0 %v3490_v47 }
 0x15d   : > { %892 = vmax.xlane.f32.xlu1 %v3495_v51 }
 0x15f   : > { %890 = vmax.xlane.f32.xlu0 %v3500_v53 }
 0x1ac   : > { %v3504_v54 = vpop.xlane.xlu0 %832 }
 0x1ad   : > { %6117 = vst [vmem:[#allocation39_spill] sm:$0xff] %v3504_v54  ;;  %v3506_v56 = vpop.xlane.xlu1 %864  ;;  %vm895_vm2 = vcmp.eq.f32.partialorder %v3321_v0, %v3504_v54 }
 0x1ae   : > { %6118 = vst [vmem:[#allocation40_spill] sm:$0xff] %v3506_v56  ;;  %v3511_v58 = vsel %vm895_vm2, %v3286_v57, 128  ;;  %vm911_vm3 = vcmp.eq.f32.partialorder %v3326_v5, %v3506_v56 }
 0x1af   : > { %v973_v61 = vshra.s32 %v3511_v58, 16  ;;  %v3517_v62 = vsel %vm911_vm3, %v3286_v57, 128 }
 0x1b0   : > { %v3519_v1 = vpop.xlane.xlu0 %830  ;;  %v1197_v4 = vshra.s32 %v3517_v62, 16 }
 0x1b1   : > { %6119 = vst [vmem:[#allocation41_spill] sm:$0xff] %v3519_v1  ;;  %v3521_v2 = vpop.xlane.xlu1 %836  ;;  %v3523_v3 = vcvt.s32.f32 %v973_v61  ;;  %vm894_vm4 = vcmp.eq.f32.partialorder %v3338_v16, %v3519_v1 }
 0x1b2   : > { %6120 = vst [vmem:[#allocation42_spill] sm:$0xff] %v3521_v2  ;;  %v3529_v6 = vsel %vm894_vm4, %v3286_v57, 128  ;;  %vm897_vm5 = vcmp.eq.f32.partialorder %v3334_v15, %v3521_v2  ;;  %v3542_v11 = vcvt.s32.f32 %v1197_v4 }
 0x1b3   : > { %976 = vmin.xlane.f32.xlu1 %v3523_v3  ;;  %v959_v48 = vshra.s32 %v3529_v6, 16  ;;  %v3536_v8 = vsel %vm897_vm5, %v3286_v57, 128 }
 0x1b4   : > { %v3538_v9 = vpop.xlane.xlu0 %862  ;;  %v1001_v49 = vshra.s32 %v3536_v8, 16 }
 0x1b5   : > { %6121 = vst [vmem:[#allocation43_spill] sm:$0xff] %v3538_v9  ;;  %v3540_v42 = vpop.xlane.xlu1 %868  ;;  %v3544_v44 = vcvt.s32.f32 %v959_v48  ;;  %vm910_vm6 = vcmp.eq.f32.partialorder %v3349_v30, %v3538_v9 }
 0x1b6   : > { %6122 = vst [vmem:[#allocation44_spill] sm:$0xff] %v3540_v42  ;;  %v3550_v12 = vsel %vm910_vm6, %v3286_v57, 128  ;;  %vm913_vm7 = vcmp.eq.f32.partialorder %v3345_v25, %v3540_v42  ;;  %v3564_v21 = vcvt.s32.f32 %v1001_v49 }
 0x1b7   : > { %1200 = vmin.xlane.f32.xlu1 %v3542_v11  ;;  %962 = vmin.xlane.f32.xlu0 %v3544_v44  ;;  %v1183_v14 = vshra.s32 %v3550_v12, 16  ;;  %v3558_v17 = vsel %vm913_vm7, %v3286_v57, 128 }
 0x1b8   : > { %v3560_v18 = vpop.xlane.xlu0 %866  ;;  %v1225_v29 = vshra.s32 %v3558_v17, 16 }
 0x1b9   : > { %6123 = vst [vmem:[#allocation45_spill] sm:$0xff] %v3560_v18  ;;  %v3562_v19 = vpop.xlane.xlu1 %834  ;;  %v3566_v24 = vcvt.s32.f32 %v1183_v14  ;;  %vm912_vm8 = vcmp.eq.f32.partialorder %v3361_v27, %v3560_v18 }
 0x1ba   : > { %6124 = vst [vmem:[#allocation46_spill] sm:$0xff] %v3562_v19  ;;  %vm896_vm9 = vcmp.eq.f32.partialorder %v3357_v39, %v3562_v19  ;;  %v3579_v34 = vsel %vm912_vm8, %v3286_v57, 128  ;;  %v3586_v52 = vcvt.s32.f32 %v1225_v29 }
 0x1bb   : > { %1004 = vmin.xlane.f32.xlu1 %v3564_v21  ;;  %1186 = vmin.xlane.f32.xlu0 %v3566_v24  ;;  %v3576_v33 = vsel %vm896_vm9, %v3286_v57, 128  ;;  %v1211_v4 = vshra.s32 %v3579_v34, 16 }
 0x1bc   : > { %v3581_v36 = vpop.xlane.xlu0 %838  ;;  %v987_v38 = vshra.s32 %v3576_v33, 16 }
 0x1bd   : > { %6125 = vst [vmem:[#allocation47_spill] sm:$0xff] %v3581_v36  ;;  %v3584_v45 = vpop.xlane.xlu1 %840  ;;  %vm898_vm10 = vcmp.eq.f32.partialorder %v3372_v55, %v3581_v36  ;;  %v3608_v36 = vcvt.s32.f32 %v1211_v4 }
 0x1be   : > { %6126 = vst [vmem:[#allocation48_spill] sm:$0xff] %v3584_v45  ;;  %v3590_v61 = vcvt.s32.f32 %v987_v38  ;;  %vm899_vm11 = vcmp.eq.f32.partialorder %v3378_v59, %v3584_v45  ;;  %v3600_v49 = vsel %vm898_vm10, %v3286_v57, 128 }
 0x1bf   : > { %1228 = vmin.xlane.f32.xlu1 %v3586_v52  ;;  %v3597_v48 = vsel %vm899_vm11, %v3286_v57, 128  ;;  %v1015_v18 = vshra.s32 %v3600_v49, 16 }
 0x1c0   : > { %990 = vmin.xlane.f32.xlu0 %v3590_v61  ;;  %v1029_v14 = vshra.s32 %v3597_v48, 16 }
 0x1c1   : > { %v3604_v29 = vpop.xlane.xlu1 %872  ;;  %v3630_v9 = vcvt.s32.f32 %v1015_v18 }
 0x1c2   : > { %6127 = vst [vmem:[#allocation49_spill] sm:$0xff] %v3604_v29  ;;  %v3606_v38 = vcvt.s32.f32 %v1029_v14  ;;  %vm915_vm12 = vcmp.eq.f32.partialorder %v3393_v60, %v3604_v29 }
 0x1c3   : > { %v3616_v19 = vsel %vm915_vm12, %v3286_v57, 128 }
 0x1c4   : > { %v3613_v45 = vpop.xlane.xlu0 %870  ;;  %1032 = vmin.xlane.f32.xlu1 %v3606_v38  ;;  %1214 = vmin.xlane.f32.xlu0 %v3608_v36  ;;  %v1253_v42 = vshra.s32 %v3616_v19, 16 }
 0x1c5   : > { %6128 = vst [vmem:[#allocation50_spill] sm:$0xff] %v3613_v45  ;;  %vm914_vm13 = vcmp.eq.f32.partialorder %v3401_v26, %v3613_v45  ;;  %v3623_v4 = vpop.xlane.xlu1 %844 }
 0x1c6   : > { %6129 = vst [vmem:[#allocation51_spill] sm:$0xff] %v3623_v4  ;;  %v3626_v14 = vsel %vm914_vm13, %v3286_v57, 128  ;;  %v3628_v29 = vcvt.s32.f32 %v1253_v42  ;;  %vm901_vm14 = vcmp.eq.f32.partialorder %v3406_v46, %v3623_v4 }
 0x1c7   : > { %v1239_v2 = vshra.s32 %v3626_v14, 16  ;;  %v3638_v56 = vsel %vm901_vm14, %v3286_v57, 128 }
 0x1c8   : > { %v3635_v1 = vpop.xlane.xlu0 %842  ;;  %1256 = vmin.xlane.f32.xlu1 %v3628_v29  ;;  %1018 = vmin.xlane.f32.xlu0 %v3630_v9  ;;  %v1057_v45 = vshra.s32 %v3638_v56, 16 }
 0x1c9   : > { %6130 = vst [vmem:[#allocation52_spill] sm:$0xff] %v3635_v1  ;;  %vm900_vm15 = vcmp.eq.f32.partialorder %v3411_v43, %v3635_v1  ;;  %v3645_v42 = vpop.xlane.xlu1 %876  ;;  %v3652_v54 = vcvt.s32.f32 %v1239_v2 }
 0x1ca   : > { %6131 = vst [vmem:[#allocation53_spill] sm:$0xff] %v3645_v42  ;;  %v3648_v18 = vsel %vm900_vm15, %v3286_v57, 128  ;;  %v3650_v4 = vcvt.s32.f32 %v1057_v45  ;;  %vm917_vm0 = vcmp.eq.f32.partialorder %v3415_v50, %v3645_v42 }
 0x1cb   : > { %v1043_v26 = vshra.s32 %v3648_v18, 16  ;;  %v3660_v55 = vsel %vm917_vm0, %v3286_v57, 128 }
 0x1cc   : > { %v3657_v46 = vpop.xlane.xlu0 %874  ;;  %1060 = vmin.xlane.f32.xlu1 %v3650_v4  ;;  %1242 = vmin.xlane.f32.xlu0 %v3652_v54  ;;  %v1281_v1 = vshra.s32 %v3660_v55, 16 }
 0x1cd   : > { %6132 = vst [vmem:[#allocation54_spill] sm:$0xff] %v3657_v46  ;;  %vm916_vm1 = vcmp.eq.f32.partialorder %v3420_v22, %v3657_v46  ;;  %v3667_v2 = vpop.xlane.xlu1 %848  ;;  %v3674_v43 = vcvt.s32.f32 %v1043_v26 }
 0x1ce   : > { %6133 = vst [vmem:[#allocation55_spill] sm:$0xff] %v3667_v2  ;;  %v3670_v45 = vsel %vm916_vm1, %v3286_v57, 128  ;;  %v3672_v42 = vcvt.s32.f32 %v1281_v1  ;;  %vm903_vm2 = vcmp.eq.f32.partialorder %v3425_v28, %v3667_v2 }
 0x1cf   : > { %v1267_v50 = vshra.s32 %v3670_v45, 16  ;;  %v3682_v27 = vsel %vm903_vm2, %v3286_v57, 128 }
 0x1d0   : > { %v3679_v60 = vpop.xlane.xlu0 %846  ;;  %1284 = vmin.xlane.f32.xlu1 %v3672_v42  ;;  %1046 = vmin.xlane.f32.xlu0 %v3674_v43  ;;  %v1085_v46 = vshra.s32 %v3682_v27, 16 }
 0x1d1   : > { %6134 = vst [vmem:[#allocation56_spill] sm:$0xff] %v3679_v60  ;;  %vm902_vm3 = vcmp.eq.f32.partialorder %v3430_v63, %v3679_v60  ;;  %v3689_v26 = vpop.xlane.xlu1 %880  ;;  %v3696_v22 = vcvt.s32.f32 %v1267_v50 }
 0x1d2   : > { %6135 = vst [vmem:[#allocation57_spill] sm:$0xff] %v3689_v26  ;;  %v3692_v1 = vsel %vm902_vm3, %v3286_v57, 128  ;;  %v3694_v2 = vcvt.s32.f32 %v1085_v46  ;;  %vm919_vm4 = vcmp.eq.f32.partialorder %v3435_v41, %v3689_v26 }
 0x1d3   : > { %v1071_v28 = vshra.s32 %v3692_v1, 16  ;;  %v3704_v39 = vsel %vm919_vm4, %v3286_v57, 128 }
 0x1d4   : > { %v3701_v59 = vpop.xlane.xlu0 %878  ;;  %1088 = vmin.xlane.f32.xlu1 %v3694_v2  ;;  %1270 = vmin.xlane.f32.xlu0 %v3696_v22  ;;  %v1309_v60 = vshra.s32 %v3704_v39, 16 }
 0x1d5   : > { %6136 = vst [vmem:[#allocation58_spill] sm:$0xff] %v3701_v59  ;;  %vm918_vm5 = vcmp.eq.f32.partialorder %v3440_v7, %v3701_v59  ;;  %v3711_v46 = vpop.xlane.xlu1 %852  ;;  %v3718_v63 = vcvt.s32.f32 %v1071_v28 }
 0x1d6   : > { %6137 = vst [vmem:[#allocation59_spill] sm:$0xff] %v3711_v46  ;;  %v3714_v50 = vsel %vm918_vm5, %v3286_v57, 128  ;;  %v3716_v26 = vcvt.s32.f32 %v1309_v60  ;;  %vm905_vm6 = vcmp.eq.f32.partialorder %v3445_v10, %v3711_v46 }
 0x1d7   : > { %v1295_v41 = vshra.s32 %v3714_v50, 16  ;;  %v3726_v30 = vsel %vm905_vm6, %v3286_v57, 128 }
 0x1d8   : > { %v3723_v25 = vpop.xlane.xlu0 %850  ;;  %1312 = vmin.xlane.f32.xlu1 %v3716_v26  ;;  %1074 = vmin.xlane.f32.xlu0 %v3718_v63  ;;  %v1113_v59 = vshra.s32 %v3726_v30, 16 }
 0x1d9   : > { %6138 = vst [vmem:[#allocation60_spill] sm:$0xff] %v3723_v25  ;;  %vm904_vm7 = vcmp.eq.f32.partialorder %v3450_v13, %v3723_v25  ;;  %v3733_v60 = vpop.xlane.xlu1 %884  ;;  %v3740_v7 = vcvt.s32.f32 %v1295_v41 }
 0x1da   : > { %6139 = vst [vmem:[#allocation61_spill] sm:$0xff] %v3733_v60  ;;  %v3736_v28 = vsel %vm904_vm7, %v3286_v57, 128  ;;  %v3738_v46 = vcvt.s32.f32 %v1113_v59  ;;  %vm921_vm8 = vcmp.eq.f32.partialorder %v3455_v20, %v3733_v60 }
 0x1db   : > { %v1099_v10 = vshra.s32 %v3736_v28, 16  ;;  %v3748_v16 = vsel %vm921_vm8, %v3286_v57, 128 }
 0x1dc   : > { %v3745_v15 = vpop.xlane.xlu0 %882  ;;  %1116 = vmin.xlane.f32.xlu1 %v3738_v46  ;;  %1298 = vmin.xlane.f32.xlu0 %v3740_v7  ;;  %v1337_v25 = vshra.s32 %v3748_v16, 16 }
 0x1dd   : > { %6140 = vst [vmem:[#allocation62_spill] sm:$0xff] %v3745_v15  ;;  %vm920_vm9 = vcmp.eq.f32.partialorder %v3460_v23, %v3745_v15  ;;  %v3762_v13 = vcvt.s32.f32 %v1099_v10 }
 0x1de   : > { %v3755_v59 = vpop.xlane.xlu1 %856  ;;  %v3758_v41 = vsel %vm920_vm9, %v3286_v57, 128  ;;  %v3760_v60 = vcvt.s32.f32 %v1337_v25 }
 0x1df   : > { %6141 = vst [vmem:[#allocation63_spill] sm:$0xff] %v3755_v59  ;;  %6143 = vst [vmem:[#allocation65_spill] sm:$0xff] %v3762_v13  ;;  %vm907_vm10 = vcmp.eq.f32.partialorder %v3466_v31, %v3755_v59  ;;  %v1323_v20 = vshra.s32 %v3758_v41, 16 }
 0x1e0   : > { %6142 = vst [vmem:[#allocation64_spill] sm:$0xff] %v3760_v60  ;;  %v3767_v5 = vpop.xlane.xlu0 %854  ;;  %v3770_v0 = vsel %vm907_vm10, %v3286_v57, 128  ;;  %1340 = vmin.xlane.f32.xlu1 %v3760_v60  ;;  %1102 = vmin.xlane.f32.xlu0 %v3762_v13 }
 0x1e1   : > { %6144 = vst [vmem:[#allocation66_spill] sm:$0xff] %v3767_v5  ;;  %v1141_v15 = vshra.s32 %v3770_v0, 16  ;;  %vm906_vm11 = vcmp.eq.f32.partialorder %v3471_v32, %v3767_v5  ;;  %v3784_v23 = vcvt.s32.f32 %v1323_v20 }
 0x1e2   : > { %v3777_v25 = vpop.xlane.xlu1 %888  ;;  %v3780_v10 = vsel %vm906_vm11, %v3286_v57, 128 }
 0x1e3   : > { %6145 = vst [vmem:[#allocation67_spill] sm:$0xff] %v3777_v25  ;;  %v3782_v59 = vcvt.s32.f32 %v1141_v15  ;;  %6147 = vst [vmem:[#allocation69_spill] sm:$0xff] %v3784_v23  ;;  %vm923_vm12 = vcmp.eq.f32.partialorder %v3476_v35, %v3777_v25  ;;  %v1127_v31 = vshra.s32 %v3780_v10, 16 }
 0x1e4   : > { %v3789_v13 = vpop.xlane.xlu0 %886  ;;  %v3792_v60 = vsel %vm923_vm12, %v3286_v57, 128  ;;  %1326 = vmin.xlane.f32.xlu0 %v3784_v23 }
 0x1e5   : > { %6146 = vst [vmem:[#allocation68_spill] sm:$0xff] %v3782_v59  ;;  %6148 = vst [vmem:[#allocation70_spill] sm:$0xff] %v3789_v13  ;;  %1144 = vmin.xlane.f32.xlu1 %v3782_v59  ;;  %v1365_v5 = vshra.s32 %v3792_v60, 16  ;;  %vm922_vm13 = vcmp.eq.f32.partialorder %v3480_v37, %v3789_v13  ;;  %v3806_v32 = vcvt.s32.f32 %v1127_v31 }
 0x1e6   : > { %v3799_v15 = vpop.xlane.xlu1 %860  ;;  %v3802_v20 = vsel %vm922_vm13, %v3286_v57, 128 }
 0x1e7   : > { %6149 = vst [vmem:[#allocation71_spill] sm:$0xff] %v3799_v15  ;;  %v3804_v25 = vcvt.s32.f32 %v1365_v5  ;;  %6151 = vst [vmem:[#allocation73_spill] sm:$0xff] %v3806_v32  ;;  %vm909_vm14 = vcmp.eq.f32.partialorder %v3485_v40, %v3799_v15  ;;  %v1351_v35 = vshra.s32 %v3802_v20, 16 }
 0x1e8   : > { %v3811_v23 = vpop.xlane.xlu0 %858  ;;  %v3814_v59 = vsel %vm909_vm14, %v3286_v57, 128  ;;  %1130 = vmin.xlane.f32.xlu0 %v3806_v32 }
 0x1e9   : > { %6150 = vst [vmem:[#allocation72_spill] sm:$0xff] %v3804_v25  ;;  %6152 = vst [vmem:[#allocation74_spill] sm:$0xff] %v3811_v23  ;;  %1368 = vmin.xlane.f32.xlu1 %v3804_v25  ;;  %v1169_v13 = vshra.s32 %v3814_v59, 16  ;;  %vm908_vm15 = vcmp.eq.f32.partialorder %v3490_v47, %v3811_v23  ;;  %v3828_v37 = vcvt.s32.f32 %v1351_v35 }
 0x1ea   : > { %v3821_v5 = vpop.xlane.xlu1 %892  ;;  %v3824_v31 = vsel %vm908_vm15, %v3286_v57, 128 }
 0x1eb   : > { %6153 = vst [vmem:[#allocation75_spill] sm:$0xff] %v3821_v5  ;;  %v3826_v15 = vcvt.s32.f32 %v1169_v13  ;;  %6154 = vst [vmem:[#allocation76_spill] sm:$0xff] %v3828_v37  ;;  %vm925_vm0 = vcmp.eq.f32.partialorder %v3495_v51, %v3821_v5  ;;  %v1155_v40 = vshra.s32 %v3824_v31, 16 }
 0x1ec   : > { %v3833_v32 = vpop.xlane.xlu0 %890  ;;  %v3836_v25 = vsel %vm925_vm0, %v3286_v57, 128  ;;  %1354 = vmin.xlane.f32.xlu0 %v3828_v37  ;;  %v972_v37 = vand.u32 65535, %v3511_v58  ;;  %v1000_v58 = vand.u32 65535, %v3536_v8  ;;  %v1224_v8 = vand.u32 65535, %v3558_v17 }
 0x1ed   : > { %6155 = vst [vmem:[#allocation77_spill] sm:$0xff] %v3833_v32  ;;  %1172 = vmin.xlane.f32.xlu1 %v3826_v15  ;;  %v1393_v23 = vshra.s32 %v3836_v25, 16  ;;  %vm924_vm1 = vcmp.eq.f32.partialorder %v3500_v53, %v3833_v32  ;;  %v3848_v5 = vcvt.s32.f32 %v1155_v40  ;;  %v958_v40 = vand.u32 65535, %v3529_v6 }
 0x1ee   : > { %v3844_v13 = vsel %vm924_vm1, %v3286_v57, 128  ;;  %v974_v53 = vcvt.s32.f32 %v972_v37 }
 0x1ef   : > { %6156 = vst [vmem:[#allocation78_spill] sm:$0xff] %v3844_v13  ;;  %v3846_v35 = vcvt.s32.f32 %v1393_v23  ;;  %6158 = vst [vmem:[#allocation80_spill] sm:$0xff] %v3848_v5  ;;  %v1379_v47 = vshra.s32 %v3844_v13, 16  ;;  %v1196_v23 = vand.u32 65535, %v3517_v62  ;;  %v1182_v13 = vand.u32 65535, %v3550_v12 }
 0x1f0   : > { %1158 = vmin.xlane.f32.xlu0 %v3848_v5 }
 0x1f1   : > { %6157 = vst [vmem:[#allocation79_spill] sm:$0xff] %v3846_v35  ;;  %1396 = vmin.xlane.f32.xlu1 %v3846_v35  ;;  %v3853_v51 = vcvt.s32.f32 %v1379_v47  ;;  %v1198_v5 = vcvt.s32.f32 %v1196_v23  ;;  %v1184_v6 = vcvt.s32.f32 %v1182_v13  ;;  %v1210_v13 = vand.u32 65535, %v3579_v34 }
 0x1f3   : > { %6159 = vst [vmem:[#allocation81_spill] sm:$0xff] %v3853_v51 }
 0x1f4   : > { %1382 = vmin.xlane.f32.xlu0 %v3853_v51  ;;  %v960_v51 = vcvt.s32.f32 %v958_v40 }
 0x240   : > { %v3857_v32 = vpop.xlane.xlu1 %976 }
 0x241   : > { %vm978_vm2 = vcmp.eq.f32.partialorder %v3523_v3, %v3857_v32  ;;  %v1002_v3 = vcvt.s32.f32 %v1000_v58 }
 0x242   : > { %v979_v57 = vsel %vm978_vm2, %v974_v53, inf }
 0x243   : > { %980 = vmin.xlane.f32.xlu1 %v979_v57 }
 0x244   : > { %v3863_v35 = vpop.xlane.xlu1 %1200  ;;  %v3865_v47 = vpop.xlane.xlu0 %962 }
 0x245   : > { %vm1202_vm3 = vcmp.eq.f32.partialorder %v3542_v11, %v3863_v35  ;;  %vm964_vm4 = vcmp.eq.f32.partialorder %v3544_v44, %v3865_v47  ;;  %v986_v11 = vand.u32 65535, %v3576_v33 }
 0x246   : > { %v1203_v37 = vsel %vm1202_vm3, %v1198_v5, inf  ;;  %v965_v62 = vsel %vm964_vm4, %v960_v51, inf  ;;  %v1226_v5 = vcvt.s32.f32 %v1224_v8 }
 0x247   : > { %1204 = vmin.xlane.f32.xlu1 %v1203_v37  ;;  %966 = vmin.xlane.f32.xlu0 %v965_v62  ;;  %v988_v17 = vcvt.s32.f32 %v986_v11  ;;  %v1212_v62 = vcvt.s32.f32 %v1210_v13 }
 0x248   : > { %v3873_v57 = vpop.xlane.xlu1 %1004  ;;  %v3875_v53 = vpop.xlane.xlu0 %1186 }
 0x249   : > { %vm1006_vm5 = vcmp.eq.f32.partialorder %v3564_v21, %v3873_v57  ;;  %vm1188_vm6 = vcmp.eq.f32.partialorder %v3566_v24, %v3875_v53  ;;  %v1028_v21 = vand.u32 65535, %v3597_v48 }
 0x24a   : > { %v1007_v44 = vsel %vm1006_vm5, %v1002_v3, inf  ;;  %v1189_v51 = vsel %vm1188_vm6, %v1184_v6, inf  ;;  %v1014_v3 = vand.u32 65535, %v3600_v49  ;;  %v1238_v49 = vand.u32 65535, %v3626_v14 }
 0x24b   : > { %1008 = vmin.xlane.f32.xlu1 %v1007_v44  ;;  %1190 = vmin.xlane.f32.xlu0 %v1189_v51  ;;  %v1030_v37 = vcvt.s32.f32 %v1028_v21  ;;  %v1042_v14 = vand.u32 65535, %v3648_v18  ;;  %v1266_v18 = vand.u32 65535, %v3670_v45  ;;  %v1070_v45 = vand.u32 65535, %v3692_v1 }
 0x24c   : > { %v3883_v12 = vpop.xlane.xlu1 %1228  ;;  %v1016_v11 = vcvt.s32.f32 %v1014_v3  ;;  %v1294_v1 = vand.u32 65535, %v3714_v50  ;;  %v1098_v50 = vand.u32 65535, %v3736_v28  ;;  %v1322_v28 = vand.u32 65535, %v3758_v41 }
 0x24d   : > { %v3885_v23 = vpop.xlane.xlu0 %990  ;;  %vm1230_vm7 = vcmp.eq.f32.partialorder %v3586_v52, %v3883_v12  ;;  %v1252_v52 = vand.u32 65535, %v3616_v19  ;;  %v1056_v19 = vand.u32 65535, %v3638_v56  ;;  %v1280_v56 = vand.u32 65535, %v3660_v55 }
 0x24e   : > { %v1231_v24 = vsel %vm1230_vm7, %v1226_v5, inf  ;;  %vm992_vm8 = vcmp.eq.f32.partialorder %v3590_v61, %v3885_v23  ;;  %v1084_v55 = vand.u32 65535, %v3682_v27  ;;  %v1268_v3 = vcvt.s32.f32 %v1266_v18 }
 0x24f   : > { %1232 = vmin.xlane.f32.xlu1 %v1231_v24  ;;  %v993_v33 = vsel %vm992_vm8, %v988_v17, inf  ;;  %v1254_v8 = vcvt.s32.f32 %v1252_v52  ;;  %v1058_v5 = vcvt.s32.f32 %v1056_v19  ;;  %v1240_v17 = vcvt.s32.f32 %v1238_v49 }
 0x250   : > { %994 = vmin.xlane.f32.xlu0 %v993_v33  ;;  %v1282_v24 = vcvt.s32.f32 %v1280_v56  ;;  %v1044_v33 = vcvt.s32.f32 %v1042_v14  ;;  %v1086_v52 = vcvt.s32.f32 %v1084_v55  ;;  %v1308_v27 = vand.u32 65535, %v3704_v39 }
 0x251   : > { %v3893_v40 = vpop.xlane.xlu1 %1032  ;;  %v3895_v58 = vpop.xlane.xlu0 %1214  ;;  %v1112_v39 = vand.u32 65535, %v3726_v30  ;;  %v1336_v30 = vand.u32 65535, %v3748_v16  ;;  %v1100_v14 = vcvt.s32.f32 %v1098_v50  ;;  %v1140_v16 = vand.u32 65535, %v3770_v0 }
 0x252   : > { %vm1034_vm9 = vcmp.eq.f32.partialorder %v3606_v38, %v3893_v40  ;;  %vm1216_vm10 = vcmp.eq.f32.partialorder %v3608_v36, %v3895_v58  ;;  %v1324_v18 = vcvt.s32.f32 %v1322_v28  ;;  %v1364_v0 = vand.u32 65535, %v3792_v60  ;;  %v6167_v28 = vld [vmem:[#allocation78_spill] sm:$0xff] }
 0x253   : > { %v1035_v34 = vsel %vm1034_vm9, %v1030_v37, inf  ;;  %v1217_v61 = vsel %vm1216_vm10, %v1212_v62, inf  ;;  %v1338_v56 = vcvt.s32.f32 %v1336_v30  ;;  %v1142_v55 = vcvt.s32.f32 %v1140_v16  ;;  %v6166_v30 = vld [vmem:[#allocation76_spill] sm:$0xff] }
 0x254   : > { %1036 = vmin.xlane.f32.xlu1 %v1035_v34  ;;  %1218 = vmin.xlane.f32.xlu0 %v1217_v61  ;;  %v1126_v41 = vand.u32 65535, %v3780_v10  ;;  %v1168_v60 = vand.u32 65535, %v3814_v59  ;;  %v1350_v10 = vand.u32 65535, %v3802_v20  ;;  %v1392_v59 = vand.u32 65535, %v3836_v25 }
 0x255   : > { %v3903_v48 = vpop.xlane.xlu1 %1256  ;;  %v3905_v6 = vpop.xlane.xlu0 %1018  ;;  %v1154_v20 = vand.u32 65535, %v3824_v31  ;;  %v1378_v25 = vand.u32 65535, %v6167_v28  ;;  %v6168_v31 = vld [vmem:[#allocation79_spill] sm:$0xff]  ;;  %v6176_v28 = vld [vmem:[#allocation8_spill] sm:$0xff] }
 0x256   : > { %vm1258_vm11 = vcmp.eq.f32.partialorder %v3628_v29, %v3903_v48  ;;  %vm1020_vm12 = vcmp.eq.f32.partialorder %v3630_v9, %v3905_v6 }
 0x257   : > { %v1259_v36 = vsel %vm1258_vm11, %v1254_v8, inf  ;;  %v1021_v38 = vsel %vm1020_vm12, %v1016_v11, inf  ;;  %v1310_v8 = vcvt.s32.f32 %v1308_v27  ;;  %v1072_v11 = vcvt.s32.f32 %v1070_v45 }
 0x258   : > { %1260 = vmin.xlane.f32.xlu1 %v1259_v36  ;;  %1022 = vmin.xlane.f32.xlu0 %v1021_v38  ;;  %v1114_v36 = vcvt.s32.f32 %v1112_v39  ;;  %v1296_v38 = vcvt.s32.f32 %v1294_v1  ;;  %v1156_v16 = vcvt.s32.f32 %v1154_v20 }
 0x259   : > { %v3913_v44 = vpop.xlane.xlu1 %1060  ;;  %v3915_v51 = vpop.xlane.xlu0 %1242 }
 0x25a   : > { %vm1062_vm13 = vcmp.eq.f32.partialorder %v3650_v4, %v3913_v44  ;;  %vm1244_vm14 = vcmp.eq.f32.partialorder %v3652_v54, %v3915_v51 }
 0x25b   : > { %v1063_v9 = vsel %vm1062_vm13, %v1058_v5, inf  ;;  %v1245_v29 = vsel %vm1244_vm14, %v1240_v17, inf }
 0x25c   : > { %1064 = vmin.xlane.f32.xlu1 %v1063_v9  ;;  %1246 = vmin.xlane.f32.xlu0 %v1245_v29  ;;  %v6160_v9 = vld [vmem:[#allocation64_spill] sm:$0xff] }
 0x25d   : > { %v3923_v21 = vpop.xlane.xlu1 %1284  ;;  %v3925_v13 = vpop.xlane.xlu0 %1046 }
 0x25e   : > { %vm1286_vm15 = vcmp.eq.f32.partialorder %v3672_v42, %v3923_v21  ;;  %vm1048_vm0 = vcmp.eq.f32.partialorder %v3674_v43, %v3925_v13 }
 0x25f   : > { %v1287_v54 = vsel %vm1286_vm15, %v1282_v24, inf  ;;  %v1049_v4 = vsel %vm1048_vm0, %v1044_v33, inf }
 0x260   : > { %1288 = vmin.xlane.f32.xlu1 %v1287_v54  ;;  %1050 = vmin.xlane.f32.xlu0 %v1049_v4  ;;  %v6162_v54 = vld [vmem:[#allocation68_spill] sm:$0xff]  ;;  %v6163_v4 = vld [vmem:[#allocation69_spill] sm:$0xff] }
 0x261   : > { %v3933_v37 = vpop.xlane.xlu1 %1088  ;;  %v3935_v62 = vpop.xlane.xlu0 %1270 }
 0x262   : > { %vm1090_vm1 = vcmp.eq.f32.partialorder %v3694_v2, %v3933_v37  ;;  %vm1272_vm2 = vcmp.eq.f32.partialorder %v3696_v22, %v3935_v62 }
 0x263   : > { %v1091_v43 = vsel %vm1090_vm1, %v1086_v52, inf  ;;  %v1273_v42 = vsel %vm1272_vm2, %v1268_v3, inf }
 0x264   : > { %1092 = vmin.xlane.f32.xlu1 %v1091_v43  ;;  %1274 = vmin.xlane.f32.xlu0 %v1273_v42  ;;  %v1366_v43 = vcvt.s32.f32 %v1364_v0  ;;  %v1128_v42 = vcvt.s32.f32 %v1126_v41  ;;  %v983_v0 = vcvt.f32.s32 %v3857_v32  ;;  %v1207_v41 = vcvt.f32.s32 %v3863_v35  ;;  %v6172_v32 = vld [vmem:[#allocation6_spill] sm:$0xff]  ;;  %v6173_v35 = vld [vmem:[#allocation7_spill] sm:$0xff] }
 0x265   : > { %v3943_v34 = vpop.xlane.xlu1 %1312  ;;  %v3945_v61 = vpop.xlane.xlu0 %1074 }
 0x266   : > { %vm1314_vm3 = vcmp.eq.f32.partialorder %v3716_v26, %v3943_v34  ;;  %vm1076_vm4 = vcmp.eq.f32.partialorder %v3718_v63, %v3945_v61 }
 0x267   : > { %v1315_v22 = vsel %vm1314_vm3, %v1310_v8, inf  ;;  %v1077_v2 = vsel %vm1076_vm4, %v1072_v11, inf  ;;  %v6164_v8 = vld [vmem:[#allocation72_spill] sm:$0xff]  ;;  %v6165_v11 = vld [vmem:[#allocation73_spill] sm:$0xff] }
 0x268   : > { %1316 = vmin.xlane.f32.xlu1 %v1315_v22  ;;  %1078 = vmin.xlane.f32.xlu0 %v1077_v2 }
 0x269   : > { %v3953_v19 = vpop.xlane.xlu1 %1116  ;;  %v3955_v49 = vpop.xlane.xlu0 %1298 }
 0x26a   : > { %vm1118_vm5 = vcmp.eq.f32.partialorder %v3738_v46, %v3953_v19  ;;  %vm1300_vm6 = vcmp.eq.f32.partialorder %v3740_v7, %v3955_v49  ;;  %v6161_v46 = vld [vmem:[#allocation65_spill] sm:$0xff] }
 0x26b   : > { %v1119_v63 = vsel %vm1118_vm5, %v1114_v36, inf  ;;  %v1301_v26 = vsel %vm1300_vm6, %v1296_v38, inf  ;;  %v1170_v36 = vcvt.s32.f32 %v1168_v60  ;;  %v1352_v38 = vcvt.s32.f32 %v1350_v10 }
 0x26c   : > { %1120 = vmin.xlane.f32.xlu1 %v1119_v63  ;;  %1302 = vmin.xlane.f32.xlu0 %v1301_v26  ;;  %v1011_v10 = vcvt.f32.s32 %v3873_v57 }
 0x26d   : > { %v3963_v5 = vpop.xlane.xlu1 %1340  ;;  %v3965_v17 = vpop.xlane.xlu0 %1102 }
 0x26e   : > { %vm1342_vm7 = vcmp.eq.f32.partialorder %v6160_v9, %v3963_v5  ;;  %vm1104_vm8 = vcmp.eq.f32.partialorder %v6161_v46, %v3965_v17 }
 0x26f   : > { %v1343_v7 = vsel %vm1342_vm7, %v1338_v56, inf  ;;  %v1105_v29 = vsel %vm1104_vm8, %v1100_v14, inf  ;;  %v1394_v14 = vcvt.s32.f32 %v1392_v59  ;;  %v1012_v59 = vshll.u32 %v1011_v10, 16 }
 0x270   : > { %1344 = vmin.xlane.f32.xlu1 %v1343_v7  ;;  %1106 = vmin.xlane.f32.xlu0 %v1105_v29  ;;  %v1380_v29 = vcvt.s32.f32 %v1378_v25 }
 0x271   : > { %v3975_v33 = vpop.xlane.xlu0 %1326 }
 0x272   : > { %v3973_v24 = vpop.xlane.xlu1 %1144  ;;  %vm1328_vm10 = vcmp.eq.f32.partialorder %v6163_v4, %v3975_v33 }
 0x273   : > { %vm1146_vm9 = vcmp.eq.f32.partialorder %v6162_v54, %v3973_v24  ;;  %v1329_v3 = vsel %vm1328_vm10, %v1324_v18, inf  ;;  %v969_v54 = vcvt.f32.s32 %v3865_v47 }
 0x274   : > { %v1147_v52 = vsel %vm1146_vm9, %v1142_v55, inf  ;;  %1330 = vmin.xlane.f32.xlu0 %v1329_v3  ;;  %v6170_v55 = vld [vmem:[#allocation81_spill] sm:$0xff] }
 0x275   : > { %1148 = vmin.xlane.f32.xlu1 %v1147_v52  ;;  %v3985_v45 = vpop.xlane.xlu0 %1130  ;;  %v984_v52 = vshll.u32 %v983_v0, 16  ;;  %v970_v60 = vshll.u32 %v969_v54, 16 }
 0x276   : > { %v3983_v27 = vpop.xlane.xlu1 %1368  ;;  %vm1132_vm12 = vcmp.eq.f32.partialorder %v6165_v11, %v3985_v45 }
 0x277   : > { %vm1370_vm11 = vcmp.eq.f32.partialorder %v6164_v8, %v3983_v27  ;;  %v1133_v1 = vsel %vm1132_vm12, %v1128_v42, inf  ;;  %v1208_v42 = vshll.u32 %v1207_v41, 16 }
 0x278   : > { %v1371_v39 = vsel %vm1370_vm11, %v1366_v43, inf  ;;  %1134 = vmin.xlane.f32.xlu0 %v1133_v1 }
 0x279   : > { %1372 = vmin.xlane.f32.xlu1 %v1371_v39  ;;  %v3995_v2 = vpop.xlane.xlu0 %1354  ;;  %v1193_v39 = vcvt.f32.s32 %v3875_v53  ;;  %v1235_v53 = vcvt.f32.s32 %v3883_v12 }
 0x27a   : > { %v3993_v22 = vpop.xlane.xlu1 %1172  ;;  %vm1356_vm14 = vcmp.eq.f32.partialorder %v6166_v30, %v3995_v2 }
 0x27b   : > { %vm1174_vm13 = vcmp.eq.f32.partialorder %v3826_v15, %v3993_v22  ;;  %v1357_v63 = vsel %vm1356_vm14, %v1352_v38, inf  ;;  %v6169_v15 = vld [vmem:[#allocation80_spill] sm:$0xff] }
 0x27c   : > { %v1175_v50 = vsel %vm1174_vm13, %v1170_v36, inf  ;;  %1358 = vmin.xlane.f32.xlu0 %v1357_v63 }
 0x27d   : > { %1176 = vmin.xlane.f32.xlu1 %v1175_v50  ;;  %v4005_v56 = vpop.xlane.xlu0 %1158  ;;  %v1194_v50 = vshll.u32 %v1193_v39, 16 }
 0x27e   : > { %v4003_v26 = vpop.xlane.xlu1 %1396  ;;  %vm1160_vm0 = vcmp.eq.f32.partialorder %v6169_v15, %v4005_v56  ;;  %v6179_v15 = vld [vmem:[#allocation10_spill] sm:$0xff] }
 0x27f   : > { %vm1398_vm15 = vcmp.eq.f32.partialorder %v6168_v31, %v4003_v26  ;;  %v1161_v46 = vsel %vm1160_vm0, %v1156_v16, inf  ;;  %v997_v16 = vcvt.f32.s32 %v3885_v23 }
 0x280   : > { %v1399_v9 = vsel %vm1398_vm15, %v1394_v14, inf  ;;  %1162 = vmin.xlane.f32.xlu0 %v1161_v46 }
 0x281   : > { %1400 = vmin.xlane.f32.xlu1 %v1399_v9  ;;  %v4012_v7 = vpop.xlane.xlu0 %1382  ;;  %v1236_v9 = vshll.u32 %v1235_v53, 16  ;;  %v998_v41 = vshll.u32 %v997_v16, 16 }
 0x282   : > { %vm1384_vm1 = vcmp.eq.f32.partialorder %v6170_v55, %v4012_v7  ;;  %v1221_v55 = vcvt.f32.s32 %v3895_v58 }
 0x283   : > { %v1385_v18 = vsel %vm1384_vm1, %v1380_v29, inf  ;;  %v1039_v29 = vcvt.f32.s32 %v3893_v40  ;;  %v6182_v40 = vld [vmem:[#allocation12_spill] sm:$0xff] }
 0x284   : > { %1386 = vmin.xlane.f32.xlu0 %v1385_v18  ;;  %v1222_v10 = vshll.u32 %v1221_v55, 16 }
 0x2d0   : > { %v981_v4 = vpop.xlane.xlu1 %980 }
 0x2d1   : > { %v982_v3 = vcvt.f32.s32 %v981_v4  ;;  %v6180_v4 = vld [vmem:[#allocation9_spill] sm:$0xff] }
 0x2d3   : > { %v4019_v43 = vadd.s32 %v984_v52, %v982_v3 }
 0x2d4   : > { %v1205_v8 = vpop.xlane.xlu1 %1204  ;;  %v967_v11 = vpop.xlane.xlu0 %966 }
 0x2d5   : > { %6171 = vst [vmem:[#allocation64_spill] sm:$0xff] %v4019_v43  ;;  %v1206_v1 = vcvt.f32.s32 %v1205_v8  ;;  %v968_v36 = vcvt.f32.s32 %v967_v11  ;;  %vm1407_vm2 = vcmp.eq.s32.totalorder %v6172_v32, %v4019_v43  ;;  %v1263_v8 = vcvt.f32.s32 %v3903_v48 }
 0x2d6   : > { %v4029_v47 = vsel %vm1407_vm2, -1e+30, %v6173_v35 }
 0x2d7   : > { %v4031_v38 = vadd.s32 %v1208_v42, %v1206_v1  ;;  %1568 = vmax.xlane.f32.xlu1 %v4029_v47  ;;  %v4034_v57 = vadd.s32 %v970_v60, %v968_v36  ;;  %v1040_v60 = vshll.u32 %v1039_v29, 16  ;;  %v1025_v1 = vcvt.f32.s32 %v3905_v6 }
 0x2d8   : > { %v1009_v20 = vpop.xlane.xlu1 %1008  ;;  %v1191_v30 = vpop.xlane.xlu0 %1190 }
 0x2d9   : > { %6174 = vst [vmem:[#allocation65_spill] sm:$0xff] %v4031_v38  ;;  %6175 = vst [vmem:[#allocation68_spill] sm:$0xff] %v4034_v57  ;;  %v1010_v63 = vcvt.f32.s32 %v1009_v20  ;;  %v1192_v14 = vcvt.f32.s32 %v1191_v30  ;;  %vm1423_vm3 = vcmp.eq.s32.totalorder %v6172_v32, %v4031_v38  ;;  %vm1406_vm4 = vcmp.eq.s32.totalorder %v6172_v32, %v4034_v57  ;;  %v6187_v30 = vld [vmem:[#allocation13_spill] sm:$0xff] }
 0x2da   : > { %v4044_v25 = vsel %vm1423_vm3, -1e+30, %v6176_v28  ;;  %v4057_v23 = vsel %vm1406_vm4, -1e+30, %v6179_v15  ;;  %v1026_v28 = vshll.u32 %v1025_v1, 16  ;;  %v1249_v15 = vcvt.f32.s32 %v3915_v51  ;;  %v6194_v1 = vld [vmem:[#allocation17_spill] sm:$0xff] }
 0x2db   : > { %v4048_v12 = vadd.s32 %v1012_v59, %v1010_v63  ;;  %v4050_v31 = vadd.s32 %v1194_v50, %v1192_v14  ;;  %1600 = vmax.xlane.f32.xlu1 %v4044_v25  ;;  %1566 = vmax.xlane.f32.xlu0 %v4057_v23  ;;  %v6184_v59 = vld [vmem:[#allocation11_spill] sm:$0xff]  ;;  %v1264_v50 = vshll.u32 %v1263_v8, 16  ;;  %v1067_v63 = vcvt.f32.s32 %v3913_v44  ;;  %v6190_v44 = vld [vmem:[#allocation16_spill] sm:$0xff] }
 0x2dc   : > { %v1233_v46 = vpop.xlane.xlu1 %1232  ;;  %v1291_v51 = vcvt.f32.s32 %v3923_v21 }
 0x2dd   : > { %6177 = vst [vmem:[#allocation69_spill] sm:$0xff] %v4048_v12  ;;  %6178 = vst [vmem:[#allocation72_spill] sm:$0xff] %v4050_v31  ;;  %v1234_v18 = vcvt.f32.s32 %v1233_v46  ;;  %v995_v0 = vpop.xlane.xlu0 %994  ;;  %vm1409_vm5 = vcmp.eq.s32.totalorder %v6172_v32, %v4048_v12  ;;  %vm1422_vm6 = vcmp.eq.s32.totalorder %v6172_v32, %v4050_v31 }
 0x2de   : > { %v996_v54 = vcvt.f32.s32 %v995_v0  ;;  %v4068_v52 = vsel %vm1409_vm5, -1e+30, %v6180_v4  ;;  %v4079_v58 = vsel %vm1422_vm6, -1e+30, %v6182_v40  ;;  %v1068_v0 = vshll.u32 %v1067_v63, 16 }
 0x2df   : > { %v4072_v3 = vadd.s32 %v1236_v9, %v1234_v18  ;;  %1572 = vmax.xlane.f32.xlu1 %v4068_v52  ;;  %1598 = vmax.xlane.f32.xlu0 %v4079_v58 }
 0x2e0   : > { %v4081_v42 = vadd.s32 %v998_v41, %v996_v54  ;;  %v6191_v41 = vld [vmem:[#allocation14_spill] sm:$0xff] }
 0x2e1   : > { %6181 = vst [vmem:[#allocation73_spill] sm:$0xff] %v4072_v3  ;;  %v1037_v11 = vpop.xlane.xlu1 %1036  ;;  %v1219_v39 = vpop.xlane.xlu0 %1218  ;;  %vm1425_vm7 = vcmp.eq.s32.totalorder %v6172_v32, %v4072_v3 }
 0x2e2   : > { %6183 = vst [vmem:[#allocation76_spill] sm:$0xff] %v4081_v42  ;;  %v1038_v36 = vcvt.f32.s32 %v1037_v11  ;;  %v1220_v35 = vcvt.f32.s32 %v1219_v39  ;;  %v4092_v53 = vsel %vm1425_vm7, -1e+30, %v6184_v59  ;;  %vm1408_vm8 = vcmp.eq.s32.totalorder %v6172_v32, %v4081_v42  ;;  %v6195_v59 = vld [vmem:[#allocation15_spill] sm:$0xff] }
 0x2e3   : > { %1604 = vmax.xlane.f32.xlu1 %v4092_v53  ;;  %v4105_v6 = vsel %vm1408_vm8, -1e+30, %v6187_v30 }
 0x2e4   : > { %v4097_v48 = vadd.s32 %v1040_v60, %v1038_v36  ;;  %v4099_v20 = vadd.s32 %v1222_v10, %v1220_v35  ;;  %1570 = vmax.xlane.f32.xlu0 %v4105_v6  ;;  %v1250_v60 = vshll.u32 %v1249_v15, 16  ;;  %v1053_v10 = vcvt.f32.s32 %v3925_v13 }
 0x2e5   : > { %v1261_v14 = vpop.xlane.xlu1 %1260  ;;  %v1023_v16 = vpop.xlane.xlu0 %1022  ;;  %v1292_v13 = vshll.u32 %v1291_v51, 16  ;;  %v1095_v35 = vcvt.f32.s32 %v3933_v37  ;;  %v6199_v51 = vld [vmem:[#allocation18_spill] sm:$0xff] }
 0x2e6   : > { %6185 = vst [vmem:[#allocation78_spill] sm:$0xff] %v4097_v48  ;;  %6186 = vst [vmem:[#allocation79_spill] sm:$0xff] %v4099_v20  ;;  %v1262_v9 = vcvt.f32.s32 %v1261_v14  ;;  %v1024_v46 = vcvt.f32.s32 %v1023_v16  ;;  %vm1411_vm9 = vcmp.eq.s32.totalorder %v6172_v32, %v4097_v48  ;;  %vm1424_vm10 = vcmp.eq.s32.totalorder %v6172_v32, %v4099_v20 }
 0x2e7   : > { %v4122_v18 = vsel %vm1411_vm9, -1e+30, %v6190_v44  ;;  %v4130_v54 = vsel %vm1424_vm10, -1e+30, %v6191_v41  ;;  %v1054_v14 = vshll.u32 %v1053_v10, 16  ;;  %v1277_v16 = vcvt.f32.s32 %v3935_v62 }
 0x2e8   : > { %v4114_v29 = vadd.s32 %v1264_v50, %v1262_v9  ;;  %v4116_v55 = vadd.s32 %v1026_v28, %v1024_v46  ;;  %1576 = vmax.xlane.f32.xlu1 %v4122_v18  ;;  %1602 = vmax.xlane.f32.xlu0 %v4130_v54  ;;  %v6198_v46 = vld [vmem:[#allocation19_spill] sm:$0xff]  ;;  %v1096_v62 = vshll.u32 %v1095_v35, 16  ;;  %v1081_v10 = vcvt.f32.s32 %v3945_v61 }
 0x2e9   : > { %v1065_v4 = vpop.xlane.xlu1 %1064  ;;  %v1247_v40 = vpop.xlane.xlu0 %1246 }
 0x2ea   : > { %6188 = vst [vmem:[#allocation80_spill] sm:$0xff] %v4114_v29  ;;  %6189 = vst [vmem:[#allocation81_spill] sm:$0xff] %v4116_v55  ;;  %v1066_v8 = vcvt.f32.s32 %v1065_v4  ;;  %v1248_v11 = vcvt.f32.s32 %v1247_v40  ;;  %vm1427_vm11 = vcmp.eq.s32.totalorder %v6172_v32, %v4114_v29  ;;  %vm1410_vm12 = vcmp.eq.s32.totalorder %v6172_v32, %v4116_v55 }
 0x2eb   : > { %v4146_v36 = vsel %vm1427_vm11, -1e+30, %v6194_v1  ;;  %v4154_v30 = vsel %vm1410_vm12, -1e+30, %v6195_v59  ;;  %v1123_v59 = vcvt.f32.s32 %v3953_v19 }
 0x2ec   : > { %v4138_v21 = vadd.s32 %v1068_v0, %v1066_v8  ;;  %v4140_v39 = vadd.s32 %v1250_v60, %v1248_v11  ;;  %1608 = vmax.xlane.f32.xlu1 %v4146_v36  ;;  %1574 = vmax.xlane.f32.xlu0 %v4154_v30  ;;  %v1319_v0 = vcvt.f32.s32 %v3943_v34  ;;  %v1278_v60 = vshll.u32 %v1277_v16, 16 }
 0x2ed   : > { %v1289_v50 = vpop.xlane.xlu1 %1288  ;;  %v1051_v63 = vpop.xlane.xlu0 %1050 }
 0x2ee   : > { %6192 = vst [vmem:[#allocation7_spill] sm:$0xff] %v4138_v21  ;;  %6193 = vst [vmem:[#allocation8_spill] sm:$0xff] %v4140_v39  ;;  %v1290_v28 = vcvt.f32.s32 %v1289_v50  ;;  %v1052_v15 = vcvt.f32.s32 %v1051_v63  ;;  %vm1413_vm13 = vcmp.eq.s32.totalorder %v6172_v32, %v4138_v21  ;;  %vm1426_vm14 = vcmp.eq.s32.totalorder %v6172_v32, %v4140_v39  ;;  %v6203_v50 = vld [vmem:[#allocation20_spill] sm:$0xff] }
 0x2ef   : > { %v4170_v44 = vsel %vm1413_vm13, -1e+30, %v6198_v46  ;;  %v4178_v41 = vsel %vm1426_vm14, -1e+30, %v6199_v51  ;;  %v1320_v61 = vshll.u32 %v1319_v0, 16  ;;  %v6206_v51 = vld [vmem:[#allocation23_spill] sm:$0xff] }
 0x2f0   : > { %v4162_v37 = vadd.s32 %v1292_v13, %v1290_v28  ;;  %v4164_v9 = vadd.s32 %v1054_v14, %v1052_v15  ;;  %1580 = vmax.xlane.f32.xlu1 %v4170_v44  ;;  %1606 = vmax.xlane.f32.xlu0 %v4178_v41  ;;  %v6202_v13 = vld [vmem:[#allocation21_spill] sm:$0xff]  ;;  %v1082_v28 = vshll.u32 %v1081_v10, 16  ;;  %v1305_v15 = vcvt.f32.s32 %v3955_v49 }
 0x2f1   : > { %v1093_v4 = vpop.xlane.xlu1 %1092  ;;  %v1275_v40 = vpop.xlane.xlu0 %1274  ;;  %v1124_v49 = vshll.u32 %v1123_v59, 16 }
 0x2f2   : > { %6196 = vst [vmem:[#allocation10_spill] sm:$0xff] %v4162_v37  ;;  %6197 = vst [vmem:[#allocation9_spill] sm:$0xff] %v4164_v9  ;;  %v1094_v8 = vcvt.f32.s32 %v1093_v4  ;;  %v1276_v11 = vcvt.f32.s32 %v1275_v40  ;;  %vm5893_vm15 = vcmp.eq.s32.totalorder %v6172_v32, %v4162_v37  ;;  %vm5895_vm0 = vcmp.eq.s32.totalorder %v6172_v32, %v4164_v9 }
 0x2f3   : > { %v4194_v35 = vsel %vm5893_vm15, -1e+30, %v6202_v13  ;;  %v4202_v63 = vsel %vm5895_vm0, -1e+30, %v6203_v50  ;;  %v1347_v40 = vcvt.f32.s32 %v3963_v5  ;;  %v1306_v13 = vshll.u32 %v1305_v15, 16 }
 0x2f4   : > { %v4186_v34 = vadd.s32 %v1096_v62, %v1094_v8  ;;  %v4188_v1 = vadd.s32 %v1278_v60, %v1276_v11  ;;  %1612 = vmax.xlane.f32.xlu1 %v4194_v35  ;;  %1578 = vmax.xlane.f32.xlu0 %v4202_v63  ;;  %v6207_v60 = vld [vmem:[#allocation22_spill] sm:$0xff]  ;;  %v1151_v15 = vcvt.f32.s32 %v3973_v24 }
 0x2f5   : > { %v1317_v14 = vpop.xlane.xlu1 %1316  ;;  %v1079_v16 = vpop.xlane.xlu0 %1078 }
 0x2f6   : > { %6200 = vst [vmem:[#allocation12_spill] sm:$0xff] %v4186_v34  ;;  %6201 = vst [vmem:[#allocation11_spill] sm:$0xff] %v4188_v1  ;;  %v1318_v46 = vcvt.f32.s32 %v1317_v14  ;;  %v1080_v62 = vcvt.f32.s32 %v1079_v16  ;;  %vm5894_vm1 = vcmp.eq.s32.totalorder %v6172_v32, %v4186_v34  ;;  %vm5897_vm15 = vcmp.eq.s32.totalorder %v6172_v32, %v4188_v1  ;;  %v6210_v16 = vld [vmem:[#allocation25_spill] sm:$0xff] }
 0x2f7   : > { %v4218_v4 = vsel %vm5894_vm1, -1e+30, %v6206_v51  ;;  %v4226_v10 = vsel %vm5897_vm15, -1e+30, %v6207_v60 }
 0x2f8   : > { %v4210_v19 = vadd.s32 %v1320_v61, %v1318_v46  ;;  %v4212_v0 = vadd.s32 %v1082_v28, %v1080_v62  ;;  %1584 = vmax.xlane.f32.xlu1 %v4218_v4  ;;  %v1109_v61 = vcvt.f32.s32 %v3965_v17  ;;  %1610 = vmax.xlane.f32.xlu0 %v4226_v10  ;;  %v1348_v17 = vshll.u32 %v1347_v40, 16  ;;  %v6211_v46 = vld [vmem:[#allocation24_spill] sm:$0xff] }
 0x2f9   : > { %v1121_v8 = vpop.xlane.xlu1 %1120  ;;  %v1303_v11 = vpop.xlane.xlu0 %1302 }
 0x2fa   : > { %6204 = vst [vmem:[#allocation13_spill] sm:$0xff] %v4210_v19  ;;  %6205 = vst [vmem:[#allocation16_spill] sm:$0xff] %v4212_v0  ;;  %v1122_v50 = vcvt.f32.s32 %v1121_v8  ;;  %v1304_v14 = vcvt.f32.s32 %v1303_v11  ;;  %vm5896_vm1 = vcmp.eq.s32.totalorder %v6172_v32, %v4210_v19  ;;  %vm5899_vm0 = vcmp.eq.s32.totalorder %v6172_v32, %v4212_v0 }
 0x2fb   : > { %v4242_v28 = vsel %vm5896_vm1, -1e+30, %v6210_v16  ;;  %v4250_v62 = vsel %vm5899_vm0, -1e+30, %v6211_v46  ;;  %v1110_v60 = vshll.u32 %v1109_v61, 16  ;;  %v1333_v8 = vcvt.f32.s32 %v3975_v33  ;;  %v6215_v16 = vld [vmem:[#allocation26_spill] sm:$0xff] }
 0x2fc   : > { %v4234_v5 = vadd.s32 %v1124_v49, %v1122_v50  ;;  %v4236_v59 = vadd.s32 %v1306_v13, %v1304_v14  ;;  %1616 = vmax.xlane.f32.xlu1 %v4242_v28  ;;  %1582 = vmax.xlane.f32.xlu0 %v4250_v62  ;;  %v6214_v50 = vld [vmem:[#allocation27_spill] sm:$0xff]  ;;  %v1152_v33 = vshll.u32 %v1151_v15, 16  ;;  %v1375_v14 = vcvt.f32.s32 %v3983_v27 }
 0x2fd   : > { %v1345_v51 = vpop.xlane.xlu1 %1344  ;;  %v1107_v49 = vpop.xlane.xlu0 %1106 }
 0x2fe   : > { %6208 = vst [vmem:[#allocation14_spill] sm:$0xff] %v4234_v5  ;;  %6209 = vst [vmem:[#allocation17_spill] sm:$0xff] %v4236_v59  ;;  %v1346_v11 = vcvt.f32.s32 %v1345_v51  ;;  %v1108_v13 = vcvt.f32.s32 %v1107_v49  ;;  %vm5898_vm1 = vcmp.eq.s32.totalorder %v6172_v32, %v4234_v5  ;;  %vm5903_vm15 = vcmp.eq.s32.totalorder %v6172_v32, %v4236_v59 }
 0x2ff   : > { %v4266_v61 = vsel %vm5898_vm1, -1e+30, %v6214_v50  ;;  %v4274_v46 = vsel %vm5903_vm15, -1e+30, %v6215_v16  ;;  %v1334_v49 = vshll.u32 %v1333_v8, 16  ;;  %v6218_v50 = vld [vmem:[#allocation29_spill] sm:$0xff]  ;;  %v1179_v16 = vcvt.f32.s32 %v3993_v22 }
 0x300   : > { %v4258_v24 = vadd.s32 %v1348_v17, %v1346_v11  ;;  %v4260_v40 = vadd.s32 %v1110_v60, %v1108_v13  ;;  %1588 = vmax.xlane.f32.xlu1 %v4266_v61  ;;  %v1137_v60 = vcvt.f32.s32 %v3985_v45  ;;  %1614 = vmax.xlane.f32.xlu0 %v4274_v46  ;;  %v1376_v45 = vshll.u32 %v1375_v14, 16 }
 0x301   : > { %v1331_v51 = vpop.xlane.xlu0 %1330 }
 0x302   : > { %6212 = vst [vmem:[#allocation15_spill] sm:$0xff] %v4258_v24  ;;  %6213 = vst [vmem:[#allocation19_spill] sm:$0xff] %v4260_v40  ;;  %v1149_v17 = vpop.xlane.xlu1 %1148  ;;  %v1332_v13 = vcvt.f32.s32 %v1331_v51  ;;  %vm5902_vm1 = vcmp.eq.s32.totalorder %v6172_v32, %v4258_v24  ;;  %vm5909_vm0 = vcmp.eq.s32.totalorder %v6172_v32, %v4260_v40 }
 0x303   : > { %v1150_v11 = vcvt.f32.s32 %v1149_v17  ;;  %v4290_v8 = vsel %vm5902_vm1, -1e+30, %v6218_v50  ;;  %v6219_v17 = vld [vmem:[#allocation28_spill] sm:$0xff] }
 0x304   : > { %v4284_v15 = vadd.s32 %v1334_v49, %v1332_v13  ;;  %1620 = vmax.xlane.f32.xlu1 %v4290_v8  ;;  %v4298_v51 = vsel %vm5909_vm0, -1e+30, %v6219_v17  ;;  %v1361_v13 = vcvt.f32.s32 %v3995_v2  ;;  %v6222_v17 = vld [vmem:[#allocation31_spill] sm:$0xff]  ;;  %v1180_v2 = vshll.u32 %v1179_v16, 16 }
 0x305   : > { %v4282_v27 = vadd.s32 %v1152_v33, %v1150_v11  ;;  %v1135_v49 = vpop.xlane.xlu0 %1134  ;;  %v1138_v11 = vshll.u32 %v1137_v60, 16  ;;  %1586 = vmax.xlane.f32.xlu0 %v4298_v51 }
 0x306   : > { %6217 = vst [vmem:[#allocation21_spill] sm:$0xff] %v4284_v15  ;;  %v1373_v33 = vpop.xlane.xlu1 %1372  ;;  %v1136_v24 = vcvt.f32.s32 %v1135_v49  ;;  %vm5915_vm15 = vcmp.eq.s32.totalorder %v6172_v32, %v4284_v15  ;;  %v6223_v49 = vld [vmem:[#allocation30_spill] sm:$0xff] }
 0x307   : > { %6216 = vst [vmem:[#allocation18_spill] sm:$0xff] %v4282_v27  ;;  %v1374_v50 = vcvt.f32.s32 %v1373_v33  ;;  %vm5908_vm1 = vcmp.eq.s32.totalorder %v6172_v32, %v4282_v27  ;;  %v1403_v33 = vcvt.f32.s32 %v4003_v26  ;;  %v4322_v40 = vsel %vm5915_vm15, -1e+30, %v6223_v49  ;;  %v6226_v49 = vld [vmem:[#allocation33_spill] sm:$0xff] }
 0x308   : > { %v4308_v14 = vadd.s32 %v1138_v11, %v1136_v24  ;;  %v4314_v60 = vsel %vm5908_vm1, -1e+30, %v6222_v17  ;;  %v1362_v11 = vshll.u32 %v1361_v13, 16 }
 0x309   : > { %v4306_v22 = vadd.s32 %v1376_v45, %v1374_v50  ;;  %1592 = vmax.xlane.f32.xlu1 %v4314_v60  ;;  %v1359_v24 = vpop.xlane.xlu0 %1358  ;;  %v1165_v50 = vcvt.f32.s32 %v4005_v56  ;;  %1618 = vmax.xlane.f32.xlu0 %v4322_v40  ;;  %v1404_v56 = vshll.u32 %v1403_v33, 16 }
 0x30a   : > { %6221 = vst [vmem:[#allocation23_spill] sm:$0xff] %v4308_v14  ;;  %v1177_v45 = vpop.xlane.xlu1 %1176  ;;  %v1360_v27 = vcvt.f32.s32 %v1359_v24  ;;  %vm5918_vm0 = vcmp.eq.s32.totalorder %v6172_v32, %v4308_v14 }
 0x30b   : > { %6220 = vst [vmem:[#allocation20_spill] sm:$0xff] %v4306_v22  ;;  %v1178_v17 = vcvt.f32.s32 %v1177_v45  ;;  %vm5914_vm1 = vcmp.eq.s32.totalorder %v6172_v32, %v4306_v22  ;;  %v6227_v45 = vld [vmem:[#allocation32_spill] sm:$0xff] }
 0x30c   : > { %v4332_v16 = vadd.s32 %v1362_v11, %v1360_v27  ;;  %v4338_v13 = vsel %vm5914_vm1, -1e+30, %v6226_v49  ;;  %v4345_v24 = vsel %vm5918_vm0, -1e+30, %v6227_v45  ;;  %v1389_v27 = vcvt.f32.s32 %v4012_v7  ;;  %v6230_v45 = vld [vmem:[#allocation35_spill] sm:$0xff]  ;;  %v6231_v7 = vld [vmem:[#allocation34_spill] sm:$0xff] }
 0x30d   : > { %v4330_v26 = vadd.s32 %v1180_v2, %v1178_v17  ;;  %1624 = vmax.xlane.f32.xlu1 %v4338_v13  ;;  %v1163_v2 = vpop.xlane.xlu0 %1162  ;;  %v1166_v17 = vshll.u32 %v1165_v50, 16  ;;  %1590 = vmax.xlane.f32.xlu0 %v4345_v24 }
 0x30e   : > { %6225 = vst [vmem:[#allocation25_spill] sm:$0xff] %v4332_v16  ;;  %v1401_v15 = vpop.xlane.xlu1 %1400  ;;  %v1164_v22 = vcvt.f32.s32 %v1163_v2  ;;  %vm5920_vm15 = vcmp.eq.s32.totalorder %v6172_v32, %v4332_v16  ;;  %v1390_v14 = vshll.u32 %v1389_v27, 16 }
 0x30f   : > { %6224 = vst [vmem:[#allocation22_spill] sm:$0xff] %v4330_v26  ;;  %v1402_v11 = vcvt.f32.s32 %v1401_v15  ;;  %vm5919_vm1 = vcmp.eq.s32.totalorder %v6172_v32, %v4330_v26  ;;  %v4368_v15 = vsel %vm5920_vm15, -1e+30, %v6231_v7  ;;  %v6235_v7 = vld [vmem:[#allocation38_spill] sm:$0xff] }
 0x310   : > { %v4355_v49 = vadd.s32 %v1166_v17, %v1164_v22  ;;  %v4361_v50 = vsel %vm5919_vm1, -1e+30, %v6230_v45  ;;  %v6234_v45 = vld [vmem:[#allocation36_spill] sm:$0xff] }
 0x311   : > { %v4353_v33 = vadd.s32 %v1404_v56, %v1402_v11  ;;  %1596 = vmax.xlane.f32.xlu1 %v4361_v50  ;;  %v1387_v2 = vpop.xlane.xlu0 %1386  ;;  %1622 = vmax.xlane.f32.xlu0 %v4368_v15  ;;  %v6232_v56 = vld [vmem:[#allocation37_spill] sm:$0xff] }
 0x312   : > { %6229 = vst [vmem:[#allocation27_spill] sm:$0xff] %v4355_v49  ;;  %v1388_v22 = vcvt.f32.s32 %v1387_v2  ;;  %vm5921_vm1 = vcmp.eq.s32.totalorder %v6172_v32, %v4355_v49 }
 0x313   : > { %6228 = vst [vmem:[#allocation24_spill] sm:$0xff] %v4353_v33  ;;  %vm5922_vm0 = vcmp.eq.s32.totalorder %v6172_v32, %v4353_v33  ;;  %v4387_v27 = vsel %vm5921_vm1, -1e+30, %v6234_v45 }
 0x314   : > { %v4377_v17 = vsel %vm5922_vm0, -1e+30, %v6232_v56  ;;  %v4381_v11 = vadd.s32 %v1390_v14, %v1388_v22 }
 0x315   : > { %1628 = vmax.xlane.f32.xlu1 %v4377_v17  ;;  %1594 = vmax.xlane.f32.xlu0 %v4387_v27 }
 0x316   : > { %6233 = vst [vmem:[#allocation26_spill] sm:$0xff] %v4381_v11  ;;  %vm5927_vm15 = vcmp.eq.s32.totalorder %v6172_v32, %v4381_v11 }
 0x317   : > { %v4397_v2 = vsel %vm5927_vm15, -1e+30, %v6235_v7 }
 0x319   : > { %1626 = vmax.xlane.f32.xlu0 %v4397_v2 }
 0x364   : > { %v4400_v14 = vpop.xlane.xlu1 %1568 }
 0x365   : > { %6236 = vst [vmem:[#allocation29_spill] sm:$0xff] %v4400_v14  ;;  %vm1631_vm1 = vcmp.eq.f32.partialorder %v4029_v47, %v4400_v14 }
 0x366   : > { %v4405_v22 = vsel %vm1631_vm1, %v6172_v32, 128 }
 0x367   : > { %v1709_v56 = vshra.s32 %v4405_v22, 16 }
 0x368   : > { %v4408_v45 = vpop.xlane.xlu1 %1600  ;;  %v4412_v11 = vpop.xlane.xlu0 %1566 }
 0x369   : > { %6237 = vst [vmem:[#allocation28_spill] sm:$0xff] %v4408_v45  ;;  %vm1647_vm0 = vcmp.eq.f32.partialorder %v4044_v25, %v4408_v45  ;;  %6238 = vst [vmem:[#allocation31_spill] sm:$0xff] %v4412_v11  ;;  %v4414_v7 = vcvt.s32.f32 %v1709_v56  ;;  %vm1630_vm15 = vcmp.eq.f32.partialorder %v4057_v23, %v4412_v11 }
 0x36a   : > { %v4417_v49 = vsel %vm1647_vm0, %v6172_v32, 128  ;;  %v4422_v47 = vsel %vm1630_vm15, %v6172_v32, 128 }
 0x36b   : > { %1712 = vmin.xlane.f32.xlu1 %v4414_v7  ;;  %v1933_v33 = vshra.s32 %v4417_v49, 16  ;;  %v1695_v25 = vshra.s32 %v4422_v47, 16 }
 0x36c   : > { %v4426_v16 = vpop.xlane.xlu1 %1572  ;;  %v4431_v56 = vpop.xlane.xlu0 %1598 }
 0x36d   : > { %6239 = vst [vmem:[#allocation30_spill] sm:$0xff] %v4426_v16  ;;  %vm1633_vm1 = vcmp.eq.f32.partialorder %v4068_v52, %v4426_v16  ;;  %6240 = vst [vmem:[#allocation33_spill] sm:$0xff] %v4431_v56  ;;  %v4433_v26 = vcvt.s32.f32 %v1933_v33  ;;  %vm1646_vm15 = vcmp.eq.f32.partialorder %v4079_v58, %v4431_v56  ;;  %v4444_v5 = vcvt.s32.f32 %v1695_v25 }
 0x36e   : > { %v4436_v23 = vsel %vm1633_vm1, %v6172_v32, 128  ;;  %v4441_v59 = vsel %vm1646_vm15, %v6172_v32, 128 }
 0x36f   : > { %1936 = vmin.xlane.f32.xlu1 %v4433_v26  ;;  %v1737_v0 = vshra.s32 %v4436_v23, 16  ;;  %v1919_v33 = vshra.s32 %v4441_v59, 16  ;;  %1698 = vmin.xlane.f32.xlu0 %v4444_v5 }
 0x370   : > { %v4447_v52 = vpop.xlane.xlu1 %1604 }
 0x371   : > { %6241 = vst [vmem:[#allocation32_spill] sm:$0xff] %v4447_v52  ;;  %vm1649_vm0 = vcmp.eq.f32.partialorder %v4092_v53, %v4447_v52  ;;  %v4453_v19 = vcvt.s32.f32 %v1737_v0  ;;  %v4458_v1 = vpop.xlane.xlu0 %1570  ;;  %v4460_v25 = vcvt.s32.f32 %v1919_v33 }
 0x372   : > { %v4456_v58 = vsel %vm1649_vm0, %v6172_v32, 128  ;;  %6242 = vst [vmem:[#allocation35_spill] sm:$0xff] %v4458_v1  ;;  %vm1632_vm1 = vcmp.eq.f32.partialorder %v4105_v6, %v4458_v1 }
 0x373   : > { %1740 = vmin.xlane.f32.xlu1 %v4453_v19  ;;  %v1961_v34 = vshra.s32 %v4456_v58, 16  ;;  %v4467_v9 = vsel %vm1632_vm1, %v6172_v32, 128  ;;  %1922 = vmin.xlane.f32.xlu0 %v4460_v25 }
 0x374   : > { %v1723_v0 = vshra.s32 %v4467_v9, 16 }
 0x375   : > { %v4470_v53 = vcvt.s32.f32 %v1961_v34  ;;  %v4473_v37 = vpop.xlane.xlu1 %1576  ;;  %v4477_v33 = vpop.xlane.xlu0 %1602 }
 0x376   : > { %6243 = vst [vmem:[#allocation34_spill] sm:$0xff] %v4473_v37  ;;  %vm1635_vm15 = vcmp.eq.f32.partialorder %v4122_v18, %v4473_v37  ;;  %6244 = vst [vmem:[#allocation37_spill] sm:$0xff] %v4477_v33  ;;  %v4480_v6 = vcvt.s32.f32 %v1723_v0  ;;  %vm1648_vm0 = vcmp.eq.f32.partialorder %v4130_v54, %v4477_v33 }
 0x377   : > { %1964 = vmin.xlane.f32.xlu1 %v4470_v53  ;;  %v4483_v39 = vsel %vm1635_vm15, %v6172_v32, 128  ;;  %v4488_v34 = vsel %vm1648_vm0, %v6172_v32, 128 }
 0x378   : > { %1726 = vmin.xlane.f32.xlu0 %v4480_v6  ;;  %v1765_v21 = vshra.s32 %v4483_v39, 16  ;;  %v1947_v37 = vshra.s32 %v4488_v34, 16 }
 0x379   : > { %v4492_v18 = vpop.xlane.xlu1 %1608  ;;  %v4497_v0 = vpop.xlane.xlu0 %1574 }
 0x37a   : > { %6245 = vst [vmem:[#allocation36_spill] sm:$0xff] %v4492_v18  ;;  %vm1651_vm1 = vcmp.eq.f32.partialorder %v4146_v36, %v4492_v18  ;;  %6246 = vst [vmem:[#allocation38_spill] sm:$0xff] %v4497_v0  ;;  %v4499_v1 = vcvt.s32.f32 %v1765_v21  ;;  %vm1634_vm15 = vcmp.eq.f32.partialorder %v4154_v30, %v4497_v0  ;;  %v4510_v55 = vcvt.s32.f32 %v1947_v37 }
 0x37b   : > { %v4502_v54 = vsel %vm1651_vm1, %v6172_v32, 128  ;;  %v4507_v33 = vsel %vm1634_vm15, %v6172_v32, 128 }
 0x37c   : > { %1768 = vmin.xlane.f32.xlu1 %v4499_v1  ;;  %v1989_v29 = vshra.s32 %v4502_v54, 16  ;;  %v1751_v21 = vshra.s32 %v4507_v33, 16  ;;  %1950 = vmin.xlane.f32.xlu0 %v4510_v55 }
 0x37d   : > { %v4513_v36 = vpop.xlane.xlu1 %1580  ;;  %v4519_v18 = vpop.xlane.xlu0 %1606 }
 0x37e   : > { %6247 = vst [vmem:[#allocation82_spill] sm:$0xff] %v4513_v36  ;;  %vm1637_vm0 = vcmp.eq.f32.partialorder %v4170_v44, %v4513_v36  ;;  %6248 = vst [vmem:[#allocation83_spill] sm:$0xff] %v4519_v18  ;;  %v4521_v30 = vcvt.s32.f32 %v1989_v29  ;;  %vm1650_vm1 = vcmp.eq.f32.partialorder %v4178_v41, %v4519_v18  ;;  %v4532_v52 = vcvt.s32.f32 %v1751_v21 }
 0x37f   : > { %v4524_v0 = vsel %vm1637_vm0, %v6172_v32, 128  ;;  %v4529_v37 = vsel %vm1650_vm1, %v6172_v32, 128 }
 0x380   : > { %1992 = vmin.xlane.f32.xlu1 %v4521_v30  ;;  %v1793_v56 = vshra.s32 %v4524_v0, 16  ;;  %v1975_v29 = vshra.s32 %v4529_v37, 16  ;;  %1754 = vmin.xlane.f32.xlu0 %v4532_v52 }
 0x381   : > { %v4535_v44 = vpop.xlane.xlu1 %1612  ;;  %v4541_v36 = vpop.xlane.xlu0 %1578 }
 0x382   : > { %6249 = vst [vmem:[#allocation84_spill] sm:$0xff] %v4535_v44  ;;  %vm1653_vm15 = vcmp.eq.f32.partialorder %v4194_v35, %v4535_v44  ;;  %6250 = vst [vmem:[#allocation85_spill] sm:$0xff] %v4541_v36  ;;  %v4543_v41 = vcvt.s32.f32 %v1793_v56  ;;  %vm1636_vm0 = vcmp.eq.f32.partialorder %v4202_v63, %v4541_v36  ;;  %v4554_v20 = vcvt.s32.f32 %v1975_v29 }
 0x383   : > { %v4546_v18 = vsel %vm1653_vm15, %v6172_v32, 128  ;;  %v4551_v21 = vsel %vm1636_vm0, %v6172_v32, 128 }
 0x384   : > { %1796 = vmin.xlane.f32.xlu1 %v4543_v41  ;;  %v2017_v48 = vshra.s32 %v4546_v18, 16  ;;  %v1779_v56 = vshra.s32 %v4551_v21, 16  ;;  %1978 = vmin.xlane.f32.xlu0 %v4554_v20 }
 0x385   : > { %v4557_v35 = vpop.xlane.xlu1 %1584  ;;  %v4563_v44 = vpop.xlane.xlu0 %1610 }
 0x386   : > { %6251 = vst [vmem:[#allocation86_spill] sm:$0xff] %v4557_v35  ;;  %vm1639_vm1 = vcmp.eq.f32.partialorder %v4218_v4, %v4557_v35  ;;  %6252 = vst [vmem:[#allocation87_spill] sm:$0xff] %v4563_v44  ;;  %v4565_v63 = vcvt.s32.f32 %v2017_v48  ;;  %vm1652_vm15 = vcmp.eq.f32.partialorder %v4226_v10, %v4563_v44  ;;  %v4576_v16 = vcvt.s32.f32 %v1779_v56 }
 0x387   : > { %v4568_v36 = vsel %vm1639_vm1, %v6172_v32, 128  ;;  %v4573_v29 = vsel %vm1652_vm15, %v6172_v32, 128 }
 0x388   : > { %2020 = vmin.xlane.f32.xlu1 %v4565_v63  ;;  %v1821_v42 = vshra.s32 %v4568_v36, 16  ;;  %v2003_v48 = vshra.s32 %v4573_v29, 16  ;;  %1782 = vmin.xlane.f32.xlu0 %v4576_v16 }
 0x389   : > { %v4579_v4 = vpop.xlane.xlu1 %1616  ;;  %v4585_v35 = vpop.xlane.xlu0 %1582 }
 0x38a   : > { %6253 = vst [vmem:[#allocation88_spill] sm:$0xff] %v4579_v4  ;;  %vm1655_vm0 = vcmp.eq.f32.partialorder %v4242_v28, %v4579_v4  ;;  %6254 = vst [vmem:[#allocation89_spill] sm:$0xff] %v4585_v35  ;;  %v4587_v10 = vcvt.s32.f32 %v1821_v42  ;;  %vm1638_vm1 = vcmp.eq.f32.partialorder %v4250_v62, %v4585_v35  ;;  %v4598_v11 = vcvt.s32.f32 %v2003_v48 }
 0x38b   : > { %v4590_v44 = vsel %vm1655_vm0, %v6172_v32, 128  ;;  %v4595_v56 = vsel %vm1638_vm1, %v6172_v32, 128 }
 0x38c   : > { %1824 = vmin.xlane.f32.xlu1 %v4587_v10  ;;  %v2045_v3 = vshra.s32 %v4590_v44, 16  ;;  %v1807_v42 = vshra.s32 %v4595_v56, 16  ;;  %2006 = vmin.xlane.f32.xlu0 %v4598_v11 }
 0x38d   : > { %v4601_v28 = vpop.xlane.xlu1 %1588  ;;  %v4607_v4 = vpop.xlane.xlu0 %1614 }
 0x38e   : > { %6255 = vst [vmem:[#allocation90_spill] sm:$0xff] %v4601_v28  ;;  %vm1641_vm15 = vcmp.eq.f32.partialorder %v4266_v61, %v4601_v28  ;;  %6256 = vst [vmem:[#allocation91_spill] sm:$0xff] %v4607_v4  ;;  %v4609_v62 = vcvt.s32.f32 %v2045_v3  ;;  %vm1654_vm0 = vcmp.eq.f32.partialorder %v4274_v46, %v4607_v4  ;;  %v4620_v45 = vcvt.s32.f32 %v1807_v42 }
 0x38f   : > { %v4612_v35 = vsel %vm1641_vm15, %v6172_v32, 128  ;;  %v4617_v48 = vsel %vm1654_vm0, %v6172_v32, 128 }
 0x390   : > { %2048 = vmin.xlane.f32.xlu1 %v4609_v62  ;;  %v1849_v31 = vshra.s32 %v4612_v35, 16  ;;  %v2031_v3 = vshra.s32 %v4617_v48, 16  ;;  %1810 = vmin.xlane.f32.xlu0 %v4620_v45 }
 0x391   : > { %v4623_v61 = vpop.xlane.xlu1 %1620 }
 0x392   : > { %6257 = vst [vmem:[#allocation92_spill] sm:$0xff] %v4623_v61  ;;  %vm1657_vm1 = vcmp.eq.f32.partialorder %v4290_v8, %v4623_v61  ;;  %v4629_v28 = vpop.xlane.xlu0 %1586  ;;  %v4631_v46 = vcvt.s32.f32 %v1849_v31  ;;  %v4642_v12 = vcvt.s32.f32 %v2031_v3 }
 0x393   : > { %6258 = vst [vmem:[#allocation93_spill] sm:$0xff] %v4629_v28  ;;  %v4634_v4 = vsel %vm1657_vm1, %v6172_v32, 128  ;;  %vm1640_vm15 = vcmp.eq.f32.partialorder %v4298_v51, %v4629_v28 }
 0x394   : > { %v4639_v42 = vsel %vm1640_vm15, %v6172_v32, 128  ;;  %1852 = vmin.xlane.f32.xlu1 %v4631_v46  ;;  %v2073_v14 = vshra.s32 %v4634_v4, 16  ;;  %2034 = vmin.xlane.f32.xlu0 %v4642_v12 }
 0x395   : > { %v1835_v31 = vshra.s32 %v4639_v42, 16 }
 0x396   : > { %v4645_v8 = vpop.xlane.xlu1 %1592  ;;  %v4651_v61 = vpop.xlane.xlu0 %1618  ;;  %v4653_v51 = vcvt.s32.f32 %v2073_v14 }
 0x397   : > { %6259 = vst [vmem:[#allocation94_spill] sm:$0xff] %v4645_v8  ;;  %vm1643_vm0 = vcmp.eq.f32.partialorder %v4314_v60, %v4645_v8  ;;  %6260 = vst [vmem:[#allocation95_spill] sm:$0xff] %v4651_v61  ;;  %vm1656_vm1 = vcmp.eq.f32.partialorder %v4322_v40, %v4651_v61  ;;  %v4664_v57 = vcvt.s32.f32 %v1835_v31 }
 0x398   : > { %v4656_v28 = vsel %vm1643_vm0, %v6172_v32, 128  ;;  %v4661_v3 = vsel %vm1656_vm1, %v6172_v32, 128  ;;  %2076 = vmin.xlane.f32.xlu1 %v4653_v51 }
 0x399   : > { %6261 = vst [vmem:[#allocation96_spill] sm:$0xff] %v4664_v57  ;;  %v1877_v38 = vshra.s32 %v4656_v28, 16  ;;  %v2059_v14 = vshra.s32 %v4661_v3, 16  ;;  %1838 = vmin.xlane.f32.xlu0 %v4664_v57 }
 0x39a   : > { %v4667_v60 = vpop.xlane.xlu1 %1624  ;;  %v4673_v8 = vpop.xlane.xlu0 %1590 }
 0x39b   : > { %6262 = vst [vmem:[#allocation97_spill] sm:$0xff] %v4667_v60  ;;  %vm1659_vm15 = vcmp.eq.f32.partialorder %v4338_v13, %v4667_v60  ;;  %6263 = vst [vmem:[#allocation98_spill] sm:$0xff] %v4673_v8  ;;  %v4675_v40 = vcvt.s32.f32 %v1877_v38  ;;  %vm1642_vm0 = vcmp.eq.f32.partialorder %v4345_v24, %v4673_v8  ;;  %v4686_v43 = vcvt.s32.f32 %v2059_v14 }
 0x39c   : > { %v4678_v61 = vsel %vm1659_vm15, %v6172_v32, 128  ;;  %v4683_v31 = vsel %vm1642_vm0, %v6172_v32, 128 }
 0x39d   : > { %6264 = vst [vmem:[#allocation99_spill] sm:$0xff] %v4683_v31  ;;  %1880 = vmin.xlane.f32.xlu1 %v4675_v40  ;;  %6265 = vst [vmem:[#allocation100_spill] sm:$0xff] %v4686_v43  ;;  %v2101_v57 = vshra.s32 %v4678_v61, 16  ;;  %v1863_v38 = vshra.s32 %v4683_v31, 16  ;;  %2062 = vmin.xlane.f32.xlu0 %v4686_v43 }
 0x39e   : > { %v4689_v13 = vpop.xlane.xlu1 %1596  ;;  %v4695_v60 = vpop.xlane.xlu0 %1622 }
 0x39f   : > { %6266 = vst [vmem:[#allocation101_spill] sm:$0xff] %v4689_v13  ;;  %vm1645_vm1 = vcmp.eq.f32.partialorder %v4361_v50, %v4689_v13  ;;  %6267 = vst [vmem:[#allocation102_spill] sm:$0xff] %v4695_v60  ;;  %v4697_v24 = vcvt.s32.f32 %v2101_v57  ;;  %vm1658_vm15 = vcmp.eq.f32.partialorder %v4368_v15, %v4695_v60  ;;  %v4708_v31 = vcvt.s32.f32 %v1863_v38 }
 0x3a0   : > { %v4700_v8 = vsel %vm1645_vm1, %v6172_v32, 128  ;;  %v4705_v14 = vsel %vm1658_vm15, %v6172_v32, 128 }
 0x3a1   : > { %6268 = vst [vmem:[#allocation103_spill] sm:$0xff] %v4705_v14  ;;  %2104 = vmin.xlane.f32.xlu1 %v4697_v24  ;;  %6269 = vst [vmem:[#allocation104_spill] sm:$0xff] %v4708_v31  ;;  %v1905_v43 = vshra.s32 %v4700_v8, 16  ;;  %v2087_v57 = vshra.s32 %v4705_v14, 16  ;;  %1866 = vmin.xlane.f32.xlu0 %v4708_v31 }
 0x3a2   : > { %v4711_v50 = vpop.xlane.xlu1 %1628  ;;  %v4717_v13 = vpop.xlane.xlu0 %1594 }
 0x3a3   : > { %6270 = vst [vmem:[#allocation105_spill] sm:$0xff] %v4711_v50  ;;  %vm1661_vm0 = vcmp.eq.f32.partialorder %v4377_v17, %v4711_v50  ;;  %6271 = vst [vmem:[#allocation106_spill] sm:$0xff] %v4717_v13  ;;  %v4719_v15 = vcvt.s32.f32 %v1905_v43  ;;  %vm1644_vm1 = vcmp.eq.f32.partialorder %v4387_v27, %v4717_v13  ;;  %v4730_v14 = vcvt.s32.f32 %v2087_v57 }
 0x3a4   : > { %v4722_v60 = vsel %vm1661_vm0, %v6172_v32, 128  ;;  %v4727_v38 = vsel %vm1644_vm1, %v6172_v32, 128 }
 0x3a5   : > { %6272 = vst [vmem:[#allocation107_spill] sm:$0xff] %v4727_v38  ;;  %1908 = vmin.xlane.f32.xlu1 %v4719_v15  ;;  %6273 = vst [vmem:[#allocation108_spill] sm:$0xff] %v4730_v14  ;;  %v2129_v31 = vshra.s32 %v4722_v60, 16  ;;  %v1891_v17 = vshra.s32 %v4727_v38, 16  ;;  %2090 = vmin.xlane.f32.xlu0 %v4730_v14 }
 0x3a6   : > { %v4735_v43 = vpop.xlane.xlu0 %1626 }
 0x3a7   : > { %6274 = vst [vmem:[#allocation109_spill] sm:$0xff] %v4735_v43  ;;  %v4737_v50 = vcvt.s32.f32 %v2129_v31  ;;  %vm1660_vm15 = vcmp.eq.f32.partialorder %v4397_v2, %v4735_v43  ;;  %v4741_v27 = vcvt.s32.f32 %v1891_v17  ;;  %v1708_v31 = vand.u32 65535, %v4405_v22 }
 0x3a8   : > { %v4744_v13 = vsel %vm1660_vm15, %v6172_v32, 128  ;;  %v1932_v17 = vand.u32 65535, %v4417_v49  ;;  %v1694_v32 = vand.u32 65535, %v4422_v47  ;;  %v1918_v49 = vand.u32 65535, %v4441_v59 }
 0x3a9   : > { %6275 = vst [vmem:[#allocation110_spill] sm:$0xff] %v4741_v27  ;;  %6276 = vst [vmem:[#allocation111_spill] sm:$0xff] %v4744_v13  ;;  %2132 = vmin.xlane.f32.xlu1 %v4737_v50  ;;  %v2115_v57 = vshra.s32 %v4744_v13, 16  ;;  %1894 = vmin.xlane.f32.xlu0 %v4741_v27  ;;  %v1710_v2 = vcvt.s32.f32 %v1708_v31  ;;  %v1736_v27 = vand.u32 65535, %v4436_v23  ;;  %v1722_v59 = vand.u32 65535, %v4467_v9 }
 0x3ab   : > { %v4749_v38 = vcvt.s32.f32 %v2115_v57  ;;  %v1934_v57 = vcvt.s32.f32 %v1932_v17  ;;  %v1724_v17 = vcvt.s32.f32 %v1722_v59 }
 0x3ad   : > { %6277 = vst [vmem:[#allocation112_spill] sm:$0xff] %v4749_v38  ;;  %2118 = vmin.xlane.f32.xlu0 %v4749_v38  ;;  %v1696_v38 = vcvt.s32.f32 %v1694_v32  ;;  %v1920_v32 = vcvt.s32.f32 %v1918_v49 }
 0x3f8   : > { %v4753_v14 = vpop.xlane.xlu1 %1712 }
 0x3f9   : > { %vm1714_vm0 = vcmp.eq.f32.partialorder %v4414_v7, %v4753_v14 }
 0x3fa   : > { %v1715_v43 = vsel %vm1714_vm0, %v1710_v2, inf  ;;  %v1960_v2 = vand.u32 65535, %v4456_v58 }
 0x3fb   : > { %1716 = vmin.xlane.f32.xlu1 %v1715_v43  ;;  %v1738_v43 = vcvt.s32.f32 %v1736_v27 }
 0x3fc   : > { %v4759_v13 = vpop.xlane.xlu1 %1936  ;;  %v4764_v22 = vpop.xlane.xlu0 %1698  ;;  %v1962_v27 = vcvt.s32.f32 %v1960_v2  ;;  %v1750_v2 = vand.u32 65535, %v4507_v33  ;;  %v1974_v33 = vand.u32 65535, %v4529_v37  ;;  %v1778_v37 = vand.u32 65535, %v4551_v21 }
 0x3fd   : > { %vm1938_vm1 = vcmp.eq.f32.partialorder %v4433_v26, %v4759_v13  ;;  %vm1700_vm15 = vcmp.eq.f32.partialorder %v4444_v5, %v4764_v22  ;;  %v2002_v21 = vand.u32 65535, %v4573_v29  ;;  %v1806_v29 = vand.u32 65535, %v4595_v56 }
 0x3fe   : > { %v1939_v31 = vsel %vm1938_vm1, %v1934_v57, inf  ;;  %v1701_v7 = vsel %vm1700_vm15, %v1696_v38, inf  ;;  %v1764_v57 = vand.u32 65535, %v4483_v39  ;;  %v1752_v59 = vcvt.s32.f32 %v1750_v2 }
 0x3ff   : > { %1940 = vmin.xlane.f32.xlu1 %v1939_v31  ;;  %1702 = vmin.xlane.f32.xlu0 %v1701_v7  ;;  %v1988_v7 = vand.u32 65535, %v4502_v54  ;;  %v2004_v2 = vcvt.s32.f32 %v2002_v21  ;;  %v2030_v56 = vand.u32 65535, %v4617_v48  ;;  %v1834_v48 = vand.u32 65535, %v4639_v42  ;;  %v6279_v21 = vld [vmem:[#allocation99_spill] sm:$0xff] }
 0x400   : > { %v4769_v47 = vpop.xlane.xlu1 %1740  ;;  %v4774_v26 = vpop.xlane.xlu0 %1922  ;;  %v1766_v49 = vcvt.s32.f32 %v1764_v57  ;;  %v2058_v42 = vand.u32 65535, %v4661_v3  ;;  %v1862_v3 = vand.u32 65535, %v6279_v21  ;;  %v6292_v21 = vld [vmem:[#allocation39_spill] sm:$0xff] }
 0x401   : > { %vm1742_vm0 = vcmp.eq.f32.partialorder %v4453_v19, %v4769_v47  ;;  %vm1924_vm1 = vcmp.eq.f32.partialorder %v4460_v25, %v4774_v26  ;;  %v1946_v25 = vand.u32 65535, %v4488_v34 }
 0x402   : > { %v1743_v23 = vsel %vm1742_vm0, %v1738_v43, inf  ;;  %v1925_v5 = vsel %vm1924_vm1, %v1920_v32, inf  ;;  %v1792_v32 = vand.u32 65535, %v4524_v0  ;;  %v2016_v0 = vand.u32 65535, %v4546_v18 }
 0x403   : > { %1744 = vmin.xlane.f32.xlu1 %v1743_v23  ;;  %1926 = vmin.xlane.f32.xlu0 %v1925_v5  ;;  %v1948_v39 = vcvt.s32.f32 %v1946_v25  ;;  %v1990_v23 = vcvt.s32.f32 %v1988_v7  ;;  %v1820_v18 = vand.u32 65535, %v4568_v36  ;;  %v2044_v36 = vand.u32 65535, %v4590_v44 }
 0x404   : > { %v4779_v38 = vpop.xlane.xlu1 %1964  ;;  %v1848_v44 = vand.u32 65535, %v4612_v35  ;;  %v2072_v35 = vand.u32 65535, %v4634_v4  ;;  %v1876_v4 = vand.u32 65535, %v4656_v28  ;;  %v2100_v28 = vand.u32 65535, %v4678_v61 }
 0x405   : > { %vm1966_vm15 = vcmp.eq.f32.partialorder %v4470_v53, %v4779_v38  ;;  %v4783_v58 = vpop.xlane.xlu0 %1726  ;;  %v1904_v61 = vand.u32 65535, %v4700_v8  ;;  %v2128_v8 = vand.u32 65535, %v4722_v60 }
 0x406   : > { %v1967_v19 = vsel %vm1966_vm15, %v1962_v27, inf  ;;  %vm1728_vm0 = vcmp.eq.f32.partialorder %v4480_v6, %v4783_v58  ;;  %v1794_v27 = vcvt.s32.f32 %v1792_v32 }
 0x407   : > { %1968 = vmin.xlane.f32.xlu1 %v1967_v19  ;;  %v1729_v9 = vsel %vm1728_vm0, %v1724_v17, inf  ;;  %v1976_v17 = vcvt.s32.f32 %v1974_v33  ;;  %v1850_v33 = vcvt.s32.f32 %v1848_v44  ;;  %v6282_v44 = vld [vmem:[#allocation104_spill] sm:$0xff] }
 0x408   : > { %1730 = vmin.xlane.f32.xlu0 %v1729_v9  ;;  %v2018_v9 = vcvt.s32.f32 %v2016_v0 }
 0x409   : > { %v4789_v31 = vpop.xlane.xlu1 %1768  ;;  %v4794_v53 = vpop.xlane.xlu0 %1950 }
 0x40a   : > { %vm1770_vm1 = vcmp.eq.f32.partialorder %v4499_v1, %v4789_v31  ;;  %vm1952_vm15 = vcmp.eq.f32.partialorder %v4510_v55, %v4794_v53 }
 0x40b   : > { %v1771_v43 = vsel %vm1770_vm1, %v1766_v49, inf  ;;  %v1953_v6 = vsel %vm1952_vm15, %v1948_v39, inf  ;;  %v1780_v49 = vcvt.s32.f32 %v1778_v37  ;;  %v1836_v37 = vcvt.s32.f32 %v1834_v48 }
 0x40c   : > { %1772 = vmin.xlane.f32.xlu1 %v1771_v43  ;;  %1954 = vmin.xlane.f32.xlu0 %v1953_v6  ;;  %v1822_v43 = vcvt.s32.f32 %v1820_v18  ;;  %v1878_v18 = vcvt.s32.f32 %v1876_v4 }
 0x40d   : > { %v4799_v34 = vpop.xlane.xlu1 %1992  ;;  %v4804_v1 = vpop.xlane.xlu0 %1754 }
 0x40e   : > { %vm1994_vm0 = vcmp.eq.f32.partialorder %v4521_v30, %v4799_v34  ;;  %vm1756_vm1 = vcmp.eq.f32.partialorder %v4532_v52, %v4804_v1 }
 0x40f   : > { %v1995_v54 = vsel %vm1994_vm0, %v1990_v23, inf  ;;  %v1757_v55 = vsel %vm1756_vm1, %v1752_v59, inf  ;;  %v2046_v23 = vcvt.s32.f32 %v2044_v36 }
 0x410   : > { %1996 = vmin.xlane.f32.xlu1 %v1995_v54  ;;  %1758 = vmin.xlane.f32.xlu0 %v1757_v55  ;;  %v1808_v54 = vcvt.s32.f32 %v1806_v29  ;;  %v1864_v29 = vcvt.s32.f32 %v1862_v3  ;;  %v6293_v3 = vld [vmem:[#allocation6_spill] sm:$0xff] }
 0x411   : > { %v4809_v5 = vpop.xlane.xlu1 %1796  ;;  %v4814_v30 = vpop.xlane.xlu0 %1978 }
 0x412   : > { %vm1798_vm15 = vcmp.eq.f32.partialorder %v4543_v41, %v4809_v5  ;;  %vm1980_vm0 = vcmp.eq.f32.partialorder %v4554_v20, %v4814_v30 }
 0x413   : > { %v1799_v19 = vsel %vm1798_vm15, %v1794_v27, inf  ;;  %v1981_v52 = vsel %vm1980_vm0, %v1976_v17, inf  ;;  %v2032_v27 = vcvt.s32.f32 %v2030_v56  ;;  %v1906_v56 = vcvt.s32.f32 %v1904_v61  ;;  %v6295_v61 = vld [vmem:[#allocation40_spill] sm:$0xff] }
 0x414   : > { %1800 = vmin.xlane.f32.xlu1 %v1799_v19  ;;  %1982 = vmin.xlane.f32.xlu0 %v1981_v52  ;;  %v2074_v19 = vcvt.s32.f32 %v2072_v35  ;;  %v6278_v52 = vld [vmem:[#allocation96_spill] sm:$0xff]  ;;  %v6283_v35 = vld [vmem:[#allocation107_spill] sm:$0xff] }
 0x415   : > { %v4819_v57 = vpop.xlane.xlu1 %2020  ;;  %v4824_v41 = vpop.xlane.xlu0 %1782 }
 0x416   : > { %vm2022_vm1 = vcmp.eq.f32.partialorder %v4565_v63, %v4819_v57  ;;  %vm1784_vm15 = vcmp.eq.f32.partialorder %v4576_v16, %v4824_v41 }
 0x417   : > { %v2023_v25 = vsel %vm2022_vm1, %v2018_v9, inf  ;;  %v1785_v20 = vsel %vm1784_vm15, %v1780_v49, inf  ;;  %v2060_v49 = vcvt.s32.f32 %v2058_v42  ;;  %v6288_v42 = vld [vmem:[#allocation110_spill] sm:$0xff] }
 0x418   : > { %2024 = vmin.xlane.f32.xlu1 %v2023_v25  ;;  %1786 = vmin.xlane.f32.xlu0 %v1785_v20  ;;  %v6280_v20 = vld [vmem:[#allocation100_spill] sm:$0xff] }
 0x419   : > { %v4829_v7 = vpop.xlane.xlu1 %1824  ;;  %v4834_v63 = vpop.xlane.xlu0 %2006 }
 0x41a   : > { %vm1826_vm0 = vcmp.eq.f32.partialorder %v4587_v10, %v4829_v7  ;;  %vm2008_vm1 = vcmp.eq.f32.partialorder %v4598_v11, %v4834_v63 }
 0x41b   : > { %v1827_v39 = vsel %vm1826_vm0, %v1822_v43, inf  ;;  %v2009_v16 = vsel %vm2008_vm1, %v2004_v2, inf }
 0x41c   : > { %1828 = vmin.xlane.f32.xlu1 %v1827_v39  ;;  %2010 = vmin.xlane.f32.xlu0 %v2009_v16  ;;  %v2102_v39 = vcvt.s32.f32 %v2100_v28  ;;  %v6281_v16 = vld [vmem:[#allocation103_spill] sm:$0xff]  ;;  %v6290_v28 = vld [vmem:[#allocation112_spill] sm:$0xff] }
 0x41d   : > { %v4839_v6 = vpop.xlane.xlu1 %2048  ;;  %v4844_v10 = vpop.xlane.xlu0 %1810 }
 0x41e   : > { %vm2050_vm15 = vcmp.eq.f32.partialorder %v4609_v62, %v4839_v6  ;;  %vm1812_vm0 = vcmp.eq.f32.partialorder %v4620_v45, %v4844_v10 }
 0x41f   : > { %v2051_v32 = vsel %vm2050_vm15, %v2046_v23, inf  ;;  %v1813_v11 = vsel %vm1812_vm0, %v1808_v54, inf  ;;  %v2086_v23 = vand.u32 65535, %v6281_v16 }
 0x420   : > { %2052 = vmin.xlane.f32.xlu1 %v2051_v32  ;;  %1814 = vmin.xlane.f32.xlu0 %v1813_v11 }
 0x421   : > { %v4849_v59 = vpop.xlane.xlu1 %1852  ;;  %v4854_v62 = vpop.xlane.xlu0 %2034 }
 0x422   : > { %vm1854_vm1 = vcmp.eq.f32.partialorder %v4631_v46, %v4849_v59  ;;  %vm2036_vm15 = vcmp.eq.f32.partialorder %v4642_v12, %v4854_v62 }
 0x423   : > { %v1855_v55 = vsel %vm1854_vm1, %v1850_v33, inf  ;;  %v2037_v45 = vsel %vm2036_vm15, %v2032_v27, inf  ;;  %v2088_v33 = vcvt.s32.f32 %v2086_v23  ;;  %v6284_v27 = vld [vmem:[#allocation108_spill] sm:$0xff]  ;;  %v6298_v23 = vld [vmem:[#allocation29_spill] sm:$0xff] }
 0x424   : > { %1856 = vmin.xlane.f32.xlu1 %v1855_v55  ;;  %2038 = vmin.xlane.f32.xlu0 %v2037_v45  ;;  %v1890_v55 = vand.u32 65535, %v6283_v35 }
 0x425   : > { %v4859_v0 = vpop.xlane.xlu1 %2076 }
 0x426   : > { %vm2078_vm0 = vcmp.eq.f32.partialorder %v4653_v51, %v4859_v0  ;;  %v4864_v46 = vpop.xlane.xlu0 %1838  ;;  %v1892_v4 = vcvt.s32.f32 %v1890_v55  ;;  %v6303_v55 = vld [vmem:[#allocation28_spill] sm:$0xff] }
 0x427   : > { %v2079_v17 = vsel %vm2078_vm0, %v2074_v19, inf  ;;  %vm1840_vm1 = vcmp.eq.f32.partialorder %v6278_v52, %v4864_v46  ;;  %v2130_v19 = vcvt.s32.f32 %v2128_v8  ;;  %v6318_v8 = vld [vmem:[#allocation33_spill] sm:$0xff] }
 0x428   : > { %2080 = vmin.xlane.f32.xlu1 %v2079_v17  ;;  %v1841_v12 = vsel %vm1840_vm1, %v1836_v37, inf  ;;  %v6287_v17 = vld [vmem:[#allocation111_spill] sm:$0xff] }
 0x429   : > { %1842 = vmin.xlane.f32.xlu0 %v1841_v12  ;;  %v2114_v37 = vand.u32 65535, %v6287_v17  ;;  %v6307_v17 = vld [vmem:[#allocation43_spill] sm:$0xff] }
 0x42a   : > { %v4869_v9 = vpop.xlane.xlu1 %1880  ;;  %v4874_v51 = vpop.xlane.xlu0 %2062 }
 0x42b   : > { %vm1882_vm15 = vcmp.eq.f32.partialorder %v4675_v40, %v4869_v9  ;;  %vm2064_vm0 = vcmp.eq.f32.partialorder %v6280_v20, %v4874_v51  ;;  %v4917_v20 = vsel %vm1407_vm2, %v6292_v21, 0.0 }
 0x42c   : > { %v1883_v25 = vsel %vm1882_vm15, %v1878_v18, inf  ;;  %v2065_v43 = vsel %vm2064_vm0, %v2060_v49, inf  ;;  %v2116_v18 = vcvt.s32.f32 %v2114_v37  ;;  %v4950_v37 = vsel %vm1422_vm6, %v6307_v17, 0.0 }
 0x42d   : > { %1884 = vmin.xlane.f32.xlu1 %v1883_v25  ;;  %2066 = vmin.xlane.f32.xlu0 %v2065_v43  ;;  %6308 = vst [vmem:[#allocation108_spill] sm:$0xff] %v4950_v37 }
 0x42e   : > { %v4879_v36 = vpop.xlane.xlu1 %2104  ;;  %v4884_v40 = vpop.xlane.xlu0 %1866 }
 0x42f   : > { %vm2106_vm1 = vcmp.eq.f32.partialorder %v4697_v24, %v4879_v36  ;;  %vm1868_vm15 = vcmp.eq.f32.partialorder %v6282_v44, %v4884_v40  ;;  %v2239_v44 = vadd.f32 %v6298_v23, %v6292_v21 }
 0x430   : > { %v2107_v2 = vsel %vm2106_vm1, %v2102_v39, inf  ;;  %v1869_v32 = vsel %vm1868_vm15, %v1864_v29, inf  ;;  %v6323_v39 = vld [vmem:[#allocation32_spill] sm:$0xff]  ;;  %v6327_v29 = vld [vmem:[#allocation49_spill] sm:$0xff] }
 0x431   : > { %2108 = vmin.xlane.f32.xlu1 %v2107_v2  ;;  %1870 = vmin.xlane.f32.xlu0 %v1869_v32  ;;  %v4924_v2 = vsel %vm1423_vm3, %v6295_v61, 0.0 }
 0x432   : > { %v4889_v54 = vpop.xlane.xlu1 %1908  ;;  %v4894_v24 = vpop.xlane.xlu0 %2090  ;;  %6296 = vst [vmem:[#allocation103_spill] sm:$0xff] %v4924_v2 }
 0x433   : > { %vm1910_vm0 = vcmp.eq.f32.partialorder %v4719_v15, %v4889_v54  ;;  %vm2092_vm1 = vcmp.eq.f32.partialorder %v6284_v27, %v4894_v24  ;;  %v2255_v27 = vadd.f32 %v6303_v55, %v6295_v61  ;;  %v6313_v61 = vld [vmem:[#allocation46_spill] sm:$0xff] }
 0x434   : > { %v1911_v11 = vsel %vm1910_vm0, %v1906_v56, inf  ;;  %v2093_v48 = vsel %vm2092_vm1, %v2088_v33, inf  ;;  %v6301_v33 = vld [vmem:[#allocation41_spill] sm:$0xff] }
 0x435   : > { %1912 = vmin.xlane.f32.xlu1 %v1911_v11  ;;  %2094 = vmin.xlane.f32.xlu0 %v2093_v48  ;;  %v4935_v35 = vsel %vm1406_vm4, %v6301_v33, 0.0  ;;  %v6315_v11 = vld [vmem:[#allocation30_spill] sm:$0xff]  ;;  %v6319_v48 = vld [vmem:[#allocation48_spill] sm:$0xff] }
 0x436   : > { %v4899_v45 = vpop.xlane.xlu1 %2132  ;;  %v4903_v60 = vpop.xlane.xlu0 %1894  ;;  %6302 = vst [vmem:[#allocation104_spill] sm:$0xff] %v4935_v35  ;;  %v4977_v32 = vsel %vm1411_vm9, %v6319_v48, 0.0  ;;  %v6375_v35 = vld [vmem:[#allocation16_spill] sm:$0xff] }
 0x437   : > { %6285 = vst [vmem:[#allocation96_spill] sm:$0xff] %v4899_v45  ;;  %vm2134_vm15 = vcmp.eq.f32.partialorder %v4737_v50, %v4899_v45  ;;  %6286 = vst [vmem:[#allocation99_spill] sm:$0xff] %v4903_v60  ;;  %vm1896_vm0 = vcmp.eq.f32.partialorder %v6288_v42, %v4903_v60  ;;  %v6309_v42 = vld [vmem:[#allocation31_spill] sm:$0xff]  ;;  %v6331_v60 = vld [vmem:[#allocation34_spill] sm:$0xff] }
 0x438   : > { %v2135_v15 = vsel %vm2134_vm15, %v2130_v19, inf  ;;  %v1897_v52 = vsel %vm1896_vm0, %v1892_v4, inf  ;;  %v4965_v19 = vsel %vm1408_vm8, %v6313_v61, 0.0  ;;  %6320 = vst [vmem:[#allocation112_spill] sm:$0xff] %v4977_v32  ;;  %v4995_v32 = vsel %vm1427_vm11, %v6327_v29, 0.0  ;;  %v6342_v45 = vld [vmem:[#allocation10_spill] sm:$0xff] }
 0x439   : > { %2136 = vmin.xlane.f32.xlu1 %v2135_v15  ;;  %1898 = vmin.xlane.f32.xlu0 %v1897_v52  ;;  %v6305_v15 = vld [vmem:[#allocation42_spill] sm:$0xff]  ;;  %v2238_v52 = vadd.f32 %v6309_v42, %v6301_v33  ;;  %6314 = vst [vmem:[#allocation110_spill] sm:$0xff] %v4965_v19  ;;  %6328 = vst [vmem:[#allocation6_spill] sm:$0xff] %v4995_v32  ;;  %v6329_v33 = vld [vmem:[#allocation47_spill] sm:$0xff]  ;;  %vm6347_vm2 = vcmp.eq.s32.totalorder %v6293_v3, %v6342_v45 }
 0x43a   : > { %v4908_v12 = vpop.xlane.xlu0 %2118  ;;  %v4944_v4 = vsel %vm1409_vm5, %v6305_v15, 0.0  ;;  %v2241_v56 = vadd.f32 %v6315_v11, %v6305_v15  ;;  %v2287_v15 = vadd.f32 1e-06, %v2255_v27  ;;  %v5001_v27 = vsel %vm1410_vm12, %v6329_v33, 0.0  ;;  %v6336_v11 = vld [vmem:[#allocation51_spill] sm:$0xff]  ;;  %v6393_v42 = vld [vmem:[#allocation17_spill] sm:$0xff] }
 0x43b   : > { %6289 = vst [vmem:[#allocation100_spill] sm:$0xff] %v4908_v12  ;;  %vm2120_vm1 = vcmp.eq.f32.partialorder %v6290_v28, %v4908_v12  ;;  %6306 = vst [vmem:[#allocation107_spill] sm:$0xff] %v4944_v4  ;;  %v2271_v28 = vadd.f32 1e-06, %v2239_v44  ;;  %v2254_v12 = vadd.f32 %v6318_v8, %v6307_v17  ;;  %v2270_v37 = vadd.f32 1e-06, %v2238_v52 }
 0x43c   : > { %v2121_v25 = vsel %vm2120_vm1, %v2116_v18, inf  ;;  %v6321_v18 = vld [vmem:[#allocation45_spill] sm:$0xff]  ;;  %v6326_v8 = vld [vmem:[#allocation35_spill] sm:$0xff]  ;;  %6330 = vst [vmem:[#allocation40_spill] sm:$0xff] %v5001_v27  ;;  %v2243_v17 = vadd.f32 %v6331_v60, %v6319_v48  ;;  %v6335_v4 = vld [vmem:[#allocation36_spill] sm:$0xff]  ;;  %vm6402_vm9 = vcmp.eq.s32.totalorder %v6293_v3, %v6393_v42  ;;  %vm2366_vm1 = vcmp.eq.s32.totalorder %v6293_v3, 8 }
 0x43d   : > { %2122 = vmin.xlane.f32.xlu0 %v2121_v25  ;;  %v6311_v25 = vld [vmem:[#allocation44_spill] sm:$0xff]  ;;  %v4983_v19 = vsel %vm1424_vm10, %v6321_v18, 0.0  ;;  %v2240_v16 = vadd.f32 %v6326_v8, %v6313_v61  ;;  %2947 = vrcp.f32 %v2271_v28  ;;  %v2286_v61 = vadd.f32 1e-06, %v2254_v12  ;;  %v6333_v8 = vld [vmem:[#allocation37_spill] sm:$0xff]  ;;  %v6338_v12 = vld [vmem:[#allocation38_spill] sm:$0xff] }
 0x43e   : > { %v4959_v21 = vsel %vm1425_vm7, %v6311_v25, 0.0  ;;  %6322 = vst [vmem:[#allocation39_spill] sm:$0xff] %v4983_v19  ;;  %v2257_v49 = vadd.f32 %v6323_v39, %v6311_v25  ;;  %v2273_v25 = vadd.f32 1e-06, %v2241_v56  ;;  %v2256_v39 = vadd.f32 %v6333_v8, %v6321_v18  ;;  %v6339_v19 = vld [vmem:[#allocation50_spill] sm:$0xff]  ;;  %v6344_v27 = vld [vmem:[#allocation9_spill] sm:$0xff] }
 0x43f   : > { %6312 = vst [vmem:[#allocation111_spill] sm:$0xff] %v4959_v21  ;;  %2949 = vrcp.f32 %v2287_v15  ;;  %v2259_v21 = vadd.f32 %v6335_v4, %v6327_v29  ;;  %v5015_v56 = vsel %vm1413_vm13, %v6336_v11, 0.0  ;;  %v2272_v48 = vadd.f32 1e-06, %v2240_v16  ;;  %v6341_v29 = vld [vmem:[#allocation82_spill] sm:$0xff]  ;;  %v6343_v16 = vld [vmem:[#allocation83_spill] sm:$0xff] }
 0x440   : > { %v2289_v32 = vadd.f32 1e-06, %v2257_v49  ;;  %6337 = vst [vmem:[#allocation29_spill] sm:$0xff] %v5015_v56  ;;  %2951 = vrcp.f32 %v2270_v37  ;;  %v2242_v28 = vadd.f32 %v6338_v12, %v6329_v33  ;;  %v5023_v18 = vsel %vm1426_vm14, %v6339_v19, 0.0  ;;  %v6345_v4 = vld [vmem:[#allocation53_spill] sm:$0xff]  ;;  %v6346_v44 = vld [vmem:[#allocation84_spill] sm:$0xff] }
 0x441   : > { %6340 = vst [vmem:[#allocation41_spill] sm:$0xff] %v5023_v18  ;;  %2953 = vrcp.f32 %v2273_v25  ;;  %v2275_v49 = vadd.f32 1e-06, %v2243_v17  ;;  %v2245_v15 = vadd.f32 %v6341_v29, %v6336_v11  ;;  %v2288_v56 = vadd.f32 1e-06, %v2256_v39  ;;  %v6349_v25 = vld [vmem:[#allocation52_spill] sm:$0xff] }
 0x442   : > { %2955 = vrcp.f32 %v2286_v61  ;;  %v2258_v37 = vadd.f32 %v6343_v16, %v6339_v19  ;;  %v2291_v12 = vadd.f32 1e-06, %v2259_v21  ;;  %v2261_v8 = vadd.f32 %v6346_v44, %v6345_v4  ;;  %v6350_v39 = vld [vmem:[#allocation85_spill] sm:$0xff]  ;;  %v6353_v21 = vld [vmem:[#allocation55_spill] sm:$0xff]  ;;  %v6354_v33 = vld [vmem:[#allocation86_spill] sm:$0xff] }
 0x443   : > { %2957 = vrcp.f32 %v2289_v32  ;;  %v5037_v17 = vsel %vm6347_vm2, %v6345_v4, 0.0  ;;  %v2274_v11 = vadd.f32 1e-06, %v2242_v28  ;;  %v2244_v61 = vadd.f32 %v6350_v39, %v6349_v25  ;;  %v6355_v18 = vld [vmem:[#allocation12_spill] sm:$0xff]  ;;  %v6357_v28 = vld [vmem:[#allocation87_spill] sm:$0xff]  ;;  %v6359_v29 = vld [vmem:[#allocation57_spill] sm:$0xff] }
 0x444   : > { %6348 = vst [vmem:[#allocation42_spill] sm:$0xff] %v5037_v17  ;;  %2959 = vrcp.f32 %v2272_v48  ;;  %vm6351_vm3 = vcmp.eq.s32.totalorder %v6293_v3, %v6344_v27  ;;  %v2277_v19 = vadd.f32 1e-06, %v2245_v15  ;;  %v2247_v52 = vadd.f32 %v6354_v33, %v6353_v21  ;;  %v6356_v48 = vld [vmem:[#allocation54_spill] sm:$0xff]  ;;  %v6358_v44 = vld [vmem:[#allocation11_spill] sm:$0xff]  ;;  %v6360_v27 = vld [vmem:[#allocation88_spill] sm:$0xff] }
 0x445   : > { %v5045_v32 = vsel %vm6351_vm3, %v6349_v25, 0.0  ;;  %2961 = vrcp.f32 %v2275_v49  ;;  %v2290_v4 = vadd.f32 1e-06, %v2258_v37  ;;  %v2260_v17 = vadd.f32 %v6357_v28, %v6356_v48  ;;  %v6363_v15 = vld [vmem:[#allocation56_spill] sm:$0xff]  ;;  %v6364_v37 = vld [vmem:[#allocation89_spill] sm:$0xff]  ;;  %v6368_v39 = vld [vmem:[#allocation59_spill] sm:$0xff] }
 0x446   : > { %6352 = vst [vmem:[#allocation43_spill] sm:$0xff] %v5045_v32  ;;  %2963 = vrcp.f32 %v2288_v56  ;;  %v2293_v16 = vadd.f32 1e-06, %v2261_v8  ;;  %v2263_v25 = vadd.f32 %v6360_v27, %v6359_v29  ;;  %vm6361_vm4 = vcmp.eq.s32.totalorder %v6293_v3, %v6355_v18  ;;  %v6369_v27 = vld [vmem:[#allocation90_spill] sm:$0xff]  ;;  %v6373_v33 = vld [vmem:[#allocation91_spill] sm:$0xff]  ;;  %v6417_v42 = vld [vmem:[#allocation77_spill] sm:$0xff] }
 0x447   : > { %2965 = vrcp.f32 %v2291_v12  ;;  %v5055_v32 = vpop.eup %2947  ;;  %v5061_v49 = vsel %vm6361_vm4, %v6353_v21, 0.0  ;;  %v2276_v56 = vadd.f32 1e-06, %v2244_v61  ;;  %v2246_v45 = vadd.f32 %v6364_v37, %v6363_v15  ;;  %v6372_v37 = vld [vmem:[#allocation58_spill] sm:$0xff]  ;;  %v6381_v61 = vld [vmem:[#allocation60_spill] sm:$0xff]  ;;  %v6409_v50 = vld [vmem:[#allocation19_spill] sm:$0xff] }
 0x448   : > { %6362 = vst [vmem:[#allocation44_spill] sm:$0xff] %v5061_v49  ;;  %2967 = vrcp.f32 %v2274_v11  ;;  %vm6366_vm5 = vcmp.eq.s32.totalorder %v6293_v3, %v6358_v44  ;;  %v2279_v12 = vadd.f32 1e-06, %v2247_v52  ;;  %v2249_v18 = vadd.f32 %v6369_v27, %v6368_v39  ;;  %v6371_v11 = vld [vmem:[#allocation13_spill] sm:$0xff]  ;;  %v6377_v52 = vld [vmem:[#allocation92_spill] sm:$0xff]  ;;  %v6386_v44 = vld [vmem:[#allocation63_spill] sm:$0xff] }
 0x449   : > { %v5065_v28 = vpop.eup %2949  ;;  %v5071_v8 = vsel %vm6366_vm5, %v6356_v48, 0.0  ;;  %2969 = vrcp.f32 %v2277_v19  ;;  %v2292_v49 = vadd.f32 1e-06, %v2260_v17  ;;  %v2262_v60 = vadd.f32 %v6373_v33, %v6372_v37  ;;  %v6376_v19 = vld [vmem:[#allocation61_spill] sm:$0xff] }
 0x44a   : > { %6365 = vst [vmem:[#allocation46_spill] sm:$0xff] %v5065_v28  ;;  %6367 = vst [vmem:[#allocation48_spill] sm:$0xff] %v5071_v8  ;;  %v5075_v21 = vpop.eup %2951  ;;  %2971 = vrcp.f32 %v2290_v4  ;;  %v2295_v48 = vadd.f32 1e-06, %v2263_v25  ;;  %v2265_v8 = vadd.f32 %v6377_v52, %v6376_v19  ;;  %vm6379_vm6 = vcmp.eq.s32.totalorder %v6293_v3, %v6371_v11  ;;  %v6382_v33 = vld [vmem:[#allocation93_spill] sm:$0xff]  ;;  %v6387_v52 = vld [vmem:[#allocation94_spill] sm:$0xff] }
 0x44b   : > { %6370 = vst [vmem:[#allocation45_spill] sm:$0xff] %v5075_v21  ;;  %v5080_v43 = vpop.eup %2953  ;;  %2973 = vrcp.f32 %v2293_v16  ;;  %v5091_v4 = vsel %vm6379_vm6, %v6359_v29, 0.0  ;;  %v2278_v17 = vadd.f32 1e-06, %v2246_v45  ;;  %v2248_v27 = vadd.f32 %v6382_v33, %v6381_v61  ;;  %v6390_v33 = vld [vmem:[#allocation62_spill] sm:$0xff] }
 0x44c   : > { %6374 = vst [vmem:[#allocation49_spill] sm:$0xff] %v5080_v43  ;;  %v5085_v28 = vpop.eup %2955  ;;  %6380 = vst [vmem:[#allocation51_spill] sm:$0xff] %v5091_v4  ;;  %2975 = vrcp.f32 %v2276_v56  ;;  %vm6384_vm7 = vcmp.eq.s32.totalorder %v6293_v3, %v6375_v35  ;;  %v2281_v25 = vadd.f32 1e-06, %v2249_v18  ;;  %v2251_v11 = vadd.f32 %v6387_v52, %v6386_v44  ;;  %v6389_v56 = vld [vmem:[#allocation14_spill] sm:$0xff]  ;;  %v6395_v18 = vld [vmem:[#allocation97_spill] sm:$0xff] }
 0x44d   : > { %6378 = vst [vmem:[#allocation47_spill] sm:$0xff] %v5085_v28  ;;  %v5095_v43 = vpop.eup %2957  ;;  %v5101_v16 = vsel %vm6384_vm7, %v6363_v15, 0.0  ;;  %2977 = vrcp.f32 %v2279_v12  ;;  %v2294_v4 = vadd.f32 1e-06, %v2262_v60  ;;  %v6391_v28 = vld [vmem:[#allocation95_spill] sm:$0xff]  ;;  %vm6397_vm8 = vcmp.eq.s32.totalorder %v6293_v3, %v6389_v56  ;;  %v6399_v45 = vld [vmem:[#allocation66_spill] sm:$0xff] }
 0x44e   : > { %6383 = vst [vmem:[#allocation50_spill] sm:$0xff] %v5095_v43  ;;  %6385 = vst [vmem:[#allocation53_spill] sm:$0xff] %v5101_v16  ;;  %v5105_v29 = vpop.eup %2959  ;;  %2979 = vrcp.f32 %v2292_v49  ;;  %v2264_v43 = vadd.f32 %v6391_v28, %v6390_v33  ;;  %v2297_v15 = vadd.f32 1e-06, %v2265_v8  ;;  %v6394_v12 = vld [vmem:[#allocation67_spill] sm:$0xff]  ;;  %v5121_v49 = vsel %vm6397_vm8, %v6368_v39, 0.0 }
 0x44f   : > { %6388 = vst [vmem:[#allocation52_spill] sm:$0xff] %v5105_v29  ;;  %v5110_v21 = vpop.eup %2961  ;;  %2981 = vrcp.f32 %v2295_v48  ;;  %v2267_v16 = vadd.f32 %v6395_v18, %v6394_v12  ;;  %6398 = vst [vmem:[#allocation57_spill] sm:$0xff] %v5121_v49  ;;  %v2280_v60 = vadd.f32 1e-06, %v2248_v27  ;;  %v6400_v28 = vld [vmem:[#allocation98_spill] sm:$0xff]  ;;  %v5131_v8 = vsel %vm6402_vm9, %v6372_v37, 0.0 }
 0x450   : > { %6392 = vst [vmem:[#allocation55_spill] sm:$0xff] %v5110_v21  ;;  %v5115_v2 = vpop.eup %2963  ;;  %2983 = vrcp.f32 %v2278_v17  ;;  %v2250_v52 = vadd.f32 %v6400_v28, %v6399_v45  ;;  %6403 = vst [vmem:[#allocation59_spill] sm:$0xff] %v5131_v8  ;;  %v2283_v48 = vadd.f32 1e-06, %v2251_v11  ;;  %v6404_v35 = vld [vmem:[#allocation71_spill] sm:$0xff]  ;;  %v6405_v18 = vld [vmem:[#allocation101_spill] sm:$0xff]  ;;  %vm6416_vm11 = vcmp.eq.s32.totalorder %v6293_v3, %v6409_v50 }
 0x451   : > { %6396 = vst [vmem:[#allocation54_spill] sm:$0xff] %v5115_v2  ;;  %v5125_v21 = vpop.eup %2965  ;;  %2985 = vrcp.f32 %v2281_v25  ;;  %v2253_v56 = vadd.f32 %v6405_v18, %v6404_v35  ;;  %v6406_v17 = vld [vmem:[#allocation15_spill] sm:$0xff]  ;;  %v2296_v49 = vadd.f32 1e-06, %v2264_v43  ;;  %v6407_v28 = vld [vmem:[#allocation70_spill] sm:$0xff]  ;;  %v6411_v11 = vld [vmem:[#allocation105_spill] sm:$0xff] }
 0x452   : > { %6401 = vst [vmem:[#allocation56_spill] sm:$0xff] %v5125_v21  ;;  %v5135_v39 = vpop.eup %2967  ;;  %2987 = vrcp.f32 %v2294_v4  ;;  %v6408_v2 = vld [vmem:[#allocation102_spill] sm:$0xff]  ;;  %v2299_v37 = vadd.f32 1e-06, %v2267_v16  ;;  %v6410_v25 = vld [vmem:[#allocation75_spill] sm:$0xff]  ;;  %vm6412_vm10 = vcmp.eq.s32.totalorder %v6293_v3, %v6406_v17  ;;  %v5161_v16 = vsel %vm6416_vm11, %v6381_v61, 0.0 }
 0x453   : > { %v2266_v21 = vadd.f32 %v6408_v2, %v6407_v28  ;;  %v5140_v29 = vpop.eup %2969  ;;  %2989 = vrcp.f32 %v2297_v15  ;;  %v2269_v8 = vadd.f32 %v6411_v11, %v6410_v25  ;;  %v5151_v4 = vsel %vm6412_vm10, %v6376_v19, 0.0  ;;  %v6414_v27 = vld [vmem:[#allocation74_spill] sm:$0xff]  ;;  %v6418_v11 = vld [vmem:[#allocation109_spill] sm:$0xff] }
 0x454   : > { %v5145_v55 = vpop.eup %2971  ;;  %6413 = vst [vmem:[#allocation58_spill] sm:$0xff] %v5151_v4  ;;  %2991 = vrcp.f32 %v2280_v60  ;;  %v2282_v43 = vadd.f32 1e-06, %v2250_v52  ;;  %v6415_v2 = vld [vmem:[#allocation106_spill] sm:$0xff]  ;;  %v2285_v15 = vadd.f32 1e-06, %v2253_v56  ;;  %v2268_v25 = vadd.f32 %v6418_v11, %v6417_v42 }
 0x455   : > { %v2252_v28 = vadd.f32 %v6415_v2, %v6414_v27  ;;  %v5155_v18 = vpop.eup %2973  ;;  %2993 = vrcp.f32 %v2283_v48  ;;  %v6419_v60 = vld [vmem:[#allocation18_spill] sm:$0xff]  ;;  %v6420_v17 = vld [vmem:[#allocation21_spill] sm:$0xff]  ;;  %v2298_v2 = vadd.f32 1e-06, %v2266_v21  ;;  %v2301_v48 = vadd.f32 1e-06, %v2269_v8 }
 0x456   : > { %v5165_v19 = vpop.eup %2975  ;;  %2995 = vrcp.f32 %v2296_v49  ;;  %vm6421_vm12 = vcmp.eq.s32.totalorder %v6293_v3, %v6419_v60  ;;  %vm6422_vm13 = vcmp.eq.s32.totalorder %v6293_v3, %v6420_v17  ;;  %v6424_v49 = vld [vmem:[#allocation20_spill] sm:$0xff]  ;;  %v6425_v4 = vld [vmem:[#allocation23_spill] sm:$0xff]  ;;  %v1719_v8 = vcvt.f32.s32 %v4753_v14  ;;  %v6428_v17 = vld [vmem:[#allocation22_spill] sm:$0xff] }
 0x457   : > { %v5169_v27 = vpop.eup %2977  ;;  %v5175_v61 = vsel %vm6421_vm12, %v6386_v44, 0.0  ;;  %v5181_v56 = vsel %vm6422_vm13, %v6390_v33, 0.0  ;;  %2997 = vrcp.f32 %v2299_v37  ;;  %v2284_v42 = vadd.f32 1e-06, %v2252_v28 }
 0x458   : > { %6423 = vst [vmem:[#allocation61_spill] sm:$0xff] %v5181_v56  ;;  %v5183_v52 = vpop.eup %2979  ;;  %2999 = vrcp.f32 %v2282_v43  ;;  %vm6426_vm14 = vcmp.eq.s32.totalorder %v6293_v3, %v6424_v49  ;;  %v2300_v33 = vadd.f32 1e-06, %v2268_v25  ;;  %vm6430_vm15 = vcmp.eq.s32.totalorder %v6293_v3, %v6425_v4 }
 0x459   : > { %v5187_v50 = vpop.eup %2981  ;;  %v5193_v44 = vsel %vm6426_vm14, %v6394_v12, 0.0  ;;  %3001 = vrcp.f32 %v2285_v15  ;;  %v5204_v28 = vsel %vm6430_vm15, %v6399_v45, 0.0  ;;  %v1943_v12 = vcvt.f32.s32 %v4759_v13 }
 0x45a   : > { %6427 = vst [vmem:[#allocation60_spill] sm:$0xff] %v5193_v44  ;;  %v5196_v37 = vpop.eup %2983  ;;  %6431 = vst [vmem:[#allocation63_spill] sm:$0xff] %v5204_v28  ;;  %3003 = vrcp.f32 %v2298_v2  ;;  %v1705_v14 = vcvt.f32.s32 %v4764_v22  ;;  %v1747_v25 = vcvt.f32.s32 %v4769_v47  ;;  %v1929_v11 = vcvt.f32.s32 %v4774_v26 }
 0x45b   : > { %v5206_v43 = vpop.eup %2985  ;;  %3005 = vrcp.f32 %v2301_v48  ;;  %v1971_v21 = vcvt.f32.s32 %v4779_v38  ;;  %v1733_v45 = vcvt.f32.s32 %v4783_v58  ;;  %vm6432_vm0 = vcmp.eq.s32.totalorder %v6293_v3, %v6428_v17 }
 0x45c   : > { %v5211_v15 = vpop.eup %2987  ;;  %3007 = vrcp.f32 %v2284_v42  ;;  %v5222_v13 = vsel %vm6432_vm0, %v6404_v35, 0.0  ;;  %v1720_v22 = vshll.u32 %v1719_v8, 16  ;;  %v1775_v47 = vcvt.f32.s32 %v4789_v31 }
 0x45d   : > { %v5216_v60 = vpop.eup %2989  ;;  %6433 = vst [vmem:[#allocation62_spill] sm:$0xff] %v5222_v13  ;;  %3009 = vrcp.f32 %v2300_v33  ;;  %v1957_v26 = vcvt.f32.s32 %v4794_v53  ;;  %v1999_v38 = vcvt.f32.s32 %v4799_v34  ;;  %v1761_v58 = vcvt.f32.s32 %v4804_v1 }
 0x45e   : > { %v5225_v2 = vpop.eup %2991  ;;  %v1803_v42 = vcvt.f32.s32 %v4809_v5  ;;  %v1944_v4 = vshll.u32 %v1943_v12, 16  ;;  %v5233_v17 = vshll.u32 %v1705_v14, 16  ;;  %v5235_v35 = vshll.u32 %v1747_v25, 16 }
 0x45f   : > { %v5231_v48 = vpop.eup %2993  ;;  %v1985_v33 = vcvt.f32.s32 %v4814_v30  ;;  %v5240_v8 = vshll.u32 %v1929_v11, 16  ;;  %v5242_v53 = vshll.u32 %v1971_v21, 16  ;;  %v5244_v34 = vshll.u32 %v1733_v45, 16 }
 0x460   : > { %v5238_v31 = vpop.eup %2995  ;;  %v2027_v1 = vcvt.f32.s32 %v4819_v57  ;;  %v5249_v49 = vshll.u32 %v1775_v47, 16  ;;  %v1789_v12 = vcvt.f32.s32 %v4824_v41  ;;  %v1831_v14 = vcvt.f32.s32 %v4829_v7 }
 0x461   : > { %6434 = vst [vmem:[#allocation67_spill] sm:$0xff] %v5238_v31  ;;  %v5247_v5 = vpop.eup %2997  ;;  %v2013_v30 = vcvt.f32.s32 %v4834_v63  ;;  %v5256_v11 = vshll.u32 %v1957_v26, 16  ;;  %v5258_v21 = vshll.u32 %v1999_v38, 16  ;;  %v5260_v45 = vshll.u32 %v1761_v58, 16  ;;  %v6445_v31 = vld [vmem:[#allocation103_spill] sm:$0xff] }
 0x462   : > { %6435 = vst [vmem:[#allocation66_spill] sm:$0xff] %v5247_v5  ;;  %v5254_v25 = vpop.eup %2999  ;;  %v5262_v13 = vshll.u32 %v1803_v42, 16  ;;  %v5267_v41 = vshll.u32 %v1985_v33, 16  ;;  %v2055_v7 = vcvt.f32.s32 %v4839_v6  ;;  %v1817_v63 = vcvt.f32.s32 %v4844_v10 }
 0x463   : > { %6436 = vst [vmem:[#allocation71_spill] sm:$0xff] %v5254_v25  ;;  %v5265_v47 = vpop.eup %3001  ;;  %vm2431_vm2 = vcmp.eq.s32.totalorder %v6293_v3, 9  ;;  %v5274_v58 = vshll.u32 %v2027_v1, 16  ;;  %v1859_v42 = vcvt.f32.s32 %v4849_v59  ;;  %v2041_v25 = vcvt.f32.s32 %v4854_v62 }
 0x464   : > { %6437 = vst [vmem:[#allocation113_spill] sm:$0xff] %v5265_v47  ;;  %v5272_v38 = vpop.eup %3003  ;;  %v2083_v47 = vcvt.f32.s32 %v4859_v0  ;;  %v5281_v28 = vshll.u32 %v1789_v12, 16  ;;  %v5283_v6 = vshll.u32 %v1831_v14, 16  ;;  %v5285_v10 = vshll.u32 %v2013_v30, 16 }
 0x465   : > { %6438 = vst [vmem:[#allocation114_spill] sm:$0xff] %v5272_v38  ;;  %v5279_v33 = vpop.eup %3005  ;;  %v1845_v1 = vcvt.f32.s32 %v4864_v46  ;;  %v1887_v38 = vcvt.f32.s32 %v4869_v9  ;;  %v2069_v59 = vcvt.f32.s32 %v4874_v51  ;;  %v2111_v62 = vcvt.f32.s32 %v4879_v36 }
 0x466   : > { %6439 = vst [vmem:[#allocation115_spill] sm:$0xff] %v5279_v33  ;;  %v5287_v5 = vpop.eup %3007  ;;  %v5296_v14 = vshll.u32 %v2055_v7, 16  ;;  %v5298_v30 = vshll.u32 %v1817_v63, 16  ;;  %v5303_v46 = vshll.u32 %v2041_v25, 16  ;;  %v5305_v9 = vshll.u32 %v2083_v47, 16 }
 0x467   : > { %6440 = vst [vmem:[#allocation116_spill] sm:$0xff] %v5287_v5  ;;  %v5294_v12 = vpop.eup %3009  ;;  %v1873_v5 = vcvt.f32.s32 %v4884_v40  ;;  %v5312_v33 = vshll.u32 %v1845_v1, 16  ;;  %v5318_v25 = vshll.u32 %v2111_v62, 16  ;;  %v6442_v1 = vld [vmem:[#allocation28_spill] sm:$0xff] }
 0x468   : > { %6441 = vst [vmem:[#allocation117_spill] sm:$0xff] %v5294_v12  ;;  %v6443_v62 = vld [vmem:[#allocation64_spill] sm:$0xff] }
 0x488   : > { %v1717_v57 = vpop.xlane.xlu1 %1716 }
 0x489   : > { %v1718_v26 = vcvt.f32.s32 %v1717_v57 }
 0x48b   : > { %v1721_v57 = vadd.s32 %v1720_v22, %v1718_v26  ;;  %v5301_v26 = vshll.u32 %v1859_v42, 16  ;;  %v5316_v42 = vshll.u32 %v2069_v59, 16  ;;  %v5326_v59 = vshll.u32 %v1873_v5, 16 }
 0x48c   : > { %v1941_v0 = vpop.xlane.xlu1 %1940  ;;  %v1703_v36 = vpop.xlane.xlu0 %1702 }
 0x48d   : > { %vm2143_vm3 = vcmp.eq.s32.totalorder %v6293_v3, %v1721_v57  ;;  %v1942_v22 = vcvt.f32.s32 %v1941_v0  ;;  %v1704_v12 = vcvt.f32.s32 %v1703_v36  ;;  %v5314_v0 = vshll.u32 %v1887_v38, 16 }
 0x48e   : > { %v2175_v51 = vsel %vm2143_vm3, %v6298_v23, 0.0  ;;  %v1915_v23 = vcvt.f32.s32 %v4889_v54  ;;  %v6444_v36 = vcvt.s32.f32 %v6443_v62 }
 0x48f   : > { %v2207_v7 = vadd.f32 %v2175_v51, %v4917_v20  ;;  %v1945_v63 = vadd.s32 %v1944_v4, %v1942_v22  ;;  %v1707_v40 = vadd.s32 %v5233_v17, %v1704_v12  ;;  %v2097_v20 = vcvt.f32.s32 %v4894_v24  ;;  %v6446_v24 = vld [vmem:[#allocation31_spill] sm:$0xff] }
 0x490   : > { %v1745_v47 = vpop.xlane.xlu1 %1744  ;;  %v2433_v4 = vcvt.s32.f32 %v1721_v57  ;;  %v1927_v51 = vpop.xlane.xlu0 %1926  ;;  %v5338_v5 = vshll.u32 %v1915_v23, 16  ;;  %v6451_v23 = vld [vmem:[#allocation65_spill] sm:$0xff] }
 0x491   : > { %v2335_v44 = vmul.f32 %v5055_v32, %v2207_v7  ;;  %vm2159_vm4 = vcmp.eq.s32.totalorder %v6293_v3, %v1945_v63  ;;  %v1746_v38 = vcvt.f32.s32 %v1745_v47  ;;  %vm2142_vm5 = vcmp.eq.s32.totalorder %v6293_v3, %v1707_v40 }
 0x492   : > { %v2191_v22 = vsel %vm2159_vm4, %v6442_v1, 0.0  ;;  %v2174_v57 = vsel %vm2142_vm5, %v6446_v24, 0.0  ;;  %v1928_v7 = vcvt.f32.s32 %v1927_v51  ;;  %6447 = vst [vmem:[#allocation28_spill] sm:$0xff] %v5338_v5  ;;  %v6452_v51 = vcvt.s32.f32 %v6451_v23  ;;  %v6457_v23 = vld [vmem:[#allocation68_spill] sm:$0xff]  ;;  %v6465_v5 = vld [vmem:[#allocation69_spill] sm:$0xff] }
 0x493   : > { %v2400_v54 = vsel %vm2366_vm1, %v6444_v36, %v2335_v44  ;;  %v2223_v32 = vadd.f32 %v2191_v22, %v6445_v31  ;;  %v1749_v12 = vadd.s32 %v5235_v35, %v1746_v38  ;;  %v6448_v44 = vld [vmem:[#allocation46_spill] sm:$0xff]  ;;  %v6449_v31 = vld [vmem:[#allocation104_spill] sm:$0xff]  ;;  %v5345_v36 = vshll.u32 %v2097_v20, 16 }
 0x494   : > { %v2465_v17 = vsel %vm2431_vm2, %v2433_v4, %v2400_v54  ;;  %v1969_v47 = vpop.xlane.xlu1 %1968  ;;  %v2206_v22 = vadd.f32 %v2174_v57, %v6449_v31  ;;  %v2449_v4 = vcvt.s32.f32 %v1945_v63  ;;  %v1931_v35 = vadd.s32 %v5240_v8, %v1928_v7  ;;  %v6456_v8 = vld [vmem:[#allocation96_spill] sm:$0xff] }
 0x495   : > { %2497 = vst [vmem:[%s5340_s10 + $0x8] sm:$0xff] %v2465_v17  ;;  %v2351_v1 = vmul.f32 %v6448_v44, %v2223_v32  ;;  %v1970_v62 = vcvt.f32.s32 %v1969_v47  ;;  %6450 = vst [vmem:[#allocation64_spill] sm:$0xff] %v5345_v36  ;;  %vm2145_vm6 = vcmp.eq.s32.totalorder %v6293_v3, %v1749_v12  ;;  %v1731_v38 = vpop.xlane.xlu0 %1730  ;;  %v6453_v17 = vld [vmem:[#allocation45_spill] sm:$0xff]  ;;  %v6454_v32 = vld [vmem:[#allocation30_spill] sm:$0xff]  ;;  %v2432_v20 = vcvt.s32.f32 %v1707_v40 }
 0x496   : > { %v2334_v24 = vmul.f32 %v6453_v17, %v2206_v22  ;;  %v2177_v44 = vsel %vm2145_vm6, %v6454_v32, 0.0  ;;  %v6455_v47 = vld [vmem:[#allocation107_spill] sm:$0xff]  ;;  %vm2158_vm7 = vcmp.eq.s32.totalorder %v6293_v3, %v1931_v35  ;;  %v2139_v7 = vcvt.f32.s32 %v6456_v8  ;;  %v6460_v40 = vld [vmem:[#allocation49_spill] sm:$0xff]  ;;  %v6462_v32 = vld [vmem:[#allocation32_spill] sm:$0xff] }
 0x497   : > { %v2416_v54 = vsel %vm2366_vm1, %v6452_v51, %v2351_v1  ;;  %v1973_v57 = vadd.s32 %v5242_v53, %v1970_v62  ;;  %v2209_v31 = vadd.f32 %v2177_v44, %v6455_v47  ;;  %v6458_v1 = vcvt.s32.f32 %v6457_v23  ;;  %v6459_v51 = vld [vmem:[#allocation33_spill] sm:$0xff]  ;;  %v6463_v8 = vld [vmem:[#allocation111_spill] sm:$0xff] }
 0x498   : > { %v2481_v63 = vsel %vm2431_vm2, %v2449_v4, %v2416_v54  ;;  %v2190_v17 = vsel %vm2158_vm7, %v6459_v51, 0.0  ;;  %v6461_v4 = vld [vmem:[#allocation108_spill] sm:$0xff]  ;;  %v6464_v51 = vld [vmem:[#allocation99_spill] sm:$0xff]  ;;  %v6466_v56 = vcvt.s32.f32 %v6465_v5 }
 0x499   : > { %2513 = vst [vmem:[%s5340_s10 + $0x88] sm:$0xff] %v2481_v63  ;;  %v2399_v22 = vsel %vm2366_vm1, %v6458_v1, %v2334_v24  ;;  %vm2161_vm8 = vcmp.eq.s32.totalorder %v6293_v3, %v1973_v57  ;;  %v2337_v62 = vmul.f32 %v6460_v40, %v2209_v31  ;;  %v2222_v54 = vadd.f32 %v2190_v17, %v6461_v4  ;;  %v1773_v47 = vpop.xlane.xlu1 %1772  ;;  %v6467_v31 = vld [vmem:[#allocation47_spill] sm:$0xff]  ;;  %v1955_v40 = vpop.xlane.xlu0 %1954  ;;  %v6470_v5 = vld [vmem:[#allocation72_spill] sm:$0xff] }
 0x49a   : > { %v2464_v53 = vsel %vm2431_vm2, %v2432_v20, %v2399_v22  ;;  %v2193_v44 = vsel %vm2161_vm8, %v6462_v32, 0.0  ;;  %v2435_v63 = vcvt.s32.f32 %v1749_v12  ;;  %v1732_v24 = vcvt.f32.s32 %v1731_v38  ;;  %v6468_v12 = vld [vmem:[#allocation50_spill] sm:$0xff] }
 0x49b   : > { %2496 = vst [vmem:[%s5340_s10] sm:$0xff] %v2464_v53  ;;  %v2225_v23 = vadd.f32 %v2193_v44, %v6463_v8  ;;  %v1774_v1 = vcvt.f32.s32 %v1773_v47  ;;  %v1901_v36 = vcvt.f32.s32 %v6464_v51  ;;  %v2402_v20 = vsel %vm2366_vm1, %v6466_v56, %v2337_v62  ;;  %v6469_v44 = vld [vmem:[#allocation100_spill] sm:$0xff] }
 0x49c   : > { %v2350_v22 = vmul.f32 %v6467_v31, %v2222_v54  ;;  %v2448_v17 = vcvt.s32.f32 %v1931_v35  ;;  %v2467_v53 = vsel %vm2431_vm2, %v2435_v63, %v2402_v20  ;;  %v1735_v38 = vadd.s32 %v5244_v34, %v1732_v24  ;;  %v6472_v34 = vld [vmem:[#allocation73_spill] sm:$0xff]  ;;  %v6475_v31 = vld [vmem:[#allocation110_spill] sm:$0xff] }
 0x49d   : > { %v2353_v4 = vmul.f32 %v6468_v12, %v2225_v23  ;;  %v1777_v32 = vadd.s32 %v5249_v49, %v1774_v1  ;;  %v2125_v47 = vcvt.f32.s32 %v6469_v44  ;;  %2499 = vst [vmem:[%s5340_s10 + $0x18] sm:$0xff] %v2467_v53  ;;  %v6471_v56 = vcvt.s32.f32 %v6470_v5  ;;  %v1997_v8 = vpop.xlane.xlu1 %1996  ;;  %v6474_v1 = vld [vmem:[#allocation35_spill] sm:$0xff]  ;;  %v6477_v44 = vld [vmem:[#allocation112_spill] sm:$0xff] }
 0x49e   : > { %v2451_v62 = vcvt.s32.f32 %v1973_v57  ;;  %v1956_v54 = vcvt.f32.s32 %v1955_v40  ;;  %v5392_v51 = vshll.u32 %v2139_v7, 16  ;;  %v6473_v23 = vcvt.s32.f32 %v6472_v34  ;;  %v1759_v7 = vpop.xlane.xlu0 %1758 }
 0x49f   : > { %v2415_v35 = vsel %vm2366_vm1, %v6471_v56, %v2350_v22  ;;  %vm2144_vm9 = vcmp.eq.s32.totalorder %v6293_v3, %v1735_v38  ;;  %v5401_v24 = vshll.u32 %v1901_v36, 16  ;;  %vm2147_vm10 = vcmp.eq.s32.totalorder %v6293_v3, %v1777_v32 }
 0x4a0   : > { %v2480_v63 = vsel %vm2431_vm2, %v2448_v17, %v2415_v35  ;;  %v2418_v49 = vsel %vm2366_vm1, %v6473_v23, %v2353_v4  ;;  %v2176_v20 = vsel %vm2144_vm9, %v6474_v1, 0.0  ;;  %v6476_v17 = vld [vmem:[#allocation34_spill] sm:$0xff]  ;;  %v1959_v53 = vadd.s32 %v5256_v11, %v1956_v54  ;;  %v6480_v1 = vld [vmem:[#allocation37_spill] sm:$0xff] }
 0x4a1   : > { %2512 = vst [vmem:[%s5340_s10 + $0x80] sm:$0xff] %v2480_v63  ;;  %v2483_v57 = vsel %vm2431_vm2, %v2451_v62, %v2418_v49  ;;  %v2208_v22 = vadd.f32 %v2176_v20, %v6475_v31  ;;  %v2179_v40 = vsel %vm2147_vm10, %v6476_v17, 0.0  ;;  %v1998_v12 = vcvt.f32.s32 %v1997_v8  ;;  %v1801_v35 = vpop.xlane.xlu1 %1800  ;;  %v6478_v62 = vld [vmem:[#allocation52_spill] sm:$0xff]  ;;  %v6479_v49 = vld [vmem:[#allocation55_spill] sm:$0xff]  ;;  %v6484_v17 = vld [vmem:[#allocation78_spill] sm:$0xff] }
 0x4a2   : > { %2515 = vst [vmem:[%s5340_s10 + $0x98] sm:$0xff] %v2483_v57  ;;  %v5412_v4 = vshll.u32 %v2125_v47, 16  ;;  %v2434_v36 = vcvt.s32.f32 %v1735_v38  ;;  %v2211_v5 = vadd.f32 %v2179_v40, %v6477_v44  ;;  %v1760_v56 = vcvt.f32.s32 %v1759_v7  ;;  %v1983_v38 = vpop.xlane.xlu0 %1982  ;;  %v6481_v8 = vld [vmem:[#allocation76_spill] sm:$0xff] }
 0x4a3   : > { %v2336_v63 = vmul.f32 %v6478_v62, %v2208_v22  ;;  %v2437_v34 = vcvt.s32.f32 %v1777_v32  ;;  %vm2160_vm11 = vcmp.eq.s32.totalorder %v6293_v3, %v1959_v53  ;;  %v2001_v23 = vadd.s32 %v5258_v21, %v1998_v12  ;;  %v6483_v32 = vld [vmem:[#allocation39_spill] sm:$0xff]  ;;  %v6486_v12 = vld [vmem:[#allocation36_spill] sm:$0xff]  ;;  %v6488_v62 = vld [vmem:[#allocation6_spill] sm:$0xff] }
 0x4a4   : > { %v2339_v57 = vmul.f32 %v6479_v49, %v2211_v5  ;;  %v2192_v11 = vsel %vm2160_vm11, %v6480_v1, 0.0  ;;  %v1763_v47 = vadd.s32 %v5260_v45, %v1760_v56  ;;  %v1802_v54 = vcvt.f32.s32 %v1801_v35  ;;  %v6489_v49 = vld [vmem:[#allocation38_spill] sm:$0xff] }
 0x4a5   : > { %v6482_v20 = vcvt.s32.f32 %v6481_v8  ;;  %v2224_v31 = vadd.f32 %v2192_v11, %v6483_v32  ;;  %v2450_v22 = vcvt.s32.f32 %v1959_v53  ;;  %vm2163_vm12 = vcmp.eq.s32.totalorder %v6293_v3, %v2001_v23  ;;  %v2025_v5 = vpop.xlane.xlu1 %2024  ;;  %v6487_v53 = vld [vmem:[#allocation54_spill] sm:$0xff]  ;;  %v6490_v11 = vld [vmem:[#allocation40_spill] sm:$0xff]  ;;  %v6491_v32 = vld [vmem:[#allocation79_spill] sm:$0xff] }
 0x4a6   : > { %v6485_v40 = vcvt.s32.f32 %v6484_v17  ;;  %v2195_v44 = vsel %vm2163_vm12, %v6486_v12, 0.0  ;;  %vm2146_vm13 = vcmp.eq.s32.totalorder %v6293_v3, %v1763_v47  ;;  %v2453_v1 = vcvt.s32.f32 %v2001_v23  ;;  %v6493_v17 = vld [vmem:[#allocation56_spill] sm:$0xff] }
 0x4a7   : > { %v2401_v7 = vsel %vm2366_vm1, %v6482_v20, %v2336_v63  ;;  %v2352_v35 = vmul.f32 %v6487_v53, %v2224_v31  ;;  %v2227_v63 = vadd.f32 %v2195_v44, %v6488_v62  ;;  %v1805_v8 = vadd.s32 %v5262_v13, %v1802_v54  ;;  %v6494_v54 = vld [vmem:[#allocation80_spill] sm:$0xff]  ;;  %v6496_v53 = vld [vmem:[#allocation82_spill] sm:$0xff] }
 0x4a8   : > { %v2466_v21 = vsel %vm2431_vm2, %v2434_v36, %v2401_v7  ;;  %v2404_v45 = vsel %vm2366_vm1, %v6485_v40, %v2339_v57  ;;  %v2178_v36 = vsel %vm2146_vm13, %v6489_v49, 0.0  ;;  %v1984_v20 = vcvt.f32.s32 %v1983_v38  ;;  %v1787_v7 = vpop.xlane.xlu0 %1786  ;;  %v6499_v49 = vld [vmem:[#allocation29_spill] sm:$0xff] }
 0x4a9   : > { %2498 = vst [vmem:[%s5340_s10 + $0x10] sm:$0xff] %v2466_v21  ;;  %v2469_v56 = vsel %vm2431_vm2, %v2437_v34, %v2404_v45  ;;  %v2210_v57 = vadd.f32 %v2178_v36, %v6490_v11  ;;  %v6492_v21 = vcvt.s32.f32 %v6491_v32  ;;  %v2355_v31 = vmul.f32 %v6493_v17, %v2227_v63  ;;  %v1829_v13 = vpop.xlane.xlu1 %1828  ;;  %v6502_v17 = vld [vmem:[#allocation41_spill] sm:$0xff] }
 0x4aa   : > { %2501 = vst [vmem:[%s5340_s10 + $0x28] sm:$0xff] %v2469_v56  ;;  %v2026_v40 = vcvt.f32.s32 %v2025_v5  ;;  %v1788_v45 = vcvt.f32.s32 %v1787_v7  ;;  %v2436_v44 = vcvt.s32.f32 %v1763_v47  ;;  %vm2149_vm14 = vcmp.eq.s32.totalorder %v6293_v3, %v1805_v8  ;;  %v6497_v47 = vld [vmem:[#allocation81_spill] sm:$0xff] }
 0x4ab   : > { %v2417_v34 = vsel %vm2366_vm1, %v6492_v21, %v2352_v35  ;;  %v2338_v23 = vmul.f32 %v5135_v39, %v2210_v57  ;;  %v6495_v38 = vcvt.s32.f32 %v6494_v54  ;;  %v2181_v5 = vsel %vm2149_vm14, %v6496_v53, 0.0  ;;  %v6501_v21 = vld [vmem:[#allocation84_spill] sm:$0xff] }
 0x4ac   : > { %v2482_v12 = vsel %vm2431_vm2, %v2450_v22, %v2417_v34  ;;  %v1987_v35 = vadd.s32 %v5267_v41, %v1984_v20  ;;  %v2029_v62 = vadd.s32 %v5274_v58, %v2026_v40  ;;  %v6498_v22 = vcvt.s32.f32 %v6497_v47  ;;  %v2011_v57 = vpop.xlane.xlu0 %2010  ;;  %v6503_v40 = vld [vmem:[#allocation42_spill] sm:$0xff] }
 0x4ad   : > { %2514 = vst [vmem:[%s5340_s10 + $0x90] sm:$0xff] %v2482_v12  ;;  %v2420_v56 = vsel %vm2366_vm1, %v6495_v38, %v2355_v31  ;;  %v2213_v36 = vadd.f32 %v2181_v5, %v6499_v49  ;;  %v1791_v11 = vadd.s32 %v5281_v28, %v1788_v45  ;;  %v2439_v41 = vcvt.s32.f32 %v1805_v8  ;;  %v2053_v28 = vpop.xlane.xlu1 %2052  ;;  %v6504_v8 = vld [vmem:[#allocation7_spill] sm:$0xff] }
 0x4ae   : > { %v2485_v39 = vsel %vm2431_vm2, %v2453_v1, %v2420_v56  ;;  %v2403_v63 = vsel %vm2366_vm1, %v6498_v22, %v2338_v23  ;;  %vm2162_vm15 = vcmp.eq.s32.totalorder %v6293_v3, %v1987_v35  ;;  %vm2165_vm0 = vcmp.eq.s32.totalorder %v6293_v3, %v2029_v62  ;;  %v6500_v1 = vld [vmem:[#allocation83_spill] sm:$0xff] }
 0x4af   : > { %2517 = vst [vmem:[%s5340_s10 + $0xa8] sm:$0xff] %v2485_v39  ;;  %v2468_v7 = vsel %vm2431_vm2, %v2436_v44, %v2403_v63  ;;  %v2341_v58 = vmul.f32 %v5140_v29, %v2213_v36  ;;  %v2194_v20 = vsel %vm2162_vm15, %v6500_v1, 0.0  ;;  %v2452_v32 = vcvt.s32.f32 %v1987_v35  ;;  %v6506_v29 = vld [vmem:[#allocation85_spill] sm:$0xff] }
 0x4b0   : > { %2500 = vst [vmem:[%s5340_s10 + $0x20] sm:$0xff] %v2468_v7  ;;  %v2197_v34 = vsel %vm2165_vm0, %v6501_v21, 0.0  ;;  %v2226_v31 = vadd.f32 %v2194_v20, %v6502_v17  ;;  %v2455_v12 = vcvt.s32.f32 %v2029_v62  ;;  %vm2148_vm3 = vcmp.eq.s32.totalorder %v6293_v3, %v1791_v11  ;;  %v1815_v53 = vpop.xlane.xlu0 %1814  ;;  %v6507_v62 = vld [vmem:[#allocation43_spill] sm:$0xff] }
 0x4b1   : > { %v2229_v45 = vadd.f32 %v2197_v34, %v6503_v40  ;;  %v6505_v23 = vcvt.s32.f32 %v6504_v8  ;;  %v2180_v54 = vsel %vm2148_vm3, %v6506_v29, 0.0  ;;  %v1830_v38 = vcvt.f32.s32 %v1829_v13  ;;  %v1857_v36 = vpop.xlane.xlu1 %1856  ;;  %v6516_v8 = vld [vmem:[#allocation87_spill] sm:$0xff] }
 0x4b2   : > { %v2012_v56 = vcvt.f32.s32 %v2011_v57  ;;  %v2354_v35 = vmul.f32 %v5145_v55, %v2226_v31  ;;  %v2212_v47 = vadd.f32 %v2180_v54, %v6507_v62  ;;  %v2054_v49 = vcvt.f32.s32 %v2053_v28  ;;  %v6508_v57 = vld [vmem:[#allocation8_spill] sm:$0xff]  ;;  %v6510_v55 = vld [vmem:[#allocation10_spill] sm:$0xff]  ;;  %v6512_v28 = vld [vmem:[#allocation9_spill] sm:$0xff] }
 0x4b3   : > { %v2406_v44 = vsel %vm2366_vm1, %v6505_v23, %v2341_v58  ;;  %v2357_v39 = vmul.f32 %v5155_v18, %v2229_v45  ;;  %v1833_v22 = vadd.s32 %v5283_v6, %v1830_v38  ;;  %v1816_v13 = vcvt.f32.s32 %v1815_v53  ;;  %v6517_v54 = vld [vmem:[#allocation48_spill] sm:$0xff] }
 0x4b4   : > { %v2471_v5 = vsel %vm2431_vm2, %v2439_v41, %v2406_v44  ;;  %v2015_v63 = vadd.s32 %v5285_v10, %v2012_v56  ;;  %v6509_v7 = vcvt.s32.f32 %v6508_v57  ;;  %v6511_v58 = vcvt.s32.f32 %v6510_v55  ;;  %v2039_v34 = vpop.xlane.xlu0 %2038  ;;  %v6523_v55 = vld [vmem:[#allocation11_spill] sm:$0xff] }
 0x4b5   : > { %2503 = vst [vmem:[%s5340_s10 + $0x38] sm:$0xff] %v2471_v5  ;;  %v2340_v1 = vmul.f32 %v5165_v19, %v2212_v47  ;;  %v1858_v20 = vcvt.f32.s32 %v1857_v36  ;;  %v2438_v21 = vcvt.s32.f32 %v1791_v11  ;;  %vm2151_vm4 = vcmp.eq.s32.totalorder %v6293_v3, %v1833_v22  ;;  %v6514_v19 = vld [vmem:[#allocation86_spill] sm:$0xff]  ;;  %v2081_v29 = vpop.xlane.xlu1 %2080 }
 0x4b6   : > { %v2419_v41 = vsel %vm2366_vm1, %v6509_v7, %v2354_v35  ;;  %v2422_v18 = vsel %vm2366_vm1, %v6511_v58, %v2357_v39  ;;  %v6513_v17 = vcvt.s32.f32 %v6512_v28  ;;  %v2183_v40 = vsel %vm2151_vm4, %v6514_v19, 0.0 }
 0x4b7   : > { %v2484_v6 = vsel %vm2431_vm2, %v2452_v32, %v2419_v41  ;;  %v2487_v10 = vsel %vm2431_vm2, %v2455_v12, %v2422_v18  ;;  %v2441_v45 = vcvt.s32.f32 %v1833_v22  ;;  %vm2164_vm5 = vcmp.eq.s32.totalorder %v6293_v3, %v2015_v63  ;;  %v6515_v12 = vld [vmem:[#allocation44_spill] sm:$0xff] }
 0x4b8   : > { %2516 = vst [vmem:[%s5340_s10 + $0xa0] sm:$0xff] %v2484_v6  ;;  %2519 = vst [vmem:[%s5340_s10 + $0xb8] sm:$0xff] %v2487_v10  ;;  %v2405_v31 = vsel %vm2366_vm1, %v6513_v17, %v2340_v1  ;;  %v2215_v11 = vadd.f32 %v2183_v40, %v6515_v12  ;;  %v2196_v23 = vsel %vm2164_vm5, %v6516_v8, 0.0  ;;  %v2057_v44 = vadd.s32 %v5296_v14, %v2054_v49  ;;  %v1843_v47 = vpop.xlane.xlu0 %1842  ;;  %v6518_v14 = vld [vmem:[#allocation88_spill] sm:$0xff]  ;;  %v6525_v1 = vld [vmem:[#allocation53_spill] sm:$0xff] }
 0x4b9   : > { %v2470_v32 = vsel %vm2431_vm2, %v2438_v21, %v2405_v31  ;;  %v2228_v38 = vadd.f32 %v2196_v23, %v6517_v54  ;;  %v2454_v56 = vcvt.s32.f32 %v2015_v63  ;;  %v1819_v53 = vadd.s32 %v5298_v30, %v1816_v13  ;;  %v6519_v63 = vld [vmem:[#allocation12_spill] sm:$0xff]  ;;  %v6522_v13 = vld [vmem:[#allocation89_spill] sm:$0xff]  ;;  %v6526_v6 = vld [vmem:[#allocation90_spill] sm:$0xff] }
 0x4ba   : > { %2502 = vst [vmem:[%s5340_s10 + $0x30] sm:$0xff] %v2470_v32  ;;  %v1861_v5 = vadd.s32 %v5301_v26, %v1858_v20  ;;  %v2343_v35 = vmul.f32 %v5169_v27, %v2215_v11  ;;  %vm2167_vm6 = vcmp.eq.s32.totalorder %v6293_v3, %v2057_v44  ;;  %v2457_v39 = vcvt.s32.f32 %v2057_v44  ;;  %v6521_v27 = vld [vmem:[#allocation51_spill] sm:$0xff]  ;;  %v1885_v41 = vpop.xlane.xlu1 %1884  ;;  %v6527_v17 = vld [vmem:[#allocation57_spill] sm:$0xff] }
 0x4bb   : > { %v2040_v62 = vcvt.f32.s32 %v2039_v34  ;;  %v2356_v22 = vmul.f32 %v5183_v52, %v2228_v38  ;;  %v2199_v49 = vsel %vm2167_vm6, %v6518_v14, 0.0  ;;  %vm2150_vm7 = vcmp.eq.s32.totalorder %v6293_v3, %v1819_v53  ;;  %v6528_v11 = vld [vmem:[#allocation13_spill] sm:$0xff]  ;;  %v6530_v38 = vld [vmem:[#allocation16_spill] sm:$0xff]  ;;  %v6535_v14 = vld [vmem:[#allocation59_spill] sm:$0xff] }
 0x4bc   : > { %v2082_v36 = vcvt.f32.s32 %v2081_v29  ;;  %v6520_v57 = vcvt.s32.f32 %v6519_v63  ;;  %v2231_v26 = vadd.f32 %v2199_v49, %v6521_v27  ;;  %v2182_v7 = vsel %vm2150_vm7, %v6522_v13, 0.0  ;;  %v2067_v19 = vpop.xlane.xlu0 %2066  ;;  %v6536_v63 = vld [vmem:[#allocation92_spill] sm:$0xff] }
 0x4bd   : > { %vm2153_vm8 = vcmp.eq.s32.totalorder %v6293_v3, %v1861_v5  ;;  %v6524_v58 = vcvt.s32.f32 %v6523_v55  ;;  %v2214_v20 = vadd.f32 %v2182_v7, %v6525_v1  ;;  %v2440_v28 = vcvt.s32.f32 %v1819_v53 }
 0x4be   : > { %v2408_v30 = vsel %vm2366_vm1, %v6520_v57, %v2343_v35  ;;  %v2185_v10 = vsel %vm2153_vm8, %v6526_v6, 0.0  ;;  %v2359_v34 = vmul.f32 %v5187_v50, %v2231_v26  ;;  %v2043_v32 = vadd.s32 %v5303_v46, %v2040_v62  ;;  %v2109_v54 = vpop.xlane.xlu1 %2108  ;;  %v6534_v62 = vld [vmem:[#allocation91_spill] sm:$0xff] }
 0x4bf   : > { %v2473_v52 = vsel %vm2431_vm2, %v2441_v45, %v2408_v30  ;;  %v2421_v18 = vsel %vm2366_vm1, %v6524_v58, %v2356_v22  ;;  %v2217_v31 = vadd.f32 %v2185_v10, %v6527_v17  ;;  %v2342_v40 = vmul.f32 %v5196_v37, %v2214_v20  ;;  %v6537_v30 = vld [vmem:[#allocation58_spill] sm:$0xff]  ;;  %v6542_v17 = vld [vmem:[#allocation15_spill] sm:$0xff] }
 0x4c0   : > { %2505 = vst [vmem:[%s5340_s10 + $0x48] sm:$0xff] %v2473_v52  ;;  %v2486_v21 = vsel %vm2431_vm2, %v2454_v56, %v2421_v18  ;;  %v2443_v45 = vcvt.s32.f32 %v1861_v5  ;;  %v2085_v12 = vadd.s32 %v5305_v9, %v2082_v36  ;;  %v6529_v8 = vcvt.s32.f32 %v6528_v11 }
 0x4c1   : > { %2518 = vst [vmem:[%s5340_s10 + $0xb0] sm:$0xff] %v2486_v21  ;;  %v2345_v50 = vmul.f32 %v5206_v43, %v2217_v31  ;;  %v1844_v44 = vcvt.f32.s32 %v1843_v47  ;;  %v1886_v29 = vcvt.f32.s32 %v1885_v41  ;;  %v6531_v56 = vcvt.s32.f32 %v6530_v38  ;;  %v6532_v43 = vld [vmem:[#allocation14_spill] sm:$0xff]  ;;  %v6546_v38 = vld [vmem:[#allocation28_spill] sm:$0xff] }
 0x4c2   : > { %v2424_v23 = vsel %vm2366_vm1, %v6529_v8, %v2359_v34  ;;  %vm2166_vm9 = vcmp.eq.s32.totalorder %v6293_v3, %v2043_v32  ;;  %v2068_v9 = vcvt.f32.s32 %v2067_v19  ;;  %v6533_v5 = vcvt.s32.f32 %v6532_v43  ;;  %v1913_v41 = vpop.xlane.xlu1 %1912  ;;  %v6541_v34 = vld [vmem:[#allocation94_spill] sm:$0xff] }
 0x4c3   : > { %v2489_v37 = vsel %vm2431_vm2, %v2457_v39, %v2424_v23  ;;  %v2407_v46 = vsel %vm2366_vm1, %v6531_v56, %v2342_v40  ;;  %v2198_v47 = vsel %vm2166_vm9, %v6534_v62, 0.0  ;;  %vm2169_vm10 = vcmp.eq.s32.totalorder %v6293_v3, %v2085_v12  ;;  %v1871_v39 = vpop.xlane.xlu0 %1870  ;;  %v6552_v62 = vld [vmem:[#allocation67_spill] sm:$0xff] }
 0x4c4   : > { %2521 = vst [vmem:[%s5340_s10 + $0xc8] sm:$0xff] %v2489_v37  ;;  %v2472_v53 = vsel %vm2431_vm2, %v2440_v28, %v2407_v46  ;;  %v2410_v35 = vsel %vm2366_vm1, %v6533_v5, %v2345_v50  ;;  %v2230_v49 = vadd.f32 %v2198_v47, %v6535_v14  ;;  %v2456_v36 = vcvt.s32.f32 %v2043_v32  ;;  %v6544_v50 = vld [vmem:[#allocation95_spill] sm:$0xff] }
 0x4c5   : > { %2504 = vst [vmem:[%s5340_s10 + $0x40] sm:$0xff] %v2472_v53  ;;  %v2475_v22 = vsel %vm2431_vm2, %v2443_v45, %v2410_v35  ;;  %v2201_v57 = vsel %vm2169_vm10, %v6536_v63, 0.0  ;;  %v2459_v26 = vcvt.s32.f32 %v2085_v12  ;;  %v1847_v13 = vadd.s32 %v5312_v33, %v1844_v44  ;;  %v6538_v33 = vld [vmem:[#allocation17_spill] sm:$0xff] }
 0x4c6   : > { %2507 = vst [vmem:[%s5340_s10 + $0x58] sm:$0xff] %v2475_v22  ;;  %v2233_v27 = vadd.f32 %v2201_v57, %v6537_v30  ;;  %v1889_v7 = vadd.s32 %v5314_v0, %v1886_v29  ;;  %v2358_v52 = vmul.f32 %v5211_v15, %v2230_v49  ;;  %v2071_v55 = vadd.s32 %v5316_v42, %v2068_v9  ;;  %v6540_v15 = vld [vmem:[#allocation93_spill] sm:$0xff]  ;;  %v2137_v14 = vpop.xlane.xlu1 %2136 }
 0x4c7   : > { %v2110_v58 = vcvt.f32.s32 %v2109_v54  ;;  %v1872_v18 = vcvt.f32.s32 %v1871_v39  ;;  %vm2152_vm11 = vcmp.eq.s32.totalorder %v6293_v3, %v1847_v13  ;;  %v1914_v20 = vcvt.f32.s32 %v1913_v41  ;;  %v2095_v6 = vpop.xlane.xlu0 %2094  ;;  %v6545_v29 = vld [vmem:[#allocation61_spill] sm:$0xff]  ;;  %v6553_v39 = vld [vmem:[#allocation60_spill] sm:$0xff] }
 0x4c8   : > { %v2361_v1 = vmul.f32 %v5216_v60, %v2233_v27  ;;  %vm2155_vm12 = vcmp.eq.s32.totalorder %v6293_v3, %v1889_v7  ;;  %v6539_v10 = vcvt.s32.f32 %v6538_v33  ;;  %v2184_v21 = vsel %vm2152_vm11, %v6540_v15, 0.0  ;;  %v6555_v27 = vld [vmem:[#allocation21_spill] sm:$0xff]  ;;  %v6561_v15 = vld [vmem:[#allocation20_spill] sm:$0xff] }
 0x4c9   : > { %v2442_v42 = vcvt.s32.f32 %v1847_v13  ;;  %v2187_v28 = vsel %vm2155_vm12, %v6541_v34, 0.0  ;;  %v6543_v31 = vcvt.s32.f32 %v6542_v17  ;;  %v2216_v40 = vadd.f32 %v2184_v21, %v5161_v16  ;;  %v6563_v34 = vld [vmem:[#allocation71_spill] sm:$0xff] }
 0x4ca   : > { %v2423_v0 = vsel %vm2366_vm1, %v6539_v10, %v2358_v52  ;;  %v2219_v45 = vadd.f32 %v2187_v28, %v5175_v61  ;;  %v2445_v12 = vcvt.s32.f32 %v1889_v7  ;;  %vm2168_vm13 = vcmp.eq.s32.totalorder %v6293_v3, %v2071_v55  ;;  %v6557_v7 = vld [vmem:[#allocation66_spill] sm:$0xff]  ;;  %v6558_v52 = vld [vmem:[#allocation63_spill] sm:$0xff] }
 0x4cb   : > { %v2488_v60 = vsel %vm2431_vm2, %v2456_v36, %v2423_v0  ;;  %v2426_v19 = vsel %vm2366_vm1, %v6543_v31, %v2361_v1  ;;  %v2113_v11 = vadd.s32 %v5318_v25, %v2110_v58  ;;  %v2344_v8 = vmul.f32 %v5225_v2, %v2216_v40  ;;  %v1899_v61 = vpop.xlane.xlu0 %1898  ;;  %v6547_v25 = vld [vmem:[#allocation19_spill] sm:$0xff]  ;;  %v6554_v36 = vld [vmem:[#allocation98_spill] sm:$0xff]  ;;  %v6559_v58 = vld [vmem:[#allocation101_spill] sm:$0xff] }
 0x4cc   : > { %2520 = vst [vmem:[%s5340_s10 + $0xc0] sm:$0xff] %v2488_v60  ;;  %v2491_v32 = vsel %vm2431_vm2, %v2459_v26, %v2426_v19  ;;  %v2347_v23 = vmul.f32 %v5231_v48, %v2219_v45  ;;  %v2200_v44 = vsel %vm2168_vm13, %v6544_v50, 0.0  ;;  %v1875_v16 = vadd.s32 %v5326_v59, %v1872_v18  ;;  %v6549_v48 = vld [vmem:[#allocation18_spill] sm:$0xff]  ;;  %v6551_v59 = vld [vmem:[#allocation97_spill] sm:$0xff]  ;;  %v6565_v45 = vld [vmem:[#allocation64_spill] sm:$0xff] }
 0x4cd   : > { %2523 = vst [vmem:[%s5340_s10 + $0xd8] sm:$0xff] %v2491_v32  ;;  %v2232_v54 = vadd.f32 %v2200_v44, %v6545_v29  ;;  %v2458_v37 = vcvt.s32.f32 %v2071_v55  ;;  %vm2171_vm14 = vcmp.eq.s32.totalorder %v6293_v3, %v2113_v11  ;;  %v1917_v56 = vadd.s32 %v6546_v38, %v1914_v20  ;;  %v6560_v20 = vld [vmem:[#allocation62_spill] sm:$0xff]  ;;  %v6564_v19 = vld [vmem:[#allocation113_spill] sm:$0xff] }
 0x4ce   : > { %v6548_v46 = vcvt.s32.f32 %v6547_v25  ;;  %v6550_v9 = vcvt.s32.f32 %v6549_v48  ;;  %v2203_v43 = vsel %vm2171_vm14, %v6551_v59, 0.0  ;;  %vm2154_vm15 = vcmp.eq.s32.totalorder %v6293_v3, %v1875_v16 }
 0x4cf   : > { %v2360_v47 = vmul.f32 %v6552_v62, %v2232_v54  ;;  %v2235_v22 = vadd.f32 %v2203_v43, %v6553_v39  ;;  %v2461_v49 = vcvt.s32.f32 %v2113_v11  ;;  %v2186_v63 = vsel %vm2154_vm15, %v6554_v36, 0.0  ;;  %v2123_v30 = vpop.xlane.xlu0 %2122  ;;  %v6571_v54 = vld [vmem:[#allocation22_spill] sm:$0xff] }
 0x4d0   : > { %v2409_v2 = vsel %vm2366_vm1, %v6548_v46, %v2344_v8  ;;  %v2412_v53 = vsel %vm2366_vm1, %v6550_v9, %v2347_v23  ;;  %v2444_v57 = vcvt.s32.f32 %v1875_v16  ;;  %vm2157_vm0 = vcmp.eq.s32.totalorder %v6293_v3, %v1917_v56  ;;  %v6568_v16 = vld [vmem:[#allocation70_spill] sm:$0xff] }
 0x4d1   : > { %v2474_v5 = vsel %vm2431_vm2, %v2442_v42, %v2409_v2  ;;  %v2477_v35 = vsel %vm2431_vm2, %v2445_v12, %v2412_v53  ;;  %v6556_v26 = vcvt.s32.f32 %v6555_v27  ;;  %v2363_v41 = vmul.f32 %v6557_v7, %v2235_v22  ;;  %v6566_v12 = vld [vmem:[#allocation23_spill] sm:$0xff]  ;;  %v6577_v53 = vld [vmem:[#allocation105_spill] sm:$0xff]  ;;  %v6578_v43 = vld [vmem:[#allocation74_spill] sm:$0xff] }
 0x4d2   : > { %2506 = vst [vmem:[%s5340_s10 + $0x50] sm:$0xff] %v2474_v5  ;;  %2509 = vst [vmem:[%s5340_s10 + $0x68] sm:$0xff] %v2477_v35  ;;  %v2218_v55 = vadd.f32 %v2186_v63, %v6558_v52  ;;  %v2189_v18 = vsel %vm2157_vm0, %v6559_v58, 0.0  ;;  %v2096_v10 = vcvt.f32.s32 %v2095_v6  ;;  %v2138_v0 = vcvt.f32.s32 %v2137_v14  ;;  %v6575_v2 = vld [vmem:[#allocation75_spill] sm:$0xff]  ;;  %v6582_v22 = vld [vmem:[#allocation77_spill] sm:$0xff] }
 0x4d3   : > { %v2425_v13 = vsel %vm2366_vm1, %v6556_v26, %v2360_v47  ;;  %v2221_v33 = vadd.f32 %v2189_v18, %v6560_v20  ;;  %v6562_v21 = vcvt.s32.f32 %v6561_v15  ;;  %v1900_v60 = vcvt.f32.s32 %v1899_v61  ;;  %v6569_v61 = vld [vmem:[#allocation25_spill] sm:$0xff]  ;;  %v6579_v5 = vld [vmem:[#allocation27_spill] sm:$0xff]  ;;  %v6581_v47 = vld [vmem:[#allocation106_spill] sm:$0xff] }
 0x4d4   : > { %v2490_v1 = vsel %vm2431_vm2, %v2458_v37, %v2425_v13  ;;  %v2346_v28 = vmul.f32 %v6563_v34, %v2218_v55  ;;  %v2124_v17 = vcvt.f32.s32 %v2123_v30  ;;  %v2099_v32 = vadd.s32 %v6565_v45, %v2096_v10  ;;  %v6583_v14 = vld [vmem:[#allocation26_spill] sm:$0xff]  ;;  %v6586_v30 = vld [vmem:[#allocation109_spill] sm:$0xff]  ;;  %v6587_v7 = vld [vmem:[#allocation115_spill] sm:$0xff] }
 0x4d5   : > { %2522 = vst [vmem:[%s5340_s10 + $0xd0] sm:$0xff] %v2490_v1  ;;  %v2428_v42 = vsel %vm2366_vm1, %v6562_v21, %v2363_v41  ;;  %v2349_v40 = vmul.f32 %v6564_v19, %v2221_v33  ;;  %v2141_v6 = vadd.s32 %v5392_v51, %v2138_v0  ;;  %v6567_v11 = vcvt.s32.f32 %v6566_v12  ;;  %v6585_v36 = vld [vmem:[#allocation114_spill] sm:$0xff]  ;;  %v6589_v20 = vld [vmem:[#allocation116_spill] sm:$0xff]  ;;  %v6590_v21 = vld [vmem:[#allocation117_spill] sm:$0xff] }
 0x4d6   : > { %v2493_v31 = vsel %vm2431_vm2, %v2461_v49, %v2428_v42  ;;  %v2447_v23 = vcvt.s32.f32 %v1917_v56  ;;  %v1903_v50 = vadd.s32 %v5401_v24, %v1900_v60  ;;  %v2127_v44 = vadd.s32 %v5412_v4, %v2124_v17  ;;  %v6573_v56 = vld [vmem:[#allocation24_spill] sm:$0xff]  ;;  %v6574_v4 = vld [vmem:[#allocation102_spill] sm:$0xff] }
 0x4d7   : > { %2525 = vst [vmem:[%s5340_s10 + $0xe8] sm:$0xff] %v2493_v31  ;;  %v2411_v8 = vsel %vm2366_vm1, %v6567_v11, %v2346_v28  ;;  %vm6570_vm3 = vcmp.eq.s32.totalorder %v6293_v3, %v6569_v61  ;;  %v6572_v37 = vcvt.s32.f32 %v6571_v54  ;;  %vm2170_vm4 = vcmp.eq.s32.totalorder %v6293_v3, %v2099_v32 }
 0x4d8   : > { %v1466_v29 = vsel %vm6570_vm3, %v6568_v16, 0.0  ;;  %v2476_v51 = vsel %vm2431_vm2, %v2444_v57, %v2411_v8  ;;  %v2398_v25 = vcvt.s32.f32 %v6573_v56  ;;  %v2202_v46 = vsel %vm2170_vm4, %v6574_v4, 0.0 }
 0x4d9   : > { %v2414_v38 = vsel %vm2366_vm1, %v6572_v37, %v2349_v40  ;;  %2508 = vst [vmem:[%s5340_s10 + $0x60] sm:$0xff] %v2476_v51  ;;  %vm2173_vm5 = vcmp.eq.s32.totalorder %v6293_v3, %v2141_v6  ;;  %vm6576_vm6 = vcmp.eq.s32.totalorder %v6293_v3, %v6573_v56  ;;  %v2234_v9 = vadd.f32 %v2202_v46, %v1466_v29 }
 0x4da   : > { %v2479_v24 = vsel %vm2431_vm2, %v2447_v23, %v2414_v38  ;;  %v1469_v48 = vsel %vm6576_vm6, %v6575_v2, 0.0  ;;  %v2205_v59 = vsel %vm2173_vm5, %v6577_v53, 0.0  ;;  %vm2156_vm7 = vcmp.eq.s32.totalorder %v6293_v3, %v1903_v50 }
 0x4db   : > { %2511 = vst [vmem:[%s5340_s10 + $0x78] sm:$0xff] %v2479_v24  ;;  %vm6580_vm8 = vcmp.eq.s32.totalorder %v6293_v3, %v6579_v5  ;;  %v2237_v62 = vadd.f32 %v2205_v59, %v1469_v48  ;;  %v2188_v39 = vsel %vm2156_vm7, %v6581_v47, 0.0  ;;  %vm2172_vm9 = vcmp.eq.s32.totalorder %v6293_v3, %v2127_v44 }
 0x4dc   : > { %v1452_v35 = vsel %vm6580_vm8, %v6578_v43, 0.0  ;;  %vm6584_vm10 = vcmp.eq.s32.totalorder %v6293_v3, %v6583_v14  ;;  %v2362_v63 = vmul.f32 %v6585_v36, %v2234_v9  ;;  %v2204_v27 = vsel %vm2172_vm9, %v6586_v30, 0.0 }
 0x4dd   : > { %v1468_v49 = vsel %vm6584_vm10, %v6582_v22, 0.0  ;;  %v2220_v57 = vadd.f32 %v2188_v39, %v1452_v35  ;;  %v2381_v26 = vcvt.s32.f32 %v6579_v5  ;;  %v2460_v13 = vcvt.s32.f32 %v2099_v32 }
 0x4de   : > { %v2365_v41 = vmul.f32 %v6587_v7, %v2237_v62  ;;  %v2236_v52 = vadd.f32 %v2204_v27, %v1468_v49  ;;  %v2397_v55 = vcvt.s32.f32 %v6583_v14  ;;  %v6588_v58 = vcvt.s32.f32 %v6569_v61 }
 0x4df   : > { %v2463_v1 = vcvt.s32.f32 %v2141_v6  ;;  %v2348_v33 = vmul.f32 %v6589_v20, %v2220_v57  ;;  %v2446_v15 = vcvt.s32.f32 %v1903_v50  ;;  %v2462_v60 = vcvt.s32.f32 %v2127_v44 }
 0x4e0   : > { %v2427_v18 = vsel %vm2366_vm1, %v6588_v58, %v2362_v63  ;;  %v2430_v0 = vsel %vm2366_vm1, %v2398_v25, %v2365_v41  ;;  %v2364_v42 = vmul.f32 %v6590_v21, %v2236_v52 }
 0x4e1   : > { %v2492_v10 = vsel %vm2431_vm2, %v2460_v13, %v2427_v18  ;;  %v2495_v34 = vsel %vm2431_vm2, %v2463_v1, %v2430_v0  ;;  %v2413_v28 = vsel %vm2366_vm1, %v2381_v26, %v2348_v33 }
 0x4e2   : > { %2524 = vst [vmem:[%s5340_s10 + $0xe0] sm:$0xff] %v2492_v10  ;;  %2527 = vst [vmem:[%s5340_s10 + $0xf8] sm:$0xff] %v2495_v34  ;;  %v2478_v17 = vsel %vm2431_vm2, %v2446_v15, %v2413_v28  ;;  %v2429_v31 = vsel %vm2366_vm1, %v2397_v55, %v2364_v42 }
 0x4e3   : > { %2510 = vst [vmem:[%s5340_s10 + $0x70] sm:$0xff] %v2478_v17  ;;  %v2494_v19 = vsel %vm2431_vm2, %v2462_v60, %v2429_v31 }
 0x4e4   : > { %2526 = vst [vmem:[%s5340_s10 + $0xf0] sm:$0xff] %v2494_v19 }
 0x4e5   : > { %3024 = shalt.err (!%p3021_p3)
}
 0x4e6   : > { %s3025_s28 = scalar_lea.hbm %s5723_s14, 4096  ;;  %s3029_s5 = scalar_lea.hbm %s5783_s4, 8192 }
 0x4e7   : > { %p3026_p4 = scmp.ne.s32.totalorder %s5723_s14, %s3025_s28  ;;  %p3030_p9 = scmp.lt.u32.totalorder %s5723_s14, %s5783_s4 }
 0x4e8   : > { %p3031_p10 = scmp.lt.u32.totalorder %s3029_s5, %s3025_s28  ;;  %p3033_p12 = scmp.lt.u32.totalorder %s3025_s28, %s5723_s14 }
 0x4e9   : > { %p3027_p7 = pnand %p3026_p4, %p3144_p5 }
 0x4ea   : > { %p3032_p11 = por %p3031_p10, %p3030_p9 }
 0x4eb   : > { %p3028_p8 = pneg %p3027_p7 }
 0x4ec   : > { %p3034_p13 = por %p3033_p12, %p3032_p11 }
 0x4ee   : > { %p3035_p0 = pnand %p3034_p13, %p3028_p8 }
 0x4f0   : > { %3038 = shalt.err (!%p3035_p0)
}
 0x4f1   : > { %s3076_s8 = smov 128   ;;  %s3077_s9 = smov 8  }
 0x4f2   : > { %2778 = dma.vmem_to_hbm [thread:$0]  (%p3144_p5), %s5725_s12, 4096, %s5723_s14, %s5738_s15, %s3076_s8, %s3076_s8, %s3077_s9  }
 0x4f3 PF: > { %p2784_p1 = scmp.ge.s32.totalorder %s3073_s20, 2  ;;  %s2557_s10 = sand.u32 1, %s3061_s17  }
 0x4f4   : > { %s2558_s11 = scalar_lea.sflag [#allocation4], %s2557_s10 }
 0x4f5   : > { %p2781_p2 = pnand %p2784_p1, %p3148_p6 }
 0x4f7   : > { %3056 = dma.done.wait (!%p2781_p2), %s2558_s11, 4096  }
 0x4f8   : > { %3058 = vsyncadd (!%p2781_p2), %s2558_s11, 4294963200  ;;  %p15_p3 = scmp.ge.s32.totalorder %s3131_s22, 4   ;;  %s6591_s17 = smov %s3065_s18 }
 0x4f9   : > { %s6592_s18 = smov %s3069_s19  ;;  %s6593_s19 = smov %s3142_s25 }
 0x4fa   : > { %s6594_s20 = smov %s3131_s22  ;;  %17 = sbr.rel (!%p15_p3) target bundleno = 5 (0x5), region = 71 }
 0x501   :  { %2563 = vsyncpa [#allocation4], 1 }
 0x502   :  { %2565 = vsyncpa [#allocation4 + $0x1], 1 }

</bundles_post_ra>
